<compile_context>
chip_gen: v7x
topology: tpu7x:2x2x1
jax: 0.10.0
libtpu: 0.0.40
codegen_flags: <defaults>
</compile_context>

<pallas_src>
import functools

import jax
import jax.numpy as jnp
from jax.experimental import pallas as pl
from jax.experimental.pallas import tpu as pltpu


# --------------------------- fused forward kernel ---------------------------
def _onehot(tok, vocab, dtype):
    """tok: (N, 1) int32 -> (N, vocab) one-hot in `dtype`."""
    col = jax.lax.broadcasted_iota(jnp.int32, (tok.shape[0], vocab), 1)
    return (col == tok).astype(dtype)


def translator_kernel(src_tok_ref, dec_tok_ref, tgt_ref, valid_ref,
                      emb_enc_ref, wih_enc_ref, whh_enc_ref, b_enc_ref,
                      emb_dec_ref, wih_dec_ref, whh_dec_ref, b_dec_ref,
                      w_out_ref, b_out_ref,
                      loss_ref,
                      *, t_src, t_tgt, batch, batch_pad, hidden, vocab):
    Bp, H, V = batch_pad, hidden, vocab
    bf16 = jnp.bfloat16

    def cell(gx, whh, h, c):
        # gx already holds x @ W_ih^T + (b_ih + b_hh); only the recurrent matmul
        # remains inside the time loop.  h is carried in f32 and cast to bf16
        # only at the MXU dot site.
        # TODO(synk): verify in the bundle dump that Mosaic keeps whh staged in
        # MXU weight registers across the unrolled steps; if not, drive it with
        # pltpu.matmul_push_rhs / matmul_acc_lhs / matmul_pop.
        gates = gx + jnp.dot(h.astype(bf16), whh, preferred_element_type=jnp.float32)
        i = jax.nn.sigmoid(gates[:, 0 * H:1 * H])
        f = jax.nn.sigmoid(gates[:, 1 * H:2 * H])
        g = jnp.tanh(gates[:, 2 * H:3 * H])
        o = jax.nn.sigmoid(gates[:, 3 * H:4 * H])
        c_new = f * c + i * g
        h_new = o * jnp.tanh(c_new)
        return h_new, c_new

    # ------------------------------ Encoder ------------------------------
    # Embedding lookup fused into the input projection as a one-hot matmul
    # (onehot(tok) @ (E @ W_ih^T) == emb[tok] @ W_ih^T); hoisted out of the
    # recurrence, bias folded in once.
    # TODO(synk): for real vocab sizes replace the one-hot matmul with a row
    # gather (scalar-prefetch token ids / pl.Element) + one (T*Bp,E)@(E,4H) dot.
    emb_proj_enc = jnp.dot(emb_enc_ref[...], wih_enc_ref[...],
                           preferred_element_type=jnp.float32)             # (V, 4H)
    gates_x_enc = (jnp.dot(_onehot(src_tok_ref[...], V, bf16),
                           emb_proj_enc.astype(bf16),
                           preferred_element_type=jnp.float32)
                   + b_enc_ref[...])                                       # (Tsrc*Bp, 4H)
    whh_enc = whh_enc_ref[...]                                             # bf16 (H, 4H)

    h = jnp.zeros((Bp, H), jnp.float32)
    c = jnp.zeros((Bp, H), jnp.float32)
    # TODO(synk): at real H/Bp switch to lax.fori_loop(unroll=2..4) with h/c in
    # VMEM scratch once vreg spills appear; fully unrolled is right at toy sizes.
    for t in range(t_src):                  # fully unrolled; h/c live in vregs
        h, c = cell(gates_x_enc[t * Bp:(t + 1) * Bp, :], whh_enc, h, c)

    # ------------------------------ Decoder ------------------------------
    emb_proj_dec = jnp.dot(emb_dec_ref[...], wih_dec_ref[...],
                           preferred_element_type=jnp.float32)             # (V, 4H)
    gates_x_dec = (jnp.dot(_onehot(dec_tok_ref[...], V, bf16),
                           emb_proj_dec.astype(bf16),
                           preferred_element_type=jnp.float32)
                   + b_dec_ref[...])                                       # (Ttgt*Bp, 4H)
    whh_dec = whh_dec_ref[...]

    hs = []
    for t in range(t_tgt):                  # fully unrolled decoder steps
        h, c = cell(gates_x_dec[t * Bp:(t + 1) * Bp, :], whh_dec, h, c)
        hs.append(h)
    hs_all = jnp.concatenate(hs, axis=0)                                   # (Ttgt*Bp, H)

    # ---- Vocab projection + cross-entropy batched over all decoder steps ----
    # TODO(synk): for real vocab sizes tile w_out / CE over a "parallel" grid
    # axis on V with an online (flash-CE) running max/sum so it fits v7x's
    # 64 MiB VMEM and uses its second TensorCore.
    logits = (jnp.dot(hs_all.astype(bf16), w_out_ref[...],
                      preferred_element_type=jnp.float32)
              + b_out_ref[...])                                            # (Ttgt*Bp, V)
    m = jnp.max(logits, axis=-1, keepdims=True)
    lse = m + jnp.log(jnp.sum(jnp.exp(logits - m), axis=-1, keepdims=True))
    col_v = jax.lax.broadcasted_iota(jnp.int32, (t_tgt * Bp, V), 1)
    onehot_tgt = (col_v == tgt_ref[...]).astype(jnp.float32)
    picked = jnp.sum(logits * onehot_tgt, axis=-1, keepdims=True)          # (Ttgt*Bp, 1)

    total = jnp.zeros((1, 1), jnp.float32) + jnp.sum(valid_ref[...] * (lse - picked))
    loss_ref[...] = total * (1.0 / float(t_tgt * batch))


# ------------------------------- glue / wrapper ------------------------------
def _time_major_padded(tok_bt, batch_pad):
    """(B, T) int -> (T*batch_pad, 1) int32, time-major, pad rows filled with 0."""
    B, T = tok_bt.shape
    tok_tm = tok_bt.T.astype(jnp.int32)                                    # (T, B)
    pad = jnp.zeros((T, batch_pad - B), jnp.int32)
    return jnp.concatenate([tok_tm, pad], axis=1).reshape(T * batch_pad, 1)


def translator_loss(params, tokens, dec_input, dec_target):
    B, T_src = tokens.shape
    _, T_tgt = dec_input.shape
    H = params["whh_enc"].shape[0]
    E = params["emb_enc"].shape[1]
    V = params["emb_enc"].shape[0]
    Bp = max(8, ((B + 7) // 8) * 8)          # pad batch to a full f32 sublane tile

    src_tok = _time_major_padded(tokens, Bp)
    dec_tok = _time_major_padded(dec_input, Bp)
    tgt = _time_major_padded(dec_target, Bp)
    # Pad-row mask for the loss, built host-side (tiny).
    valid = jnp.tile((jnp.arange(Bp) < B).astype(jnp.float32),
                     (T_tgt,)).reshape(T_tgt * Bp, 1)

    bf16 = jnp.bfloat16
    kernel = functools.partial(translator_kernel, t_src=T_src, t_tgt=T_tgt,
                               batch=B, batch_pad=Bp, hidden=H, vocab=V)

    # Advisory cost estimate so XLA can schedule around the fused call.
    flops = 2 * (2 * V * E * 4 * H
                 + (T_src + T_tgt) * Bp * V * 4 * H
                 + (T_src + T_tgt) * Bp * H * 4 * H
                 + T_tgt * Bp * H * V)
    transcendentals = (T_src + T_tgt) * Bp * 4 * H + 2 * T_tgt * Bp * V
    bytes_accessed = (2 * (2 * V * E + 2 * E * 4 * H + 2 * H * 4 * H + H * V)  # bf16 weights
                      + 4 * (2 * 4 * H + V)                                    # f32 biases
                      + 4 * ((T_src + 2 * T_tgt) * Bp + T_tgt * Bp) + 4)       # tokens/mask/loss

    out = pl.pallas_call(
        kernel,
        out_shape=jax.ShapeDtypeStruct((1, 1), jnp.float32),
        compiler_params=pltpu.CompilerParams(
            # v5e's scoped-VMEM default is only 16 MiB; 32 MiB is safe on all gens.
            vmem_limit_bytes=32 * 1024 * 1024),
        cost_estimate=pl.CostEstimate(flops=flops,
                                      transcendentals=transcendentals,
                                      bytes_accessed=bytes_accessed),
    )(src_tok, dec_tok, tgt, valid,
      params["emb_enc"].astype(bf16), params["wih_enc"].astype(bf16),
      params["whh_enc"].astype(bf16), params["b_enc"],
      params["emb_dec"].astype(bf16), params["wih_dec"].astype(bf16),
      params["whh_dec"].astype(bf16), params["b_dec"],
      params["w_out"].astype(bf16), params["b_out"])
    return out[0, 0]


# ------------------------------ parameter init -------------------------------
def init_params(key, vocab, emb, hidden):
    ks = jax.random.split(key, 10)
    s = 0.1
    return {
        "emb_enc": s * jax.random.normal(ks[0], (vocab, emb), jnp.float32),
        "wih_enc": s * jax.random.normal(ks[1], (emb, 4 * hidden), jnp.float32),
        "whh_enc": s * jax.random.normal(ks[2], (hidden, 4 * hidden), jnp.float32),
        "b_enc":   s * jax.random.normal(ks[3], (1, 4 * hidden), jnp.float32),
        "emb_dec": s * jax.random.normal(ks[4], (vocab, emb), jnp.float32),
        "wih_dec": s * jax.random.normal(ks[5], (emb, 4 * hidden), jnp.float32),
        "whh_dec": s * jax.random.normal(ks[6], (hidden, 4 * hidden), jnp.float32),
        "b_dec":   s * jax.random.normal(ks[7], (1, 4 * hidden), jnp.float32),
        "w_out":   s * jax.random.normal(ks[8], (hidden, vocab), jnp.float32),
        "b_out":   s * jax.random.normal(ks[9], (1, vocab), jnp.float32),
    }


# ------------------------------ pure-JAX reference ---------------------------
def translator_loss_ref(params, tokens, dec_input, dec_target):
    B = tokens.shape[0]
    H = params["whh_enc"].shape[0]

    def run_lstm(x_emb, wih, whh, b, h0, c0):
        def step(carry, x):
            h, c = carry
            gates = x @ wih + h @ whh + b[0]
            i = jax.nn.sigmoid(gates[:, 0 * H:1 * H])
            f = jax.nn.sigmoid(gates[:, 1 * H:2 * H])
            g = jnp.tanh(gates[:, 2 * H:3 * H])
            o = jax.nn.sigmoid(gates[:, 3 * H:4 * H])
            c = f * c + i * g
            h = o * jnp.tanh(c)
            return (h, c), h
        (hT, cT), hs = jax.lax.scan(step, (h0, c0), x_emb)
        return hs, hT, cT

    enc_emb = jnp.take(params["emb_enc"], tokens.T, axis=0)               # (T, B, E)
    zeros = jnp.zeros((B, H), jnp.float32)
    _, h_ctx, c_ctx = run_lstm(enc_emb, params["wih_enc"], params["whh_enc"],
                               params["b_enc"], zeros, zeros)

    dec_emb = jnp.take(params["emb_dec"], dec_input.T, axis=0)            # (T, B, E)
    hs, _, _ = run_lstm(dec_emb, params["wih_dec"], params["whh_dec"],
                        params["b_dec"], h_ctx, c_ctx)                    # (T, B, H)

    logits = jnp.einsum("tbh,hv->tbv", hs, params["w_out"]) + params["b_out"][0]
    logp = jax.nn.log_softmax(logits, axis=-1)
    tgt_tm = dec_target.T.astype(jnp.int32)                               # (T, B)
    nll = -jnp.take_along_axis(logp, tgt_tm[..., None], axis=-1)[..., 0]
    return jnp.mean(nll)                      # same set of B*T samples as torch


# ---------------------------------- main -------------------------------------
if __name__ == "__main__":
    # H = 128 so each gate slice is a full 128-lane (vreg-aligned) slice.
    VOCAB, EMB, HIDDEN = 16, 32, 128
    B, T_SRC, T_TGT = 2, 8, 8

    key = jax.random.PRNGKey(0)
    kp, k1, k2, k3 = jax.random.split(key, 4)
    params = init_params(kp, VOCAB, EMB, HIDDEN)

    tokens = jax.random.randint(k1, (B, T_SRC), 0, VOCAB, dtype=jnp.int32)
    dec_input = jax.random.randint(k2, (B, T_TGT), 0, VOCAB, dtype=jnp.int32)
    dec_target = jax.random.randint(k3, (B, T_TGT), 0, VOCAB, dtype=jnp.int32)

    loss = jax.block_until_ready(translator_loss(params, tokens, dec_input, dec_target))
    loss_ref = jax.block_until_ready(
        translator_loss_ref(params, tokens, dec_input, dec_target))

    # Tolerance accounts for bf16 MXU operands (f32 accumulation) vs. the f32 reference.
    assert jnp.allclose(loss, loss_ref, rtol=3e-2, atol=3e-2), (loss, loss_ref)

    # TODO(synk): eval-mode greedy decode (infer_token loop with early STOP break)
    # is host-side dynamic control flow over single tokens; not expressed as a kernel.
    print("KERNEL_OK")
</pallas_src>

<mosaic_0001>
module attributes {stable_mosaic.version = 11 : i64} {
  func.func @translator_kernel(%arg0: memref<64x1xi32, #tpu.memory_space<vmem>>, %arg1: memref<64x1xi32, #tpu.memory_space<vmem>>, %arg2: memref<64x1xi32, #tpu.memory_space<vmem>>, %arg3: memref<64x1xf32, #tpu.memory_space<vmem>>, %arg4: memref<16x32xbf16, #tpu.memory_space<vmem>>, %arg5: memref<32x512xbf16, #tpu.memory_space<vmem>>, %arg6: memref<128x512xbf16, #tpu.memory_space<vmem>>, %arg7: memref<1x512xf32, #tpu.memory_space<vmem>>, %arg8: memref<16x32xbf16, #tpu.memory_space<vmem>>, %arg9: memref<32x512xbf16, #tpu.memory_space<vmem>>, %arg10: memref<128x512xbf16, #tpu.memory_space<vmem>>, %arg11: memref<1x512xf32, #tpu.memory_space<vmem>>, %arg12: memref<128x16xbf16, #tpu.memory_space<vmem>>, %arg13: memref<1x16xf32, #tpu.memory_space<vmem>>, %arg14: memref<1x1xf32, #tpu.memory_space<vmem>>) attributes {dimension_semantics = [], scalar_prefetch = 0 : i64, scratch_operands = 0 : i64, tpu.core_type = #tpu.core_type<tc>} {
    %c0 = arith.constant 0 : index
    %c0_0 = arith.constant 0 : index
    %0 = vector.load %arg4[%c0, %c0_0] : memref<16x32xbf16, #tpu.memory_space<vmem>>, vector<16x32xbf16>
    %c0_1 = arith.constant 0 : index
    %c0_2 = arith.constant 0 : index
    %1 = vector.load %arg5[%c0_1, %c0_2] : memref<32x512xbf16, #tpu.memory_space<vmem>>, vector<32x512xbf16>
    %cst = arith.constant dense<0.000000e+00> : vector<16x512xf32>
    %2 = tpu.matmul %0, %1, %cst {dimension_numbers = #tpu.dot_dimension_numbers<[1], [0], [0], [1], [0, 0, 1, 1], [], []>} : vector<16x32xbf16>, vector<32x512xbf16>, vector<16x512xf32> -> vector<16x512xf32>
    %c0_3 = arith.constant 0 : index
    %c0_4 = arith.constant 0 : index
    %3 = vector.load %arg0[%c0_3, %c0_4] : memref<64x1xi32, #tpu.memory_space<vmem>>, vector<64x1xi32>
    %4 = tpu.iota {dimensions = array<i32: 1>} : vector<64x16xi32>
    %5 = vector.broadcast %3 : vector<64x1xi32> to vector<64x16xi32>
    %6 = arith.cmpi eq, %4, %5 : vector<64x16xi32>
    %7 = arith.extui %6 : vector<64x16xi1> to vector<64x16xi32>
    %8 = arith.sitofp %7 : vector<64x16xi32> to vector<64x16xf32>
    %9 = arith.truncf %8 : vector<64x16xf32> to vector<64x16xbf16>
    %10 = arith.truncf %2 : vector<16x512xf32> to vector<16x512xbf16>
    %cst_5 = arith.constant dense<0.000000e+00> : vector<64x512xf32>
    %11 = tpu.matmul %9, %10, %cst_5 {dimension_numbers = #tpu.dot_dimension_numbers<[1], [0], [0], [1], [0, 0, 1, 1], [], []>} : vector<64x16xbf16>, vector<16x512xbf16>, vector<64x512xf32> -> vector<64x512xf32>
    %c0_6 = arith.constant 0 : index
    %c0_7 = arith.constant 0 : index
    %12 = vector.load %arg7[%c0_6, %c0_7] : memref<1x512xf32, #tpu.memory_space<vmem>>, vector<1x512xf32>
    %13 = vector.broadcast %12 : vector<1x512xf32> to vector<64x512xf32>
    %14 = arith.addf %11, %13 : vector<64x512xf32>
    %c0_8 = arith.constant 0 : index
    %c0_9 = arith.constant 0 : index
    %15 = vector.load %arg6[%c0_8, %c0_9] : memref<128x512xbf16, #tpu.memory_space<vmem>>, vector<128x512xbf16>
    %cst_10 = arith.constant 0.000000e+00 : f32
    %16 = vector.broadcast %cst_10 : f32 to vector<8x128xf32>
    %cst_11 = arith.constant 0.000000e+00 : f32
    %17 = vector.broadcast %cst_11 : f32 to vector<8x128xf32>
    %18 = vector.extract_strided_slice %14 {offsets = [0, 0], sizes = [8, 512], strides = [1, 1]} : vector<64x512xf32> to vector<8x512xf32>
    %19 = arith.truncf %16 : vector<8x128xf32> to vector<8x128xbf16>
    %cst_12 = arith.constant dense<0.000000e+00> : vector<8x512xf32>
    %20 = tpu.matmul %19, %15, %cst_12 {dimension_numbers = #tpu.dot_dimension_numbers<[1], [0], [0], [1], [0, 0, 1, 1], [], []>} : vector<8x128xbf16>, vector<128x512xbf16>, vector<8x512xf32> -> vector<8x512xf32>
    %21 = arith.addf %18, %20 : vector<8x512xf32>
    %22 = vector.extract_strided_slice %21 {offsets = [0, 0], sizes = [8, 128], strides = [1, 1]} : vector<8x512xf32> to vector<8x128xf32>
    %23 = arith.negf %22 : vector<8x128xf32>
    %24 = math.exp %23 : vector<8x128xf32>
    %cst_13 = arith.constant 1.000000e+00 : f32
    %25 = vector.broadcast %cst_13 : f32 to vector<8x128xf32>
    %26 = arith.addf %25, %24 : vector<8x128xf32>
    %27 = arith.divf %25, %26 : vector<8x128xf32>
    %28 = vector.extract_strided_slice %21 {offsets = [0, 128], sizes = [8, 128], strides = [1, 1]} : vector<8x512xf32> to vector<8x128xf32>
    %29 = arith.negf %28 : vector<8x128xf32>
    %30 = math.exp %29 : vector<8x128xf32>
    %cst_14 = arith.constant 1.000000e+00 : f32
    %31 = vector.broadcast %cst_14 : f32 to vector<8x128xf32>
    %32 = arith.addf %31, %30 : vector<8x128xf32>
    %33 = arith.divf %31, %32 : vector<8x128xf32>
    %34 = vector.extract_strided_slice %21 {offsets = [0, 256], sizes = [8, 128], strides = [1, 1]} : vector<8x512xf32> to vector<8x128xf32>
    %35 = math.tanh %34 : vector<8x128xf32>
    %36 = vector.extract_strided_slice %21 {offsets = [0, 384], sizes = [8, 128], strides = [1, 1]} : vector<8x512xf32> to vector<8x128xf32>
    %37 = arith.negf %36 : vector<8x128xf32>
    %38 = math.exp %37 : vector<8x128xf32>
    %cst_15 = arith.constant 1.000000e+00 : f32
    %39 = vector.broadcast %cst_15 : f32 to vector<8x128xf32>
    %40 = arith.addf %39, %38 : vector<8x128xf32>
    %41 = arith.divf %39, %40 : vector<8x128xf32>
    %42 = arith.mulf %33, %17 : vector<8x128xf32>
    %43 = arith.mulf %27, %35 : vector<8x128xf32>
    %44 = arith.addf %42, %43 : vector<8x128xf32>
    %45 = math.tanh %44 : vector<8x128xf32>
    %46 = arith.mulf %41, %45 : vector<8x128xf32>
    %47 = vector.extract_strided_slice %14 {offsets = [8, 0], sizes = [8, 512], strides = [1, 1]} : vector<64x512xf32> to vector<8x512xf32>
    %48 = arith.truncf %46 : vector<8x128xf32> to vector<8x128xbf16>
    %cst_16 = arith.constant dense<0.000000e+00> : vector<8x512xf32>
    %49 = tpu.matmul %48, %15, %cst_16 {dimension_numbers = #tpu.dot_dimension_numbers<[1], [0], [0], [1], [0, 0, 1, 1], [], []>} : vector<8x128xbf16>, vector<128x512xbf16>, vector<8x512xf32> -> vector<8x512xf32>
    %50 = arith.addf %47, %49 : vector<8x512xf32>
    %51 = vector.extract_strided_slice %50 {offsets = [0, 0], sizes = [8, 128], strides = [1, 1]} : vector<8x512xf32> to vector<8x128xf32>
    %52 = arith.negf %51 : vector<8x128xf32>
    %53 = math.exp %52 : vector<8x128xf32>
    %cst_17 = arith.constant 1.000000e+00 : f32
    %54 = vector.broadcast %cst_17 : f32 to vector<8x128xf32>
    %55 = arith.addf %54, %53 : vector<8x128xf32>
    %56 = arith.divf %54, %55 : vector<8x128xf32>
    %57 = vector.extract_strided_slice %50 {offsets = [0, 128], sizes = [8, 128], strides = [1, 1]} : vector<8x512xf32> to vector<8x128xf32>
    %58 = arith.negf %57 : vector<8x128xf32>
    %59 = math.exp %58 : vector<8x128xf32>
    %cst_18 = arith.constant 1.000000e+00 : f32
    %60 = vector.broadcast %cst_18 : f32 to vector<8x128xf32>
    %61 = arith.addf %60, %59 : vector<8x128xf32>
    %62 = arith.divf %60, %61 : vector<8x128xf32>
    %63 = vector.extract_strided_slice %50 {offsets = [0, 256], sizes = [8, 128], strides = [1, 1]} : vector<8x512xf32> to vector<8x128xf32>
    %64 = math.tanh %63 : vector<8x128xf32>
    %65 = vector.extract_strided_slice %50 {offsets = [0, 384], sizes = [8, 128], strides = [1, 1]} : vector<8x512xf32> to vector<8x128xf32>
    %66 = arith.negf %65 : vector<8x128xf32>
    %67 = math.exp %66 : vector<8x128xf32>
    %cst_19 = arith.constant 1.000000e+00 : f32
    %68 = vector.broadcast %cst_19 : f32 to vector<8x128xf32>
    %69 = arith.addf %68, %67 : vector<8x128xf32>
    %70 = arith.divf %68, %69 : vector<8x128xf32>
    %71 = arith.mulf %62, %44 : vector<8x128xf32>
    %72 = arith.mulf %56, %64 : vector<8x128xf32>
    %73 = arith.addf %71, %72 : vector<8x128xf32>
    %74 = math.tanh %73 : vector<8x128xf32>
    %75 = arith.mulf %70, %74 : vector<8x128xf32>
    %76 = vector.extract_strided_slice %14 {offsets = [16, 0], sizes = [8, 512], strides = [1, 1]} : vector<64x512xf32> to vector<8x512xf32>
    %77 = arith.truncf %75 : vector<8x128xf32> to vector<8x128xbf16>
    %cst_20 = arith.constant dense<0.000000e+00> : vector<8x512xf32>
    %78 = tpu.matmul %77, %15, %cst_20 {dimension_numbers = #tpu.dot_dimension_numbers<[1], [0], [0], [1], [0, 0, 1, 1], [], []>} : vector<8x128xbf16>, vector<128x512xbf16>, vector<8x512xf32> -> vector<8x512xf32>
    %79 = arith.addf %76, %78 : vector<8x512xf32>
    %80 = vector.extract_strided_slice %79 {offsets = [0, 0], sizes = [8, 128], strides = [1, 1]} : vector<8x512xf32> to vector<8x128xf32>
    %81 = arith.negf %80 : vector<8x128xf32>
    %82 = math.exp %81 : vector<8x128xf32>
    %cst_21 = arith.constant 1.000000e+00 : f32
    %83 = vector.broadcast %cst_21 : f32 to vector<8x128xf32>
    %84 = arith.addf %83, %82 : vector<8x128xf32>
    %85 = arith.divf %83, %84 : vector<8x128xf32>
    %86 = vector.extract_strided_slice %79 {offsets = [0, 128], sizes = [8, 128], strides = [1, 1]} : vector<8x512xf32> to vector<8x128xf32>
    %87 = arith.negf %86 : vector<8x128xf32>
    %88 = math.exp %87 : vector<8x128xf32>
    %cst_22 = arith.constant 1.000000e+00 : f32
    %89 = vector.broadcast %cst_22 : f32 to vector<8x128xf32>
    %90 = arith.addf %89, %88 : vector<8x128xf32>
    %91 = arith.divf %89, %90 : vector<8x128xf32>
    %92 = vector.extract_strided_slice %79 {offsets = [0, 256], sizes = [8, 128], strides = [1, 1]} : vector<8x512xf32> to vector<8x128xf32>
    %93 = math.tanh %92 : vector<8x128xf32>
    %94 = vector.extract_strided_slice %79 {offsets = [0, 384], sizes = [8, 128], strides = [1, 1]} : vector<8x512xf32> to vector<8x128xf32>
    %95 = arith.negf %94 : vector<8x128xf32>
    %96 = math.exp %95 : vector<8x128xf32>
    %cst_23 = arith.constant 1.000000e+00 : f32
    %97 = vector.broadcast %cst_23 : f32 to vector<8x128xf32>
    %98 = arith.addf %97, %96 : vector<8x128xf32>
    %99 = arith.divf %97, %98 : vector<8x128xf32>
    %100 = arith.mulf %91, %73 : vector<8x128xf32>
    %101 = arith.mulf %85, %93 : vector<8x128xf32>
    %102 = arith.addf %100, %101 : vector<8x128xf32>
    %103 = math.tanh %102 : vector<8x128xf32>
    %104 = arith.mulf %99, %103 : vector<8x128xf32>
    %105 = vector.extract_strided_slice %14 {offsets = [24, 0], sizes = [8, 512], strides = [1, 1]} : vector<64x512xf32> to vector<8x512xf32>
    %106 = arith.truncf %104 : vector<8x128xf32> to vector<8x128xbf16>
    %cst_24 = arith.constant dense<0.000000e+00> : vector<8x512xf32>
    %107 = tpu.matmul %106, %15, %cst_24 {dimension_numbers = #tpu.dot_dimension_numbers<[1], [0], [0], [1], [0, 0, 1, 1], [], []>} : vector<8x128xbf16>, vector<128x512xbf16>, vector<8x512xf32> -> vector<8x512xf32>
    %108 = arith.addf %105, %107 : vector<8x512xf32>
    %109 = vector.extract_strided_slice %108 {offsets = [0, 0], sizes = [8, 128], strides = [1, 1]} : vector<8x512xf32> to vector<8x128xf32>
    %110 = arith.negf %109 : vector<8x128xf32>
    %111 = math.exp %110 : vector<8x128xf32>
    %cst_25 = arith.constant 1.000000e+00 : f32
    %112 = vector.broadcast %cst_25 : f32 to vector<8x128xf32>
    %113 = arith.addf %112, %111 : vector<8x128xf32>
    %114 = arith.divf %112, %113 : vector<8x128xf32>
    %115 = vector.extract_strided_slice %108 {offsets = [0, 128], sizes = [8, 128], strides = [1, 1]} : vector<8x512xf32> to vector<8x128xf32>
    %116 = arith.negf %115 : vector<8x128xf32>
    %117 = math.exp %116 : vector<8x128xf32>
    %cst_26 = arith.constant 1.000000e+00 : f32
    %118 = vector.broadcast %cst_26 : f32 to vector<8x128xf32>
    %119 = arith.addf %118, %117 : vector<8x128xf32>
    %120 = arith.divf %118, %119 : vector<8x128xf32>
    %121 = vector.extract_strided_slice %108 {offsets = [0, 256], sizes = [8, 128], strides = [1, 1]} : vector<8x512xf32> to vector<8x128xf32>
    %122 = math.tanh %121 : vector<8x128xf32>
    %123 = vector.extract_strided_slice %108 {offsets = [0, 384], sizes = [8, 128], strides = [1, 1]} : vector<8x512xf32> to vector<8x128xf32>
    %124 = arith.negf %123 : vector<8x128xf32>
    %125 = math.exp %124 : vector<8x128xf32>
    %cst_27 = arith.constant 1.000000e+00 : f32
    %126 = vector.broadcast %cst_27 : f32 to vector<8x128xf32>
    %127 = arith.addf %126, %125 : vector<8x128xf32>
    %128 = arith.divf %126, %127 : vector<8x128xf32>
    %129 = arith.mulf %120, %102 : vector<8x128xf32>
    %130 = arith.mulf %114, %122 : vector<8x128xf32>
    %131 = arith.addf %129, %130 : vector<8x128xf32>
    %132 = math.tanh %131 : vector<8x128xf32>
    %133 = arith.mulf %128, %132 : vector<8x128xf32>
    %134 = vector.extract_strided_slice %14 {offsets = [32, 0], sizes = [8, 512], strides = [1, 1]} : vector<64x512xf32> to vector<8x512xf32>
    %135 = arith.truncf %133 : vector<8x128xf32> to vector<8x128xbf16>
    %cst_28 = arith.constant dense<0.000000e+00> : vector<8x512xf32>
    %136 = tpu.matmul %135, %15, %cst_28 {dimension_numbers = #tpu.dot_dimension_numbers<[1], [0], [0], [1], [0, 0, 1, 1], [], []>} : vector<8x128xbf16>, vector<128x512xbf16>, vector<8x512xf32> -> vector<8x512xf32>
    %137 = arith.addf %134, %136 : vector<8x512xf32>
    %138 = vector.extract_strided_slice %137 {offsets = [0, 0], sizes = [8, 128], strides = [1, 1]} : vector<8x512xf32> to vector<8x128xf32>
    %139 = arith.negf %138 : vector<8x128xf32>
    %140 = math.exp %139 : vector<8x128xf32>
    %cst_29 = arith.constant 1.000000e+00 : f32
    %141 = vector.broadcast %cst_29 : f32 to vector<8x128xf32>
    %142 = arith.addf %141, %140 : vector<8x128xf32>
    %143 = arith.divf %141, %142 : vector<8x128xf32>
    %144 = vector.extract_strided_slice %137 {offsets = [0, 128], sizes = [8, 128], strides = [1, 1]} : vector<8x512xf32> to vector<8x128xf32>
    %145 = arith.negf %144 : vector<8x128xf32>
    %146 = math.exp %145 : vector<8x128xf32>
    %cst_30 = arith.constant 1.000000e+00 : f32
    %147 = vector.broadcast %cst_30 : f32 to vector<8x128xf32>
    %148 = arith.addf %147, %146 : vector<8x128xf32>
    %149 = arith.divf %147, %148 : vector<8x128xf32>
    %150 = vector.extract_strided_slice %137 {offsets = [0, 256], sizes = [8, 128], strides = [1, 1]} : vector<8x512xf32> to vector<8x128xf32>
    %151 = math.tanh %150 : vector<8x128xf32>
    %152 = vector.extract_strided_slice %137 {offsets = [0, 384], sizes = [8, 128], strides = [1, 1]} : vector<8x512xf32> to vector<8x128xf32>
    %153 = arith.negf %152 : vector<8x128xf32>
    %154 = math.exp %153 : vector<8x128xf32>
    %cst_31 = arith.constant 1.000000e+00 : f32
    %155 = vector.broadcast %cst_31 : f32 to vector<8x128xf32>
    %156 = arith.addf %155, %154 : vector<8x128xf32>
    %157 = arith.divf %155, %156 : vector<8x128xf32>
    %158 = arith.mulf %149, %131 : vector<8x128xf32>
    %159 = arith.mulf %143, %151 : vector<8x128xf32>
    %160 = arith.addf %158, %159 : vector<8x128xf32>
    %161 = math.tanh %160 : vector<8x128xf32>
    %162 = arith.mulf %157, %161 : vector<8x128xf32>
    %163 = vector.extract_strided_slice %14 {offsets = [40, 0], sizes = [8, 512], strides = [1, 1]} : vector<64x512xf32> to vector<8x512xf32>
    %164 = arith.truncf %162 : vector<8x128xf32> to vector<8x128xbf16>
    %cst_32 = arith.constant dense<0.000000e+00> : vector<8x512xf32>
    %165 = tpu.matmul %164, %15, %cst_32 {dimension_numbers = #tpu.dot_dimension_numbers<[1], [0], [0], [1], [0, 0, 1, 1], [], []>} : vector<8x128xbf16>, vector<128x512xbf16>, vector<8x512xf32> -> vector<8x512xf32>
    %166 = arith.addf %163, %165 : vector<8x512xf32>
    %167 = vector.extract_strided_slice %166 {offsets = [0, 0], sizes = [8, 128], strides = [1, 1]} : vector<8x512xf32> to vector<8x128xf32>
    %168 = arith.negf %167 : vector<8x128xf32>
    %169 = math.exp %168 : vector<8x128xf32>
    %cst_33 = arith.constant 1.000000e+00 : f32
    %170 = vector.broadcast %cst_33 : f32 to vector<8x128xf32>
    %171 = arith.addf %170, %169 : vector<8x128xf32>
    %172 = arith.divf %170, %171 : vector<8x128xf32>
    %173 = vector.extract_strided_slice %166 {offsets = [0, 128], sizes = [8, 128], strides = [1, 1]} : vector<8x512xf32> to vector<8x128xf32>
    %174 = arith.negf %173 : vector<8x128xf32>
    %175 = math.exp %174 : vector<8x128xf32>
    %cst_34 = arith.constant 1.000000e+00 : f32
    %176 = vector.broadcast %cst_34 : f32 to vector<8x128xf32>
    %177 = arith.addf %176, %175 : vector<8x128xf32>
    %178 = arith.divf %176, %177 : vector<8x128xf32>
    %179 = vector.extract_strided_slice %166 {offsets = [0, 256], sizes = [8, 128], strides = [1, 1]} : vector<8x512xf32> to vector<8x128xf32>
    %180 = math.tanh %179 : vector<8x128xf32>
    %181 = vector.extract_strided_slice %166 {offsets = [0, 384], sizes = [8, 128], strides = [1, 1]} : vector<8x512xf32> to vector<8x128xf32>
    %182 = arith.negf %181 : vector<8x128xf32>
    %183 = math.exp %182 : vector<8x128xf32>
    %cst_35 = arith.constant 1.000000e+00 : f32
    %184 = vector.broadcast %cst_35 : f32 to vector<8x128xf32>
    %185 = arith.addf %184, %183 : vector<8x128xf32>
    %186 = arith.divf %184, %185 : vector<8x128xf32>
    %187 = arith.mulf %178, %160 : vector<8x128xf32>
    %188 = arith.mulf %172, %180 : vector<8x128xf32>
    %189 = arith.addf %187, %188 : vector<8x128xf32>
    %190 = math.tanh %189 : vector<8x128xf32>
    %191 = arith.mulf %186, %190 : vector<8x128xf32>
    %192 = vector.extract_strided_slice %14 {offsets = [48, 0], sizes = [8, 512], strides = [1, 1]} : vector<64x512xf32> to vector<8x512xf32>
    %193 = arith.truncf %191 : vector<8x128xf32> to vector<8x128xbf16>
    %cst_36 = arith.constant dense<0.000000e+00> : vector<8x512xf32>
    %194 = tpu.matmul %193, %15, %cst_36 {dimension_numbers = #tpu.dot_dimension_numbers<[1], [0], [0], [1], [0, 0, 1, 1], [], []>} : vector<8x128xbf16>, vector<128x512xbf16>, vector<8x512xf32> -> vector<8x512xf32>
    %195 = arith.addf %192, %194 : vector<8x512xf32>
    %196 = vector.extract_strided_slice %195 {offsets = [0, 0], sizes = [8, 128], strides = [1, 1]} : vector<8x512xf32> to vector<8x128xf32>
    %197 = arith.negf %196 : vector<8x128xf32>
    %198 = math.exp %197 : vector<8x128xf32>
    %cst_37 = arith.constant 1.000000e+00 : f32
    %199 = vector.broadcast %cst_37 : f32 to vector<8x128xf32>
    %200 = arith.addf %199, %198 : vector<8x128xf32>
    %201 = arith.divf %199, %200 : vector<8x128xf32>
    %202 = vector.extract_strided_slice %195 {offsets = [0, 128], sizes = [8, 128], strides = [1, 1]} : vector<8x512xf32> to vector<8x128xf32>
    %203 = arith.negf %202 : vector<8x128xf32>
    %204 = math.exp %203 : vector<8x128xf32>
    %cst_38 = arith.constant 1.000000e+00 : f32
    %205 = vector.broadcast %cst_38 : f32 to vector<8x128xf32>
    %206 = arith.addf %205, %204 : vector<8x128xf32>
    %207 = arith.divf %205, %206 : vector<8x128xf32>
    %208 = vector.extract_strided_slice %195 {offsets = [0, 256], sizes = [8, 128], strides = [1, 1]} : vector<8x512xf32> to vector<8x128xf32>
    %209 = math.tanh %208 : vector<8x128xf32>
    %210 = vector.extract_strided_slice %195 {offsets = [0, 384], sizes = [8, 128], strides = [1, 1]} : vector<8x512xf32> to vector<8x128xf32>
    %211 = arith.negf %210 : vector<8x128xf32>
    %212 = math.exp %211 : vector<8x128xf32>
    %cst_39 = arith.constant 1.000000e+00 : f32
    %213 = vector.broadcast %cst_39 : f32 to vector<8x128xf32>
    %214 = arith.addf %213, %212 : vector<8x128xf32>
    %215 = arith.divf %213, %214 : vector<8x128xf32>
    %216 = arith.mulf %207, %189 : vector<8x128xf32>
    %217 = arith.mulf %201, %209 : vector<8x128xf32>
    %218 = arith.addf %216, %217 : vector<8x128xf32>
    %219 = math.tanh %218 : vector<8x128xf32>
    %220 = arith.mulf %215, %219 : vector<8x128xf32>
    %221 = vector.extract_strided_slice %14 {offsets = [56, 0], sizes = [8, 512], strides = [1, 1]} : vector<64x512xf32> to vector<8x512xf32>
    %222 = arith.truncf %220 : vector<8x128xf32> to vector<8x128xbf16>
    %cst_40 = arith.constant dense<0.000000e+00> : vector<8x512xf32>
    %223 = tpu.matmul %222, %15, %cst_40 {dimension_numbers = #tpu.dot_dimension_numbers<[1], [0], [0], [1], [0, 0, 1, 1], [], []>} : vector<8x128xbf16>, vector<128x512xbf16>, vector<8x512xf32> -> vector<8x512xf32>
    %224 = arith.addf %221, %223 : vector<8x512xf32>
    %225 = vector.extract_strided_slice %224 {offsets = [0, 0], sizes = [8, 128], strides = [1, 1]} : vector<8x512xf32> to vector<8x128xf32>
    %226 = arith.negf %225 : vector<8x128xf32>
    %227 = math.exp %226 : vector<8x128xf32>
    %cst_41 = arith.constant 1.000000e+00 : f32
    %228 = vector.broadcast %cst_41 : f32 to vector<8x128xf32>
    %229 = arith.addf %228, %227 : vector<8x128xf32>
    %230 = arith.divf %228, %229 : vector<8x128xf32>
    %231 = vector.extract_strided_slice %224 {offsets = [0, 128], sizes = [8, 128], strides = [1, 1]} : vector<8x512xf32> to vector<8x128xf32>
    %232 = arith.negf %231 : vector<8x128xf32>
    %233 = math.exp %232 : vector<8x128xf32>
    %cst_42 = arith.constant 1.000000e+00 : f32
    %234 = vector.broadcast %cst_42 : f32 to vector<8x128xf32>
    %235 = arith.addf %234, %233 : vector<8x128xf32>
    %236 = arith.divf %234, %235 : vector<8x128xf32>
    %237 = vector.extract_strided_slice %224 {offsets = [0, 256], sizes = [8, 128], strides = [1, 1]} : vector<8x512xf32> to vector<8x128xf32>
    %238 = math.tanh %237 : vector<8x128xf32>
    %239 = vector.extract_strided_slice %224 {offsets = [0, 384], sizes = [8, 128], strides = [1, 1]} : vector<8x512xf32> to vector<8x128xf32>
    %240 = arith.negf %239 : vector<8x128xf32>
    %241 = math.exp %240 : vector<8x128xf32>
    %cst_43 = arith.constant 1.000000e+00 : f32
    %242 = vector.broadcast %cst_43 : f32 to vector<8x128xf32>
    %243 = arith.addf %242, %241 : vector<8x128xf32>
    %244 = arith.divf %242, %243 : vector<8x128xf32>
    %245 = arith.mulf %236, %218 : vector<8x128xf32>
    %246 = arith.mulf %230, %238 : vector<8x128xf32>
    %247 = arith.addf %245, %246 : vector<8x128xf32>
    %248 = math.tanh %247 : vector<8x128xf32>
    %249 = arith.mulf %244, %248 : vector<8x128xf32>
    %c0_44 = arith.constant 0 : index
    %c0_45 = arith.constant 0 : index
    %250 = vector.load %arg8[%c0_44, %c0_45] : memref<16x32xbf16, #tpu.memory_space<vmem>>, vector<16x32xbf16>
    %c0_46 = arith.constant 0 : index
    %c0_47 = arith.constant 0 : index
    %251 = vector.load %arg9[%c0_46, %c0_47] : memref<32x512xbf16, #tpu.memory_space<vmem>>, vector<32x512xbf16>
    %cst_48 = arith.constant dense<0.000000e+00> : vector<16x512xf32>
    %252 = tpu.matmul %250, %251, %cst_48 {dimension_numbers = #tpu.dot_dimension_numbers<[1], [0], [0], [1], [0, 0, 1, 1], [], []>} : vector<16x32xbf16>, vector<32x512xbf16>, vector<16x512xf32> -> vector<16x512xf32>
    %c0_49 = arith.constant 0 : index
    %c0_50 = arith.constant 0 : index
    %253 = vector.load %arg1[%c0_49, %c0_50] : memref<64x1xi32, #tpu.memory_space<vmem>>, vector<64x1xi32>
    %254 = tpu.iota {dimensions = array<i32: 1>} : vector<64x16xi32>
    %255 = vector.broadcast %253 : vector<64x1xi32> to vector<64x16xi32>
    %256 = arith.cmpi eq, %254, %255 : vector<64x16xi32>
    %257 = arith.extui %256 : vector<64x16xi1> to vector<64x16xi32>
    %258 = arith.sitofp %257 : vector<64x16xi32> to vector<64x16xf32>
    %259 = arith.truncf %258 : vector<64x16xf32> to vector<64x16xbf16>
    %260 = arith.truncf %252 : vector<16x512xf32> to vector<16x512xbf16>
    %cst_51 = arith.constant dense<0.000000e+00> : vector<64x512xf32>
    %261 = tpu.matmul %259, %260, %cst_51 {dimension_numbers = #tpu.dot_dimension_numbers<[1], [0], [0], [1], [0, 0, 1, 1], [], []>} : vector<64x16xbf16>, vector<16x512xbf16>, vector<64x512xf32> -> vector<64x512xf32>
    %c0_52 = arith.constant 0 : index
    %c0_53 = arith.constant 0 : index
    %262 = vector.load %arg11[%c0_52, %c0_53] : memref<1x512xf32, #tpu.memory_space<vmem>>, vector<1x512xf32>
    %263 = vector.broadcast %262 : vector<1x512xf32> to vector<64x512xf32>
    %264 = arith.addf %261, %263 : vector<64x512xf32>
    %c0_54 = arith.constant 0 : index
    %c0_55 = arith.constant 0 : index
    %265 = vector.load %arg10[%c0_54, %c0_55] : memref<128x512xbf16, #tpu.memory_space<vmem>>, vector<128x512xbf16>
    %266 = vector.extract_strided_slice %264 {offsets = [0, 0], sizes = [8, 512], strides = [1, 1]} : vector<64x512xf32> to vector<8x512xf32>
    %267 = arith.truncf %249 : vector<8x128xf32> to vector<8x128xbf16>
    %cst_56 = arith.constant dense<0.000000e+00> : vector<8x512xf32>
    %268 = tpu.matmul %267, %265, %cst_56 {dimension_numbers = #tpu.dot_dimension_numbers<[1], [0], [0], [1], [0, 0, 1, 1], [], []>} : vector<8x128xbf16>, vector<128x512xbf16>, vector<8x512xf32> -> vector<8x512xf32>
    %269 = arith.addf %266, %268 : vector<8x512xf32>
    %270 = vector.extract_strided_slice %269 {offsets = [0, 0], sizes = [8, 128], strides = [1, 1]} : vector<8x512xf32> to vector<8x128xf32>
    %271 = arith.negf %270 : vector<8x128xf32>
    %272 = math.exp %271 : vector<8x128xf32>
    %cst_57 = arith.constant 1.000000e+00 : f32
    %273 = vector.broadcast %cst_57 : f32 to vector<8x128xf32>
    %274 = arith.addf %273, %272 : vector<8x128xf32>
    %275 = arith.divf %273, %274 : vector<8x128xf32>
    %276 = vector.extract_strided_slice %269 {offsets = [0, 128], sizes = [8, 128], strides = [1, 1]} : vector<8x512xf32> to vector<8x128xf32>
    %277 = arith.negf %276 : vector<8x128xf32>
    %278 = math.exp %277 : vector<8x128xf32>
    %cst_58 = arith.constant 1.000000e+00 : f32
    %279 = vector.broadcast %cst_58 : f32 to vector<8x128xf32>
    %280 = arith.addf %279, %278 : vector<8x128xf32>
    %281 = arith.divf %279, %280 : vector<8x128xf32>
    %282 = vector.extract_strided_slice %269 {offsets = [0, 256], sizes = [8, 128], strides = [1, 1]} : vector<8x512xf32> to vector<8x128xf32>
    %283 = math.tanh %282 : vector<8x128xf32>
    %284 = vector.extract_strided_slice %269 {offsets = [0, 384], sizes = [8, 128], strides = [1, 1]} : vector<8x512xf32> to vector<8x128xf32>
    %285 = arith.negf %284 : vector<8x128xf32>
    %286 = math.exp %285 : vector<8x128xf32>
    %cst_59 = arith.constant 1.000000e+00 : f32
    %287 = vector.broadcast %cst_59 : f32 to vector<8x128xf32>
    %288 = arith.addf %287, %286 : vector<8x128xf32>
    %289 = arith.divf %287, %288 : vector<8x128xf32>
    %290 = arith.mulf %281, %247 : vector<8x128xf32>
    %291 = arith.mulf %275, %283 : vector<8x128xf32>
    %292 = arith.addf %290, %291 : vector<8x128xf32>
    %293 = math.tanh %292 : vector<8x128xf32>
    %294 = arith.mulf %289, %293 : vector<8x128xf32>
    %295 = vector.extract_strided_slice %264 {offsets = [8, 0], sizes = [8, 512], strides = [1, 1]} : vector<64x512xf32> to vector<8x512xf32>
    %296 = arith.truncf %294 : vector<8x128xf32> to vector<8x128xbf16>
    %cst_60 = arith.constant dense<0.000000e+00> : vector<8x512xf32>
    %297 = tpu.matmul %296, %265, %cst_60 {dimension_numbers = #tpu.dot_dimension_numbers<[1], [0], [0], [1], [0, 0, 1, 1], [], []>} : vector<8x128xbf16>, vector<128x512xbf16>, vector<8x512xf32> -> vector<8x512xf32>
    %298 = arith.addf %295, %297 : vector<8x512xf32>
    %299 = vector.extract_strided_slice %298 {offsets = [0, 0], sizes = [8, 128], strides = [1, 1]} : vector<8x512xf32> to vector<8x128xf32>
    %300 = arith.negf %299 : vector<8x128xf32>
    %301 = math.exp %300 : vector<8x128xf32>
    %cst_61 = arith.constant 1.000000e+00 : f32
    %302 = vector.broadcast %cst_61 : f32 to vector<8x128xf32>
    %303 = arith.addf %302, %301 : vector<8x128xf32>
    %304 = arith.divf %302, %303 : vector<8x128xf32>
    %305 = vector.extract_strided_slice %298 {offsets = [0, 128], sizes = [8, 128], strides = [1, 1]} : vector<8x512xf32> to vector<8x128xf32>
    %306 = arith.negf %305 : vector<8x128xf32>
    %307 = math.exp %306 : vector<8x128xf32>
    %cst_62 = arith.constant 1.000000e+00 : f32
    %308 = vector.broadcast %cst_62 : f32 to vector<8x128xf32>
    %309 = arith.addf %308, %307 : vector<8x128xf32>
    %310 = arith.divf %308, %309 : vector<8x128xf32>
    %311 = vector.extract_strided_slice %298 {offsets = [0, 256], sizes = [8, 128], strides = [1, 1]} : vector<8x512xf32> to vector<8x128xf32>
    %312 = math.tanh %311 : vector<8x128xf32>
    %313 = vector.extract_strided_slice %298 {offsets = [0, 384], sizes = [8, 128], strides = [1, 1]} : vector<8x512xf32> to vector<8x128xf32>
    %314 = arith.negf %313 : vector<8x128xf32>
    %315 = math.exp %314 : vector<8x128xf32>
    %cst_63 = arith.constant 1.000000e+00 : f32
    %316 = vector.broadcast %cst_63 : f32 to vector<8x128xf32>
    %317 = arith.addf %316, %315 : vector<8x128xf32>
    %318 = arith.divf %316, %317 : vector<8x128xf32>
    %319 = arith.mulf %310, %292 : vector<8x128xf32>
    %320 = arith.mulf %304, %312 : vector<8x128xf32>
    %321 = arith.addf %319, %320 : vector<8x128xf32>
    %322 = math.tanh %321 : vector<8x128xf32>
    %323 = arith.mulf %318, %322 : vector<8x128xf32>
    %324 = vector.extract_strided_slice %264 {offsets = [16, 0], sizes = [8, 512], strides = [1, 1]} : vector<64x512xf32> to vector<8x512xf32>
    %325 = arith.truncf %323 : vector<8x128xf32> to vector<8x128xbf16>
    %cst_64 = arith.constant dense<0.000000e+00> : vector<8x512xf32>
    %326 = tpu.matmul %325, %265, %cst_64 {dimension_numbers = #tpu.dot_dimension_numbers<[1], [0], [0], [1], [0, 0, 1, 1], [], []>} : vector<8x128xbf16>, vector<128x512xbf16>, vector<8x512xf32> -> vector<8x512xf32>
    %327 = arith.addf %324, %326 : vector<8x512xf32>
    %328 = vector.extract_strided_slice %327 {offsets = [0, 0], sizes = [8, 128], strides = [1, 1]} : vector<8x512xf32> to vector<8x128xf32>
    %329 = arith.negf %328 : vector<8x128xf32>
    %330 = math.exp %329 : vector<8x128xf32>
    %cst_65 = arith.constant 1.000000e+00 : f32
    %331 = vector.broadcast %cst_65 : f32 to vector<8x128xf32>
    %332 = arith.addf %331, %330 : vector<8x128xf32>
    %333 = arith.divf %331, %332 : vector<8x128xf32>
    %334 = vector.extract_strided_slice %327 {offsets = [0, 128], sizes = [8, 128], strides = [1, 1]} : vector<8x512xf32> to vector<8x128xf32>
    %335 = arith.negf %334 : vector<8x128xf32>
    %336 = math.exp %335 : vector<8x128xf32>
    %cst_66 = arith.constant 1.000000e+00 : f32
    %337 = vector.broadcast %cst_66 : f32 to vector<8x128xf32>
    %338 = arith.addf %337, %336 : vector<8x128xf32>
    %339 = arith.divf %337, %338 : vector<8x128xf32>
    %340 = vector.extract_strided_slice %327 {offsets = [0, 256], sizes = [8, 128], strides = [1, 1]} : vector<8x512xf32> to vector<8x128xf32>
    %341 = math.tanh %340 : vector<8x128xf32>
    %342 = vector.extract_strided_slice %327 {offsets = [0, 384], sizes = [8, 128], strides = [1, 1]} : vector<8x512xf32> to vector<8x128xf32>
    %343 = arith.negf %342 : vector<8x128xf32>
    %344 = math.exp %343 : vector<8x128xf32>
    %cst_67 = arith.constant 1.000000e+00 : f32
    %345 = vector.broadcast %cst_67 : f32 to vector<8x128xf32>
    %346 = arith.addf %345, %344 : vector<8x128xf32>
    %347 = arith.divf %345, %346 : vector<8x128xf32>
    %348 = arith.mulf %339, %321 : vector<8x128xf32>
    %349 = arith.mulf %333, %341 : vector<8x128xf32>
    %350 = arith.addf %348, %349 : vector<8x128xf32>
    %351 = math.tanh %350 : vector<8x128xf32>
    %352 = arith.mulf %347, %351 : vector<8x128xf32>
    %353 = vector.extract_strided_slice %264 {offsets = [24, 0], sizes = [8, 512], strides = [1, 1]} : vector<64x512xf32> to vector<8x512xf32>
    %354 = arith.truncf %352 : vector<8x128xf32> to vector<8x128xbf16>
    %cst_68 = arith.constant dense<0.000000e+00> : vector<8x512xf32>
    %355 = tpu.matmul %354, %265, %cst_68 {dimension_numbers = #tpu.dot_dimension_numbers<[1], [0], [0], [1], [0, 0, 1, 1], [], []>} : vector<8x128xbf16>, vector<128x512xbf16>, vector<8x512xf32> -> vector<8x512xf32>
    %356 = arith.addf %353, %355 : vector<8x512xf32>
    %357 = vector.extract_strided_slice %356 {offsets = [0, 0], sizes = [8, 128], strides = [1, 1]} : vector<8x512xf32> to vector<8x128xf32>
    %358 = arith.negf %357 : vector<8x128xf32>
    %359 = math.exp %358 : vector<8x128xf32>
    %cst_69 = arith.constant 1.000000e+00 : f32
    %360 = vector.broadcast %cst_69 : f32 to vector<8x128xf32>
    %361 = arith.addf %360, %359 : vector<8x128xf32>
    %362 = arith.divf %360, %361 : vector<8x128xf32>
    %363 = vector.extract_strided_slice %356 {offsets = [0, 128], sizes = [8, 128], strides = [1, 1]} : vector<8x512xf32> to vector<8x128xf32>
    %364 = arith.negf %363 : vector<8x128xf32>
    %365 = math.exp %364 : vector<8x128xf32>
    %cst_70 = arith.constant 1.000000e+00 : f32
    %366 = vector.broadcast %cst_70 : f32 to vector<8x128xf32>
    %367 = arith.addf %366, %365 : vector<8x128xf32>
    %368 = arith.divf %366, %367 : vector<8x128xf32>
    %369 = vector.extract_strided_slice %356 {offsets = [0, 256], sizes = [8, 128], strides = [1, 1]} : vector<8x512xf32> to vector<8x128xf32>
    %370 = math.tanh %369 : vector<8x128xf32>
    %371 = vector.extract_strided_slice %356 {offsets = [0, 384], sizes = [8, 128], strides = [1, 1]} : vector<8x512xf32> to vector<8x128xf32>
    %372 = arith.negf %371 : vector<8x128xf32>
    %373 = math.exp %372 : vector<8x128xf32>
    %cst_71 = arith.constant 1.000000e+00 : f32
    %374 = vector.broadcast %cst_71 : f32 to vector<8x128xf32>
    %375 = arith.addf %374, %373 : vector<8x128xf32>
    %376 = arith.divf %374, %375 : vector<8x128xf32>
    %377 = arith.mulf %368, %350 : vector<8x128xf32>
    %378 = arith.mulf %362, %370 : vector<8x128xf32>
    %379 = arith.addf %377, %378 : vector<8x128xf32>
    %380 = math.tanh %379 : vector<8x128xf32>
    %381 = arith.mulf %376, %380 : vector<8x128xf32>
    %382 = vector.extract_strided_slice %264 {offsets = [32, 0], sizes = [8, 512], strides = [1, 1]} : vector<64x512xf32> to vector<8x512xf32>
    %383 = arith.truncf %381 : vector<8x128xf32> to vector<8x128xbf16>
    %cst_72 = arith.constant dense<0.000000e+00> : vector<8x512xf32>
    %384 = tpu.matmul %383, %265, %cst_72 {dimension_numbers = #tpu.dot_dimension_numbers<[1], [0], [0], [1], [0, 0, 1, 1], [], []>} : vector<8x128xbf16>, vector<128x512xbf16>, vector<8x512xf32> -> vector<8x512xf32>
    %385 = arith.addf %382, %384 : vector<8x512xf32>
    %386 = vector.extract_strided_slice %385 {offsets = [0, 0], sizes = [8, 128], strides = [1, 1]} : vector<8x512xf32> to vector<8x128xf32>
    %387 = arith.negf %386 : vector<8x128xf32>
    %388 = math.exp %387 : vector<8x128xf32>
    %cst_73 = arith.constant 1.000000e+00 : f32
    %389 = vector.broadcast %cst_73 : f32 to vector<8x128xf32>
    %390 = arith.addf %389, %388 : vector<8x128xf32>
    %391 = arith.divf %389, %390 : vector<8x128xf32>
    %392 = vector.extract_strided_slice %385 {offsets = [0, 128], sizes = [8, 128], strides = [1, 1]} : vector<8x512xf32> to vector<8x128xf32>
    %393 = arith.negf %392 : vector<8x128xf32>
    %394 = math.exp %393 : vector<8x128xf32>
    %cst_74 = arith.constant 1.000000e+00 : f32
    %395 = vector.broadcast %cst_74 : f32 to vector<8x128xf32>
    %396 = arith.addf %395, %394 : vector<8x128xf32>
    %397 = arith.divf %395, %396 : vector<8x128xf32>
    %398 = vector.extract_strided_slice %385 {offsets = [0, 256], sizes = [8, 128], strides = [1, 1]} : vector<8x512xf32> to vector<8x128xf32>
    %399 = math.tanh %398 : vector<8x128xf32>
    %400 = vector.extract_strided_slice %385 {offsets = [0, 384], sizes = [8, 128], strides = [1, 1]} : vector<8x512xf32> to vector<8x128xf32>
    %401 = arith.negf %400 : vector<8x128xf32>
    %402 = math.exp %401 : vector<8x128xf32>
    %cst_75 = arith.constant 1.000000e+00 : f32
    %403 = vector.broadcast %cst_75 : f32 to vector<8x128xf32>
    %404 = arith.addf %403, %402 : vector<8x128xf32>
    %405 = arith.divf %403, %404 : vector<8x128xf32>
    %406 = arith.mulf %397, %379 : vector<8x128xf32>
    %407 = arith.mulf %391, %399 : vector<8x128xf32>
    %408 = arith.addf %406, %407 : vector<8x128xf32>
    %409 = math.tanh %408 : vector<8x128xf32>
    %410 = arith.mulf %405, %409 : vector<8x128xf32>
    %411 = vector.extract_strided_slice %264 {offsets = [40, 0], sizes = [8, 512], strides = [1, 1]} : vector<64x512xf32> to vector<8x512xf32>
    %412 = arith.truncf %410 : vector<8x128xf32> to vector<8x128xbf16>
    %cst_76 = arith.constant dense<0.000000e+00> : vector<8x512xf32>
    %413 = tpu.matmul %412, %265, %cst_76 {dimension_numbers = #tpu.dot_dimension_numbers<[1], [0], [0], [1], [0, 0, 1, 1], [], []>} : vector<8x128xbf16>, vector<128x512xbf16>, vector<8x512xf32> -> vector<8x512xf32>
    %414 = arith.addf %411, %413 : vector<8x512xf32>
    %415 = vector.extract_strided_slice %414 {offsets = [0, 0], sizes = [8, 128], strides = [1, 1]} : vector<8x512xf32> to vector<8x128xf32>
    %416 = arith.negf %415 : vector<8x128xf32>
    %417 = math.exp %416 : vector<8x128xf32>
    %cst_77 = arith.constant 1.000000e+00 : f32
    %418 = vector.broadcast %cst_77 : f32 to vector<8x128xf32>
    %419 = arith.addf %418, %417 : vector<8x128xf32>
    %420 = arith.divf %418, %419 : vector<8x128xf32>
    %421 = vector.extract_strided_slice %414 {offsets = [0, 128], sizes = [8, 128], strides = [1, 1]} : vector<8x512xf32> to vector<8x128xf32>
    %422 = arith.negf %421 : vector<8x128xf32>
    %423 = math.exp %422 : vector<8x128xf32>
    %cst_78 = arith.constant 1.000000e+00 : f32
    %424 = vector.broadcast %cst_78 : f32 to vector<8x128xf32>
    %425 = arith.addf %424, %423 : vector<8x128xf32>
    %426 = arith.divf %424, %425 : vector<8x128xf32>
    %427 = vector.extract_strided_slice %414 {offsets = [0, 256], sizes = [8, 128], strides = [1, 1]} : vector<8x512xf32> to vector<8x128xf32>
    %428 = math.tanh %427 : vector<8x128xf32>
    %429 = vector.extract_strided_slice %414 {offsets = [0, 384], sizes = [8, 128], strides = [1, 1]} : vector<8x512xf32> to vector<8x128xf32>
    %430 = arith.negf %429 : vector<8x128xf32>
    %431 = math.exp %430 : vector<8x128xf32>
    %cst_79 = arith.constant 1.000000e+00 : f32
    %432 = vector.broadcast %cst_79 : f32 to vector<8x128xf32>
    %433 = arith.addf %432, %431 : vector<8x128xf32>
    %434 = arith.divf %432, %433 : vector<8x128xf32>
    %435 = arith.mulf %426, %408 : vector<8x128xf32>
    %436 = arith.mulf %420, %428 : vector<8x128xf32>
    %437 = arith.addf %435, %436 : vector<8x128xf32>
    %438 = math.tanh %437 : vector<8x128xf32>
    %439 = arith.mulf %434, %438 : vector<8x128xf32>
    %440 = vector.extract_strided_slice %264 {offsets = [48, 0], sizes = [8, 512], strides = [1, 1]} : vector<64x512xf32> to vector<8x512xf32>
    %441 = arith.truncf %439 : vector<8x128xf32> to vector<8x128xbf16>
    %cst_80 = arith.constant dense<0.000000e+00> : vector<8x512xf32>
    %442 = tpu.matmul %441, %265, %cst_80 {dimension_numbers = #tpu.dot_dimension_numbers<[1], [0], [0], [1], [0, 0, 1, 1], [], []>} : vector<8x128xbf16>, vector<128x512xbf16>, vector<8x512xf32> -> vector<8x512xf32>
    %443 = arith.addf %440, %442 : vector<8x512xf32>
    %444 = vector.extract_strided_slice %443 {offsets = [0, 0], sizes = [8, 128], strides = [1, 1]} : vector<8x512xf32> to vector<8x128xf32>
    %445 = arith.negf %444 : vector<8x128xf32>
    %446 = math.exp %445 : vector<8x128xf32>
    %cst_81 = arith.constant 1.000000e+00 : f32
    %447 = vector.broadcast %cst_81 : f32 to vector<8x128xf32>
    %448 = arith.addf %447, %446 : vector<8x128xf32>
    %449 = arith.divf %447, %448 : vector<8x128xf32>
    %450 = vector.extract_strided_slice %443 {offsets = [0, 128], sizes = [8, 128], strides = [1, 1]} : vector<8x512xf32> to vector<8x128xf32>
    %451 = arith.negf %450 : vector<8x128xf32>
    %452 = math.exp %451 : vector<8x128xf32>
    %cst_82 = arith.constant 1.000000e+00 : f32
    %453 = vector.broadcast %cst_82 : f32 to vector<8x128xf32>
    %454 = arith.addf %453, %452 : vector<8x128xf32>
    %455 = arith.divf %453, %454 : vector<8x128xf32>
    %456 = vector.extract_strided_slice %443 {offsets = [0, 256], sizes = [8, 128], strides = [1, 1]} : vector<8x512xf32> to vector<8x128xf32>
    %457 = math.tanh %456 : vector<8x128xf32>
    %458 = vector.extract_strided_slice %443 {offsets = [0, 384], sizes = [8, 128], strides = [1, 1]} : vector<8x512xf32> to vector<8x128xf32>
    %459 = arith.negf %458 : vector<8x128xf32>
    %460 = math.exp %459 : vector<8x128xf32>
    %cst_83 = arith.constant 1.000000e+00 : f32
    %461 = vector.broadcast %cst_83 : f32 to vector<8x128xf32>
    %462 = arith.addf %461, %460 : vector<8x128xf32>
    %463 = arith.divf %461, %462 : vector<8x128xf32>
    %464 = arith.mulf %455, %437 : vector<8x128xf32>
    %465 = arith.mulf %449, %457 : vector<8x128xf32>
    %466 = arith.addf %464, %465 : vector<8x128xf32>
    %467 = math.tanh %466 : vector<8x128xf32>
    %468 = arith.mulf %463, %467 : vector<8x128xf32>
    %469 = vector.extract_strided_slice %264 {offsets = [56, 0], sizes = [8, 512], strides = [1, 1]} : vector<64x512xf32> to vector<8x512xf32>
    %470 = arith.truncf %468 : vector<8x128xf32> to vector<8x128xbf16>
    %cst_84 = arith.constant dense<0.000000e+00> : vector<8x512xf32>
    %471 = tpu.matmul %470, %265, %cst_84 {dimension_numbers = #tpu.dot_dimension_numbers<[1], [0], [0], [1], [0, 0, 1, 1], [], []>} : vector<8x128xbf16>, vector<128x512xbf16>, vector<8x512xf32> -> vector<8x512xf32>
    %472 = arith.addf %469, %471 : vector<8x512xf32>
    %473 = vector.extract_strided_slice %472 {offsets = [0, 0], sizes = [8, 128], strides = [1, 1]} : vector<8x512xf32> to vector<8x128xf32>
    %474 = arith.negf %473 : vector<8x128xf32>
    %475 = math.exp %474 : vector<8x128xf32>
    %cst_85 = arith.constant 1.000000e+00 : f32
    %476 = vector.broadcast %cst_85 : f32 to vector<8x128xf32>
    %477 = arith.addf %476, %475 : vector<8x128xf32>
    %478 = arith.divf %476, %477 : vector<8x128xf32>
    %479 = vector.extract_strided_slice %472 {offsets = [0, 128], sizes = [8, 128], strides = [1, 1]} : vector<8x512xf32> to vector<8x128xf32>
    %480 = arith.negf %479 : vector<8x128xf32>
    %481 = math.exp %480 : vector<8x128xf32>
    %cst_86 = arith.constant 1.000000e+00 : f32
    %482 = vector.broadcast %cst_86 : f32 to vector<8x128xf32>
    %483 = arith.addf %482, %481 : vector<8x128xf32>
    %484 = arith.divf %482, %483 : vector<8x128xf32>
    %485 = vector.extract_strided_slice %472 {offsets = [0, 256], sizes = [8, 128], strides = [1, 1]} : vector<8x512xf32> to vector<8x128xf32>
    %486 = math.tanh %485 : vector<8x128xf32>
    %487 = vector.extract_strided_slice %472 {offsets = [0, 384], sizes = [8, 128], strides = [1, 1]} : vector<8x512xf32> to vector<8x128xf32>
    %488 = arith.negf %487 : vector<8x128xf32>
    %489 = math.exp %488 : vector<8x128xf32>
    %cst_87 = arith.constant 1.000000e+00 : f32
    %490 = vector.broadcast %cst_87 : f32 to vector<8x128xf32>
    %491 = arith.addf %490, %489 : vector<8x128xf32>
    %492 = arith.divf %490, %491 : vector<8x128xf32>
    %493 = arith.mulf %484, %466 : vector<8x128xf32>
    %494 = arith.mulf %478, %486 : vector<8x128xf32>
    %495 = arith.addf %493, %494 : vector<8x128xf32>
    %496 = math.tanh %495 : vector<8x128xf32>
    %497 = arith.mulf %492, %496 : vector<8x128xf32>
    %498 = tpu.concatenate %294, %323, %352, %381, %410, %439, %468, %497 in 0 : vector<8x128xf32>, vector<8x128xf32>, vector<8x128xf32>, vector<8x128xf32>, vector<8x128xf32>, vector<8x128xf32>, vector<8x128xf32>, vector<8x128xf32> -> vector<64x128xf32>
    %499 = arith.truncf %498 : vector<64x128xf32> to vector<64x128xbf16>
    %c0_88 = arith.constant 0 : index
    %c0_89 = arith.constant 0 : index
    %500 = vector.load %arg12[%c0_88, %c0_89] : memref<128x16xbf16, #tpu.memory_space<vmem>>, vector<128x16xbf16>
    %cst_90 = arith.constant dense<0.000000e+00> : vector<64x16xf32>
    %501 = tpu.matmul %499, %500, %cst_90 {dimension_numbers = #tpu.dot_dimension_numbers<[1], [0], [0], [1], [0, 0, 1, 1], [], []>} : vector<64x128xbf16>, vector<128x16xbf16>, vector<64x16xf32> -> vector<64x16xf32>
    %c0_91 = arith.constant 0 : index
    %c0_92 = arith.constant 0 : index
    %502 = vector.load %arg13[%c0_91, %c0_92] : memref<1x16xf32, #tpu.memory_space<vmem>>, vector<1x16xf32>
    %503 = vector.broadcast %502 : vector<1x16xf32> to vector<64x16xf32>
    %504 = arith.addf %501, %503 : vector<64x16xf32>
    %cst_93 = arith.constant dense<0xFF800000> : vector<64xf32>
    %505 = vector.multi_reduction <maximumf>, %504, %cst_93 [1] : vector<64x16xf32> to vector<64xf32>
    %506 = vector.shape_cast %505 : vector<64xf32> to vector<64x1xf32>
    %507 = vector.broadcast %506 : vector<64x1xf32> to vector<64x16xf32>
    %508 = arith.subf %504, %507 : vector<64x16xf32>
    %509 = math.exp %508 : vector<64x16xf32>
    %cst_94 = arith.constant dense<0.000000e+00> : vector<64xf32>
    %510 = vector.multi_reduction <add>, %509, %cst_94 [1] : vector<64x16xf32> to vector<64xf32>
    %511 = vector.shape_cast %510 : vector<64xf32> to vector<64x1xf32>
    %512 = math.log %511 : vector<64x1xf32>
    %513 = arith.addf %506, %512 : vector<64x1xf32>
    %514 = tpu.iota {dimensions = array<i32: 1>} : vector<64x16xi32>
    %c0_95 = arith.constant 0 : index
    %c0_96 = arith.constant 0 : index
    %515 = vector.load %arg2[%c0_95, %c0_96] : memref<64x1xi32, #tpu.memory_space<vmem>>, vector<64x1xi32>
    %516 = vector.broadcast %515 : vector<64x1xi32> to vector<64x16xi32>
    %517 = arith.cmpi eq, %514, %516 : vector<64x16xi32>
    %518 = arith.extui %517 : vector<64x16xi1> to vector<64x16xi32>
    %519 = arith.sitofp %518 : vector<64x16xi32> to vector<64x16xf32>
    %520 = arith.mulf %504, %519 : vector<64x16xf32>
    %cst_97 = arith.constant dense<0.000000e+00> : vector<64xf32>
    %521 = vector.multi_reduction <add>, %520, %cst_97 [1] : vector<64x16xf32> to vector<64xf32>
    %522 = vector.shape_cast %521 : vector<64xf32> to vector<64x1xf32>
    %cst_98 = arith.constant 0.000000e+00 : f32
    %523 = vector.broadcast %cst_98 : f32 to vector<1x1xf32>
    %c0_99 = arith.constant 0 : index
    %c0_100 = arith.constant 0 : index
    %524 = vector.load %arg3[%c0_99, %c0_100] : memref<64x1xf32, #tpu.memory_space<vmem>>, vector<64x1xf32>
    %525 = arith.subf %513, %522 : vector<64x1xf32>
    %526 = arith.mulf %524, %525 : vector<64x1xf32>
    %527 = vector.shape_cast %526 : vector<64x1xf32> to vector<1x64x1xf32>
    %cst_101 = arith.constant dense<0.000000e+00> : vector<1xf32>
    %528 = vector.multi_reduction <add>, %527, %cst_101 [1, 2] : vector<1x64x1xf32> to vector<1xf32>
    %529 = vector.shape_cast %528 : vector<1xf32> to vector<1x1x1xf32>
    %530 = vector.extract %529[0, 0, 0] : f32 from vector<1x1x1xf32>
    %531 = vector.broadcast %530 : f32 to vector<1x1xf32>
    %532 = arith.addf %523, %531 : vector<1x1xf32>
    %cst_102 = arith.constant 6.250000e-02 : f32
    %533 = vector.broadcast %cst_102 : f32 to vector<1x1xf32>
    %534 = arith.mulf %532, %533 : vector<1x1xf32>
    %c0_103 = arith.constant 0 : index
    %c0_104 = arith.constant 0 : index
    %535 = vector.load %arg14[%c0_103, %c0_104] : memref<1x1xf32, #tpu.memory_space<vmem>>, vector<1x1xf32>
    tpu.vector_store %arg14[%c0_103, %c0_104], %534 {strides = array<i32>} : memref<1x1xf32, #tpu.memory_space<vmem>>, vector<1x1xf32>,
    return
  }
}

</mosaic_0001>

<bundles_post_ra>
// kernel: tpu_custom_call.1
= control target key start
LH: loop header
LB: loop body
LE: loop exit
PB: predicated region body
PF: predicated region fallthrough
CT: control target
= control target key end

     0   :  { %19 = vsyncpa [#allocation3], 0  ;;  %s5917_s0 = inlined_call_operand.vmem [shape: s32[64,1], index: 0, kind: input, shape index: {}]   ;;  %s5918_s1 = inlined_call_operand.vmem [shape: s32[64,1], index: 1, kind: input, shape index: {}]   ;;  %s5919_s2 = inlined_call_operand.vmem [shape: s32[64,1], index: 2, kind: input, shape index: {}]   ;;  %s5920_s3 = inlined_call_operand.vmem [shape: f32[64,1], index: 3, kind: input, shape index: {}]   ;;  %s5921_s4 = inlined_call_operand.vmem [shape: bf16[16,32], index: 4, kind: input, shape index: {}]   ;;  %s5922_s5 = inlined_call_operand.vmem [shape: bf16[32,512], index: 5, kind: input, shape index: {}]   ;;  %s5923_s6 = inlined_call_operand.vmem [shape: bf16[128,512], index: 6, kind: input, shape index: {}]   ;;  %s5924_s7 = inlined_call_operand.vmem [shape: f32[1,512], index: 7, kind: input, shape index: {}]   ;;  %s5925_s8 = inlined_call_operand.vmem [shape: bf16[16,32], index: 8, kind: input, shape index: {}]   ;;  %s5926_s9 = inlined_call_operand.hbm [shape: bf16[32,512], index: 9, kind: input, shape index: {}]   ;;  %s5927_s10 = inlined_call_operand.hbm [shape: bf16[128,512], index: 10, kind: input, shape index: {}]   ;;  %s5928_s11 = inlined_call_operand.vmem [shape: f32[1,512], index: 11, kind: input, shape index: {}]   ;;  %s5929_s12 = inlined_call_operand.vmem [shape: bf16[128,16], index: 12, kind: input, shape index: {}]   ;;  %s5930_s13 = inlined_call_operand.vmem [shape: f32[1,16], index: 13, kind: input, shape index: {}]   ;;  %s5931_s14 = inlined_call_operand.hbm [shape: f32[1,1], index: 14, kind: output, shape index: {}]  }
   0x1   :  { %20 = vsyncpa [#allocation6], 0 }
   0x2   :  { %21 = vsyncpa [#allocation4], 0  ;;  %s4194_s29 = smov [#allocation2]   ;;  %s4122_s17 = scalar_lea.hbm %s5926_s9, 1024 }
   0x3   :  { %s45_s30 = sshll.u32 %s4194_s29, 4  ;;  %p4123_p0 = scmp.ne.s32.totalorder %s5926_s9, %s4122_s17  ;;  %s46_s30 = int_to_ptr.vmem [resolvable:$true] %s45_s30 }
   0x4   :  { %p4126_p1 = scmp.lt.u32.totalorder %s4122_s17, %s5926_s9 }
   0x6   :  { %p4128_p2 = pnand %p4126_p1, %p4123_p0 }
   0x8   :  { %4131 = shalt.err (!%p4128_p2)
}
   0x9   :  { %s4132_s22 = scalar_lea.vmem %s46_s30, 1024  ;;  %p4137_p4 = scmp.lt.s32.totalorder %s46_s30, %s46_s30 }
   0xa   :  { %p4133_p3 = scmp.ne.s32.totalorder %s46_s30, %s4132_s22  ;;  %p4138_p5 = scmp.lt.s32.totalorder %s4132_s22, %s4132_s22 }
   0xc   :  { %p4139_p6 = por %p4138_p5, %p4137_p4 }
   0xe   :  { %p4140_p7 = pnand %p4139_p6, %p4133_p3 }
  0x10   :  { %4143 = shalt.err (!%p4140_p7)
}
  0x11   :  { %s4195_s23 = smov 256   ;;  %s4196_s24 = smov 16  }
  0x12   :  { %51 = dma.hbm_to_vmem [thread:$0]  %s5926_s9, 1024, %s46_s30, [#allocation3], %s4195_s23, %s4195_s23, %s4196_s24  }
  0x13   :  { %s4197_s27 = smov [#allocation5]   ;;  %s4144_s16 = scalar_lea.hbm %s5927_s10, 4096 }
  0x14   :  { %s57_s28 = sshll.u32 %s4197_s27, 4  ;;  %p4145_p8 = scmp.ne.s32.totalorder %s5927_s10, %s4144_s16  ;;  %s58_s28 = int_to_ptr.vmem [resolvable:$true] %s57_s28 }
  0x15   :  { %p4148_p9 = scmp.lt.u32.totalorder %s4144_s16, %s5927_s10 }
  0x17   :  { %p4150_p10 = pnand %p4148_p9, %p4145_p8 }
  0x19   :  { %4153 = shalt.err (!%p4150_p10)
}
  0x1a   :  { %s4154_s21 = scalar_lea.vmem %s58_s28, 4096  ;;  %p4159_p12 = scmp.lt.s32.totalorder %s58_s28, %s58_s28 }
  0x1b   :  { %p4155_p11 = scmp.ne.s32.totalorder %s58_s28, %s4154_s21  ;;  %p4160_p13 = scmp.lt.s32.totalorder %s4154_s21, %s4154_s21 }
  0x1d   :  { %p4161_p0 = por %p4160_p13, %p4159_p12 }
  0x1f   :  { %p4162_p1 = pnand %p4161_p0, %p4155_p11 }
  0x21   :  { %4165 = shalt.err (!%p4162_p1)
}
  0x22   :  { %63 = dma.hbm_to_vmem [thread:$0]  %s5927_s10, 4096, %s58_s28, [#allocation6], %s4195_s23, %s4195_s23, %s4196_s24  }
  0x23   :  { %4188 = dma.done.wait [#allocation3], 1024  }
  0x24   :  { %4189 = vsyncadd [#allocation3], 4294966272 }
  0x25   :  { %4190 = dma.done.wait [#allocation6], 4096  }
  0x26   :  { %4191 = vsyncadd [#allocation6], 4294963200  ;;  %v5938_v0 = vmov 0   ;;  %v3640_v1 = vld [vmem:[%s5922_s5 + $0x4] ss:$16 sps:$4 sm:$0xff]   ;;  %vm132_vm0 = vcmask 261120   ;;  %v230_v31 = vlaneseq }
  0x27   :  { %168 = vmatprep.mubr.bf16.mxu1 %v5938_v0  ;;  %3638 = vset.pattern.permute.xlu0 %v5938_v0  ;;  %v3642_v2 = vld [vmem:[%s5922_s5] ss:$16 sps:$4 sm:$0xff]   ;;  %v3643_v3 = vld [vmem:[%s5922_s5 + $0x24] ss:$16 sps:$4 sm:$0xff]   ;;  %v3649_v5 = vld [vmem:[%s5922_s5 + $0xc] ss:$16 sps:$4 sm:$0xff]  }
  0x28   :  { %3639 = vset.pattern.permute.xlu1 %v5938_v0  ;;  %355 = vmatprep.mubr.bf16.mxu0 %v5938_v0  ;;  %v3645_v4 = vld [vmem:[%s5922_s5 + $0x20] ss:$16 sps:$4 sm:$0xff]   ;;  %v3647_v9 = vld [vmem:[%s5922_s5 + $0x8] ss:$16 sps:$4 sm:$0xff]   ;;  %v3652_v10 = vld [vmem:[%s5922_s5 + $0x2c] ss:$16 sps:$4 sm:$0xff]  }
  0x29   :  { %136 = vmatprep.subr.bf16.mxu1 %v3640_v1  ;;  %v3646_v6 = vld [vmem:[%s5921_s4] sm:$0xff]   ;;  %v224_v8 = vld [vmem:[%s5917_s0 + $0x10] sm:$0xff]  ;;  %v223_v11 = vld [vmem:[%s5917_s0 + $0x8] sm:$0xff]  ;;  %v4399_v33 = vand.u32 127, %v230_v31  ;;  %v5936_v43 = vmov 0.0   ;;  %vm310_vm3 = vcmask 130048  }
  0x2a   :  { %137 = vmatpush1.bf16.msra.mxu1 %v3642_v2  ;;  %v222_v7 = vld [vmem:[%s5917_s0] sm:$0xff]  ;;  %239 = vperm.xlu1 %3639, %v224_v8   ;;  %v225_v12 = vld [vmem:[%s5917_s0 + $0x18] sm:$0xff]  ;;  %v227_v15 = vld [vmem:[%s5917_s0 + $0x28] sm:$0xff] }
  0x2b   :  { %138 = vmatprep.subr.bf16.mxu1 %v3643_v3  ;;  %233 = vperm.xlu0 %3638, %v222_v7   ;;  %v3650_v13 = vld [vmem:[%s5922_s5 + $0x28] ss:$16 sps:$4 sm:$0xff]   ;;  %v226_v14 = vld [vmem:[%s5917_s0 + $0x20] sm:$0xff]  ;;  %v228_v16 = vld [vmem:[%s5917_s0 + $0x30] sm:$0xff]  ;;  %5946 = vst [vmem:[#allocation11_spill] sm:$0xff] %v4399_v33 }
  0x2c   :  { %v229_v17 = vld [vmem:[%s5917_s0 + $0x38] sm:$0xff]  ;;  %v1692_v18 = vld [vmem:[%s5918_s1] sm:$0xff]  ;;  %v1693_v19 = vld [vmem:[%s5918_s1 + $0x8] sm:$0xff] }
  0x2d   :  { %v1694_v20 = vld [vmem:[%s5918_s1 + $0x10] sm:$0xff]  ;;  %v1695_v21 = vld [vmem:[%s5918_s1 + $0x18] sm:$0xff]  ;;  %v1696_v22 = vld [vmem:[%s5918_s1 + $0x20] sm:$0xff] }
  0x2e   :  { %139 = vmatpush1.bf16.msra.mxu1 %v3645_v4  ;;  %242 = vperm.xlu1 %3639, %v225_v12   ;;  %v1697_v23 = vld [vmem:[%s5918_s1 + $0x28] sm:$0xff]  ;;  %v1698_v24 = vld [vmem:[%s5918_s1 + $0x30] sm:$0xff]  ;;  %v1699_v25 = vld [vmem:[%s5918_s1 + $0x38] sm:$0xff] }
  0x2f   :  { %179 = vmatprep.subr.bf16.mxu1 %v3649_v5  ;;  %236 = vperm.xlu0 %3638, %v223_v11   ;;  %v3253_v26 = vld [vmem:[%s5919_s2 + $0x8] sm:$0xff]  ;;  %v3252_v27 = vld [vmem:[%s5919_s2] sm:$0xff]  ;;  %v3254_v29 = vld [vmem:[%s5919_s2 + $0x10] sm:$0xff] }
  0x30   :  { %v3256_v28 = vld [vmem:[%s5919_s2 + $0x20] sm:$0xff]  ;;  %v3255_v30 = vld [vmem:[%s5919_s2 + $0x18] sm:$0xff] }
  0x31   :  { %3419 = vmatmul.mubr.msk.bf16.vlgmr.msra.gmra.mrb[0].mxu1 %vm132_vm0, %v3646_v6  ;;  %v4406_v42 = vld [vmem:[%s5923_s6 + $0x4] ss:$16 sps:$4 sm:$0xff]   ;;  %v4413_v46 = vld [vmem:[%s5923_s6] ss:$16 sps:$4 sm:$0xff]   ;;  %v4440_v58 = vld [vmem:[%s5923_s6 + $0xc] ss:$16 sps:$4 sm:$0xff]  }
  0x32   :  { %180 = vmatpush1.bf16.msra.mxu1 %v3647_v9  ;;  %211 = vmatprep.mubr.bf16.mxu1 %v5938_v0  ;;  %v4419_v49 = vld [vmem:[%s5923_s6 + $0x24] ss:$16 sps:$4 sm:$0xff]   ;;  %v4428_v55 = vld [vmem:[%s5923_s6 + $0x20] ss:$16 sps:$4 sm:$0xff]   ;;  %v4453_v62 = vld [vmem:[%s5923_s6 + $0x8] ss:$16 sps:$4 sm:$0xff]  }
  0x33   :  { %181 = vmatprep.subr.bf16.mxu1 %v3652_v10  ;;  %245 = vperm.xlu0 %3638, %v226_v14   ;;  %v4435_v57 = vld [vmem:[%s5923_s6 + $0x44] ss:$16 sps:$4 sm:$0xff]   ;;  %v4448_v61 = vld [vmem:[%s5923_s6 + $0x40] ss:$16 sps:$4 sm:$0xff]   ;;  %v4465_v2 = vld [vmem:[%s5923_s6 + $0x2c] ss:$16 sps:$4 sm:$0xff]  }
  0x34   :  { %248 = vperm.xlu1 %3639, %v227_v15   ;;  %v4460_v1 = vld [vmem:[%s5923_s6 + $0x64] ss:$16 sps:$4 sm:$0xff]   ;;  %v4476_v5 = vld [vmem:[%s5923_s6 + $0x60] ss:$16 sps:$4 sm:$0xff]   ;;  %v4493_v8 = vld [vmem:[%s5923_s6 + $0x4c] ss:$16 sps:$4 sm:$0xff]  }
  0x35   :  { %v4488_v7 = vld [vmem:[%s5923_s6 + $0x84] ss:$16 sps:$4 sm:$0xff]   ;;  %v4504_v11 = vld [vmem:[%s5923_s6 + $0x80] ss:$16 sps:$4 sm:$0xff]   ;;  %v4509_v12 = vld [vmem:[%s5923_s6 + $0x48] ss:$16 sps:$4 sm:$0xff]  }
  0x36   :  { %182 = vmatpush1.bf16.msra.mxu1 %v3650_v13  ;;  %v4516_v14 = vld [vmem:[%s5923_s6 + $0xa4] ss:$16 sps:$4 sm:$0xff]   ;;  %v4521_v15 = vld [vmem:[%s5923_s6 + $0x6c] ss:$16 sps:$4 sm:$0xff]  }
  0x37   :  { %251 = vperm.xlu0 %3638, %v228_v16  }
  0x38   :  { %254 = vperm.xlu1 %3639, %v229_v17  }
  0x39   :  { %3420 = vmatmul.mubr.msk.bf16.vlgmr.msra.gmra.mrb[4].mxu1 %vm132_vm0, %v3646_v6  ;;  %v4481_v6 = vld [vmem:[%s5923_s6 + $0x28] ss:$16 sps:$4 sm:$0xff]  }
  0x3a   :  { %428 = vmatprep.mubr.bf16.mxu1 %v5938_v0 }
  0x3b   :  { %1701 = vperm.xlu0 %3638, %v1692_v18   ;;  %v4532_v18 = vld [vmem:[%s5923_s6 + $0xa0] ss:$16 sps:$4 sm:$0xff]  }
  0x3c   :  { %1704 = vperm.xlu1 %3639, %v1693_v19   ;;  %v4537_v19 = vld [vmem:[%s5923_s6 + $0x68] ss:$16 sps:$4 sm:$0xff]  }
  0x3f   :  { %1707 = vperm.xlu0 %3638, %v1694_v20   ;;  %v4544_v20 = vld [vmem:[%s5923_s6 + $0xc4] ss:$16 sps:$4 sm:$0xff]  }
  0x40   :  { %1710 = vperm.xlu1 %3639, %v1695_v21   ;;  %v4549_v21 = vld [vmem:[%s5923_s6 + $0x8c] ss:$16 sps:$4 sm:$0xff]  }
  0x43   :  { %1713 = vperm.xlu0 %3638, %v1696_v22  }
  0x44   :  { %1716 = vperm.xlu1 %3639, %v1697_v23  }
  0x47   :  { %1719 = vperm.xlu0 %3638, %v1698_v24   ;;  %v4560_v24 = vld [vmem:[%s5923_s6 + $0xc0] ss:$16 sps:$4 sm:$0xff]  }
  0x48   :  { %1722 = vperm.xlu1 %3639, %v1699_v25   ;;  %v4565_v25 = vld [vmem:[%s5923_s6 + $0x88] ss:$16 sps:$4 sm:$0xff]  }
  0x4b   :  { %3264 = vperm.xlu0 %3638, %v3253_v26  }
  0x4c   :  { %3261 = vperm.xlu1 %3639, %v3252_v27   ;;  %v4572_v27 = vld [vmem:[%s5923_s6 + $0xe4] ss:$16 sps:$4 sm:$0xff]  }
  0x4f   :  { %3273 = vperm.xlu0 %3638, %v3256_v28   ;;  %v4577_v28 = vld [vmem:[%s5923_s6 + $0xac] ss:$16 sps:$4 sm:$0xff]  }
  0x50   :  { %3267 = vperm.xlu1 %3639, %v3254_v29   ;;  %v4586_v29 = vld [vmem:[%s5923_s6 + $0xe0] ss:$16 sps:$4 sm:$0xff]  }
  0x54   :  { %3270 = vperm.xlu1 %3639, %v3255_v30   ;;  %v4591_v30 = vld [vmem:[%s5923_s6 + $0xa8] ss:$16 sps:$4 sm:$0xff]  }
  0xa9   :  { %v240_v38 = vpop.permute.xlu1 %239 }
  0xaa   :  { %v234_v32 = vpop.permute.xlu0 %233  ;;  %vm258_vm4 = vcmp.eq.s32.totalorder %v4399_v33, %v240_v38 }
  0xab   :  { %vm256_vm1 = vcmp.eq.s32.totalorder %v4399_v33, %v234_v32  ;;  %v3423_v59 = vsel %vm258_vm4, 1.0, %v5936_v43  ;;  %v4598_v32 = vld [vmem:[%s5923_s6 + $0xcc] ss:$16 sps:$4 sm:$0xff]  }
  0xac   :  { %v3421_v44 = vsel %vm256_vm1, 1.0, %v5936_v43 }
  0xad   :  { %v243_v50 = vpop.permute.xlu1 %242 }
  0xae   :  { %v237_v35 = vpop.permute.xlu0 %236  ;;  %vm259_vm5 = vcmp.eq.s32.totalorder %v4399_v33, %v243_v50 }
  0xaf   :  { %vm257_vm2 = vcmp.eq.s32.totalorder %v4399_v33, %v237_v35  ;;  %v3424_v60 = vsel %vm259_vm5, 1.0, %v5936_v43  ;;  %v4613_v35 = vld [vmem:[%s5923_s6 + $0xec] ss:$16 sps:$4 sm:$0xff]  }
  0xb0   :  { %v3422_v45 = vsel %vm257_vm2, 1.0, %v5936_v43  ;;  %v281_v63 = vpack.c.bf16 %v3424_v60, %v3423_v59 }
  0xb1   :  { %v280_v47 = vpack.c.bf16 %v3422_v45, %v3421_v44 }
  0xb2   :  { %v246_v3 = vpop.permute.xlu0 %245 }
  0xb3   :  { %v249_v4 = vpop.permute.xlu1 %248  ;;  %vm260_vm6 = vcmp.eq.s32.totalorder %v4399_v33, %v246_v3 }
  0xb4   :  { %vm261_vm7 = vcmp.eq.s32.totalorder %v4399_v33, %v249_v4  ;;  %v3425_v9 = vsel %vm260_vm6, 1.0, %v5936_v43 }
  0xb5   :  { %v3426_v10 = vsel %vm261_vm7, 1.0, %v5936_v43 }
  0xb6   :  { %v282_v13 = vpack.c.bf16 %v3426_v10, %v3425_v9  ;;  %v252_v16 = vpop.permute.xlu0 %251 }
  0xb7   :  { %v255_v17 = vpop.permute.xlu1 %254  ;;  %vm262_vm8 = vcmp.eq.s32.totalorder %v4399_v33, %v252_v16 }
  0xb8   :  { %vm263_vm9 = vcmp.eq.s32.totalorder %v4399_v33, %v255_v17  ;;  %v3427_v22 = vsel %vm262_vm8, 1.0, %v5936_v43 }
  0xb9   :  { %v3428_v23 = vsel %vm263_vm9, 1.0, %v5936_v43 }
  0xba   :  { %v283_v26 = vpack.c.bf16 %v3428_v23, %v3427_v22 }
 0x104   :  { %v170_v34 = vpop.f32.mrb[0].mxu1 }
 0x105   :  { %v172_v36 = vpop.f32.mrb[1].mxu1 }
 0x106   :  { %v174_v37 = vpop.f32.mrb[2].mxu1 }
 0x107   :  { %v284_v39 = vpack.c.bf16 %v174_v37, %v170_v34  ;;  %v176_v40 = vpop.f32.mrb[3].mxu1  ;;  %v4607_v34 = vld [vmem:[%s5923_s6 + $0xc8] ss:$16 sps:$4 sm:$0xff]   ;;  %v4664_v37 = vshrl.u32 %v230_v31, 7 }
 0x108   :  { %v285_v41 = vpack.c.bf16 %v176_v40, %v172_v36  ;;  %v4622_v36 = vld [vmem:[%s5923_s6 + $0xe8] ss:$16 sps:$4 sm:$0xff]  }
 0x109   :  { %5947 = vst [vmem:[#allocation12_spill] sm:$0xff] %v4664_v37  ;;  %v5935_v38 = vsub.s32 0, %v4664_v37  ;;  %v5934_v40 = vsub.s32 1, %v4664_v37 }
 0x10a   :  { %323 = vmatprep.subr.bf16.mxu0 %v285_v41 }
 0x10b   :  { %324 = vmatpush1.bf16.msra.mxu0 %v284_v39  ;;  %v288_v39 = vld [vmem:[%s5924_s7] sm:$0xf] }
 0x10c   :  { %v213_v48 = vpop.f32.mrb[4].mxu1  ;;  %661 = vmatprep.subr.bf16.mxu0 %v4406_v42  ;;  %v293_v44 = vrot.slane %v288_v39, %v5935_v38 }
 0x10d   :  { %v215_v51 = vpop.f32.mrb[5].mxu1 }
 0x10e   :  { %v217_v52 = vpop.f32.mrb[6].mxu1  ;;  %3429 = vmatmul.mubr.msk.bf16.vlgmr.msra.gmra.mrb[0].mxu0 %vm310_vm3, %v280_v47 }
 0x10f   :  { %v286_v53 = vpack.c.bf16 %v217_v52, %v213_v48  ;;  %v219_v54 = vpop.f32.mrb[7].mxu1  ;;  %662 = vmatpush1.bf16.msra.mxu0 %v4413_v46  ;;  %365 = vmatprep.mubr.bf16.mxu0 %v5938_v0  ;;  %v5932_v52 = vsub.s32 2, %v4664_v37 }
 0x110   :  { %v287_v56 = vpack.c.bf16 %v219_v54, %v215_v51  ;;  %663 = vmatprep.subr.bf16.mxu0 %v4419_v49 }
 0x111   :  { %v4687_v60 = vrot.slane %v288_v39, %v5932_v52 }
 0x112   :  { %396 = vmatprep.subr.bf16.mxu1 %v287_v56 }
 0x113   :  { %397 = vmatpush1.bf16.msra.mxu1 %v286_v53  ;;  %664 = vmatpush1.bf16.msra.mxu0 %v4428_v55  ;;  %v5933_v53 = vsub.s32 3, %v4664_v37 }
 0x114   :  { %665 = vmatprep.subr.bf16.mxu0 %v4435_v57  ;;  %702 = vmatprep.subr.bf16.mxu1 %v4440_v58 }
 0x115   :  { %v305_v9 = vrot.slane %v288_v39, %v5933_v53 }
 0x116   :  { %3430 = vmatmul.mubr.msk.bf16.gmra.mrb[4].mxu0 %vm310_vm3, %v281_v63  ;;  %3433 = vmatmul.mubr.msk.bf16.vlgmr.msra.gmra.mrb[8].mxu1 %vm310_vm3, %v280_v47  ;;  %v297_v47 = vrot.slane %v288_v39, %v5934_v40 }
 0x117   :  { %666 = vmatpush1.bf16.msra.mxu0 %v4448_v61  ;;  %703 = vmatpush1.bf16.msra.mxu1 %v4453_v62 }
 0x118   :  { %667 = vmatprep.subr.bf16.mxu0 %v4460_v1  ;;  %704 = vmatprep.subr.bf16.mxu1 %v4465_v2 }
 0x119   :  { %375 = vmatprep.mubr.bf16.mxu0 %v5938_v0  ;;  %438 = vmatprep.mubr.bf16.mxu1 %v5938_v0 }
 0x11b   :  { %668 = vmatpush1.bf16.msra.mxu0 %v4476_v5  ;;  %705 = vmatpush1.bf16.msra.mxu1 %v4481_v6 }
 0x11c   :  { %669 = vmatprep.subr.bf16.mxu0 %v4488_v7  ;;  %706 = vmatprep.subr.bf16.mxu1 %v4493_v8 }
 0x11e   :  { %3431 = vmatmul.mubr.msk.bf16.gmra.mrb[8].mxu0 %vm310_vm3, %v282_v13  ;;  %3434 = vmatmul.mubr.msk.bf16.gmra.mrb[12].mxu1 %vm310_vm3, %v281_v63 }
 0x11f   :  { %670 = vmatpush1.bf16.msra.mxu0 %v4504_v11  ;;  %707 = vmatpush1.bf16.msra.mxu1 %v4509_v12 }
 0x120   :  { %671 = vmatprep.subr.bf16.mxu0 %v4516_v14  ;;  %708 = vmatprep.subr.bf16.mxu1 %v4521_v15 }
 0x121   :  { %385 = vmatprep.mubr.bf16.mxu0 %v5938_v0  ;;  %448 = vmatprep.mubr.bf16.mxu1 %v5938_v0 }
 0x123   :  { %672 = vmatpush1.bf16.msra.mxu0 %v4532_v18  ;;  %709 = vmatpush1.bf16.msra.mxu1 %v4537_v19 }
 0x124   :  { %673 = vmatprep.subr.bf16.mxu0 %v4544_v20  ;;  %710 = vmatprep.subr.bf16.mxu1 %v4549_v21 }
 0x126   :  { %3432 = vmatmul.mubr.msk.bf16.gmra.mrb[12].mxu0 %vm310_vm3, %v283_v26  ;;  %3435 = vmatmul.mubr.msk.bf16.gmra.mrb[16].mxu1 %vm310_vm3, %v282_v13 }
 0x127   :  { %674 = vmatpush1.bf16.msra.mxu0 %v4560_v24  ;;  %711 = vmatpush1.bf16.msra.mxu1 %v4565_v25 }
 0x128   :  { %675 = vmatprep.subr.bf16.mxu0 %v4572_v27  ;;  %712 = vmatprep.subr.bf16.mxu1 %v4577_v28 }
 0x129   :  { %458 = vmatprep.mubr.bf16.mxu1 %v5938_v0  ;;  %693 = vmatprep.mubr.bf16.mxu0 %v5938_v0 }
 0x12b   :  { %676 = vmatpush1.bf16.msra.mxu0 %v4586_v29  ;;  %713 = vmatpush1.bf16.msra.mxu1 %v4591_v30 }
 0x12c   :  { %714 = vmatprep.subr.bf16.mxu1 %v4598_v32  ;;  %772 = vmatprep.subr.bf16.mxu0 %v4406_v42 }
 0x12e   :  { %3436 = vmatmul.mubr.msk.bf16.gmra.mrb[20].mxu1 %vm310_vm3, %v283_v26  ;;  %694 = vmatmul.mubr.bf16.vlgmr.msra.gmra.mrb[16].mxu0 %v5938_v0 }
 0x12f   :  { %715 = vmatpush1.bf16.msra.mxu1 %v4607_v34  ;;  %734 = vmatprep.mubr.bf16.mxu1 %v5938_v0 }
 0x130   :  { %716 = vmatprep.subr.bf16.mxu1 %v4613_v35  ;;  %773 = vmatpush1.bf16.msra.mxu0 %v4413_v46 }
 0x131   :  { %774 = vmatprep.subr.bf16.mxu0 %v4419_v49  ;;  %804 = vmatprep.mubr.bf16.mxu0 %v5938_v0 }
 0x133   :  { %717 = vmatpush1.bf16.msra.mxu1 %v4622_v36 }
 0x134   :  { %813 = vmatprep.subr.bf16.mxu1 %v4440_v58  ;;  %775 = vmatpush1.bf16.msra.mxu0 %v4428_v55 }
 0x135   :  { %776 = vmatprep.subr.bf16.mxu0 %v4435_v57 }
 0x136   :  { %735 = vmatmul.mubr.bf16.vlgmr.msra.gmra.mrb[24].mxu1 %v5938_v0 }
 0x137   :  { %814 = vmatpush1.bf16.msra.mxu1 %v4453_v62  ;;  %845 = vmatprep.mubr.bf16.mxu1 %v5938_v0 }
 0x138   :  { %815 = vmatprep.subr.bf16.mxu1 %v4465_v2  ;;  %777 = vmatpush1.bf16.msra.mxu0 %v4448_v61 }
 0x139   :  { %778 = vmatprep.subr.bf16.mxu0 %v4460_v1 }
 0x13b   :  { %816 = vmatpush1.bf16.msra.mxu1 %v4481_v6 }
 0x13c   :  { %817 = vmatprep.subr.bf16.mxu1 %v4493_v8  ;;  %779 = vmatpush1.bf16.msra.mxu0 %v4476_v5 }
 0x13d   :  { %780 = vmatprep.subr.bf16.mxu0 %v4488_v7 }
 0x13f   :  { %818 = vmatpush1.bf16.msra.mxu1 %v4509_v12 }
 0x140   :  { %819 = vmatprep.subr.bf16.mxu1 %v4521_v15  ;;  %781 = vmatpush1.bf16.msra.mxu0 %v4504_v11 }
 0x141   :  { %782 = vmatprep.subr.bf16.mxu0 %v4516_v14 }
 0x143   :  { %820 = vmatpush1.bf16.msra.mxu1 %v4537_v19 }
 0x144   :  { %821 = vmatprep.subr.bf16.mxu1 %v4549_v21  ;;  %783 = vmatpush1.bf16.msra.mxu0 %v4532_v18 }
 0x145   :  { %784 = vmatprep.subr.bf16.mxu0 %v4544_v20 }
 0x147   :  { %822 = vmatpush1.bf16.msra.mxu1 %v4565_v25 }
 0x148   :  { %823 = vmatprep.subr.bf16.mxu1 %v4577_v28  ;;  %785 = vmatpush1.bf16.msra.mxu0 %v4560_v24 }
 0x149   :  { %786 = vmatprep.subr.bf16.mxu0 %v4572_v27 }
 0x14b   :  { %824 = vmatpush1.bf16.msra.mxu1 %v4591_v30 }
 0x14c   :  { %825 = vmatprep.subr.bf16.mxu1 %v4598_v32  ;;  %787 = vmatpush1.bf16.msra.mxu0 %v4586_v29 }
 0x14d   :  { %883 = vmatprep.subr.bf16.mxu0 %v4406_v42 }
 0x14f   :  { %826 = vmatpush1.bf16.msra.mxu1 %v4607_v34 }
 0x150   :  { %827 = vmatprep.subr.bf16.mxu1 %v4613_v35 }
 0x153   :  { %828 = vmatpush1.bf16.msra.mxu1 %v4622_v36 }
 0x154   :  { %924 = vmatprep.subr.bf16.mxu1 %v4440_v58 }
 0x1e1   :  { %v357_v41 = vpop.f32.mrb[0].mxu0 }
 0x1e2   :  { %v359_v45 = vpop.f32.mrb[1].mxu0 }
 0x1e3   :  { %v361_v48 = vpop.f32.mrb[2].mxu0 }
 0x1e4   :  { %v4675_v50 = vadd.f32 %v361_v48, %v293_v44  ;;  %v363_v31 = vpop.f32.mrb[3].mxu0 }
 0x1e5   :  { %v4677_v51 = vadd.f32 %v363_v31, %v297_v47 }
 0x1e9   :  { %v367_v54 = vpop.f32.mrb[4].mxu0  ;;  %v4681_v56 = vpop.f32.mrb[8].mxu1 }
 0x1ea   :  { %v4683_v59 = vadd.f32 %v367_v54, %v293_v44  ;;  %v369_v63 = vpop.f32.mrb[5].mxu0  ;;  %v4689_v3 = vpop.f32.mrb[9].mxu1 }
 0x1eb   :  { %v4691_v4 = vadd.f32 %v369_v63, %v297_v47  ;;  %v371_v10 = vpop.f32.mrb[6].mxu0  ;;  %v434_v13 = vpop.f32.mrb[10].mxu1 }
 0x1ec   :  { %v4695_v16 = vadd.f32 %v371_v10, %v293_v44  ;;  %v4698_v17 = vadd.f32 %v434_v13, %v4687_v60  ;;  %v373_v22 = vpop.f32.mrb[7].mxu0  ;;  %v436_v23 = vpop.f32.mrb[11].mxu1 }
 0x1ed   :  { %v4700_v26 = vadd.f32 %v373_v22, %v297_v47  ;;  %v4702_v48 = vadd.f32 %v436_v23, %v305_v9 }
 0x1ee   :  { %5948 = vst [vmem:[#allocation13_spill] sm:$0xff] %v4695_v16 }
 0x1ef   :  { %5949 = vst [vmem:[#allocation14_spill] sm:$0xff] %v4700_v26 }
 0x1f1   :  { %v377_v31 = vpop.f32.mrb[8].mxu0  ;;  %v440_v54 = vpop.f32.mrb[12].mxu1 }
 0x1f2   :  { %v4704_v63 = vadd.f32 %v377_v31, %v293_v44  ;;  %v4707_v52 = vadd.f32 %v440_v54, %v4687_v60  ;;  %v379_v39 = vpop.f32.mrb[9].mxu0  ;;  %v442_v53 = vpop.f32.mrb[13].mxu1 }
 0x1f3   :  { %v4709_v10 = vadd.f32 %v379_v39, %v297_v47  ;;  %v4711_v40 = vadd.f32 %v442_v53, %v305_v9  ;;  %v381_v13 = vpop.f32.mrb[10].mxu0  ;;  %v444_v38 = vpop.f32.mrb[14].mxu1 }
 0x1f4   :  { %5950 = vst [vmem:[#allocation15_spill] sm:$0xff] %v4704_v63  ;;  %v4713_v43 = vadd.f32 %v381_v13, %v293_v44  ;;  %v4716_v22 = vadd.f32 %v444_v38, %v4687_v60  ;;  %v383_v23 = vpop.f32.mrb[11].mxu0  ;;  %v446_v0 = vpop.f32.mrb[15].mxu1 }
 0x1f5   :  { %5951 = vst [vmem:[#allocation16_spill] sm:$0xff] %v4709_v10  ;;  %5952 = vst [vmem:[#allocation17_spill] sm:$0xff] %v4711_v40  ;;  %v4718_v31 = vadd.f32 %v383_v23, %v297_v47  ;;  %v4720_v37 = vadd.f32 %v446_v0, %v305_v9 }
 0x1f6   :  { %5953 = vst [vmem:[#allocation18_spill] sm:$0xff] %v4713_v43  ;;  %5954 = vst [vmem:[#allocation19_spill] sm:$0xff] %v4716_v22 }
 0x1f7   :  { %5955 = vst [vmem:[#allocation20_spill] sm:$0xff] %v4718_v31  ;;  %5956 = vst [vmem:[#allocation21_spill] sm:$0xff] %v4720_v37 }
 0x1f9   :  { %v387_v54 = vpop.f32.mrb[12].mxu0  ;;  %v450_v33 = vpop.f32.mrb[16].mxu1 }
 0x1fa   :  { %v4722_v63 = vadd.f32 %v387_v54, %v293_v44  ;;  %v4725_v53 = vadd.f32 %v450_v33, %v4687_v60  ;;  %v389_v39 = vpop.f32.mrb[13].mxu0  ;;  %v452_v10 = vpop.f32.mrb[17].mxu1  ;;  %v358_v33 = vadd.f32 %v357_v41, %v293_v44 }
 0x1fb   :  { %v4727_v13 = vadd.f32 %v389_v39, %v297_v47  ;;  %v4729_v43 = vadd.f32 %v452_v10, %v305_v9  ;;  %v391_v38 = vpop.f32.mrb[14].mxu0  ;;  %v454_v26 = vpop.f32.mrb[18].mxu1 }
 0x1fc   :  { %5957 = vst [vmem:[#allocation22_spill] sm:$0xff] %v4722_v63  ;;  %5958 = vst [vmem:[#allocation23_spill] sm:$0xff] %v4725_v53  ;;  %v4731_v22 = vadd.f32 %v391_v38, %v293_v44  ;;  %v4734_v0 = vadd.f32 %v454_v26, %v4687_v60  ;;  %v393_v23 = vpop.f32.mrb[15].mxu0  ;;  %v456_v31 = vpop.f32.mrb[19].mxu1  ;;  %v360_v53 = vadd.f32 %v359_v45, %v297_v47 }
 0x1fd   :  { %5959 = vst [vmem:[#allocation24_spill] sm:$0xff] %v4727_v13  ;;  %5960 = vst [vmem:[#allocation25_spill] sm:$0xff] %v4729_v43  ;;  %v4736_v54 = vadd.f32 %v393_v23, %v297_v47  ;;  %v4738_v63 = vadd.f32 %v456_v31, %v305_v9 }
 0x1fe   :  { %5961 = vst [vmem:[#allocation26_spill] sm:$0xff] %v4731_v22  ;;  %5962 = vst [vmem:[#allocation27_spill] sm:$0xff] %v4734_v0 }
 0x1ff   :  { %5963 = vst [vmem:[#allocation28_spill] sm:$0xff] %v4736_v54 }
 0x201   :  { %v460_v37 = vpop.f32.mrb[20].mxu1  ;;  %v695_v39 = vpop.f32.mrb[16].mxu0 }
 0x202   :  { %v4741_v10 = vadd.f32 %v460_v37, %v4687_v60  ;;  %v743_v13 = vadd.f32 %v695_v39, %v358_v33  ;;  %v462_v43 = vpop.f32.mrb[21].mxu1  ;;  %v697_v38 = vpop.f32.mrb[17].mxu0  ;;  %v431_v37 = vadd.f32 %v4681_v56, %v4687_v60 }
 0x203   :  { %v4743_v22 = vadd.f32 %v462_v43, %v305_v9  ;;  %v744_v26 = vadd.f32 %v697_v38, %v360_v53  ;;  %v464_v0 = vpop.f32.mrb[22].mxu1  ;;  %v699_v16 = vpop.f32.mrb[18].mxu0  ;;  %v433_v43 = vadd.f32 %v4689_v3, %v305_v9 }
 0x204   :  { %v3469_v40 = vmul.f32 -1.442695, %v743_v13  ;;  %v4746_v23 = vadd.f32 %v464_v0, %v4687_v60  ;;  %v466_v31 = vpop.f32.mrb[23].mxu1  ;;  %v700_v41 = vpop.f32.mrb[19].mxu0 }
 0x205   :  { %v3470_v44 = vmul.f32 -1.442695, %v744_v26  ;;  %v4748_v45 = vadd.f32 %v466_v31, %v305_v9 }
 0x206   :  { %3770 = vpow2.f32 %v3469_v40 }
 0x207   :  { %3772 = vpow2.f32 %v3470_v44 }
 0x209   :  { %v736_v47 = vpop.f32.mrb[24].mxu1 }
 0x20a   :  { %v745_v53 = vadd.f32 %v736_v47, %v431_v37  ;;  %v738_v33 = vpop.f32.mrb[25].mxu1 }
 0x20b   :  { %v746_v16 = vadd.f32 %v738_v33, %v433_v43  ;;  %v740_v13 = vpop.f32.mrb[26].mxu1 }
 0x20c   :  { %v741_v39 = vpop.f32.mrb[27].mxu1 }
 0x20d   :  { %v3471_v0 = vmul.f32 -1.442695, %v746_v16 }
 0x20f   :  { %3774 = vpow2.f32 %v3471_v0 }
 0x210   :  { %v3771_v38 = vpop.eup %3770  ;;  %3776 = vtanh.f32 %v745_v53 }
 0x211   :  { %v3773_v54 = vpop.eup %3772  ;;  %v750_v41 = vadd.f32 1.0, %v3771_v38 }
 0x212   :  { %v756_v26 = vadd.f32 1.0, %v3773_v54  ;;  %v5964_v54 = vmov 0  }
 0x213   :  { %3778 = vrcp.f32 %v750_v41 }
 0x214   :  { %3780 = vrcp.f32 %v756_v26 }
 0x219   :  { %v3775_v40 = vpop.eup %3774 }
 0x21a   :  { %v3777_v31 = vpop.eup %3776  ;;  %v763_v9 = vadd.f32 1.0, %v3775_v40 }
 0x21c   :  { %3782 = vrcp.f32 %v763_v9 }
 0x21d   :  { %v3779_v56 = vpop.eup %3778 }
 0x21e   :  { %v3781_v60 = vpop.eup %3780  ;;  %v767_v3 = vmul.f32 %v3779_v56, %v3777_v31 }
 0x21f   :  { %v766_v44 = vmul.f32 0.0, %v3781_v60 }
 0x221   :  { %v4753_v37 = vadd.f32 %v767_v3, %v766_v44 }
 0x223   :  { %3784 = vtanh.f32 %v4753_v37 }
 0x226   :  { %v3783_v43 = vpop.eup %3782 }
 0x22d   :  { %v3785_v47 = vpop.eup %3784 }
 0x22e   :  { %v770_v33 = vmul.f32 %v3785_v47, %v3783_v43 }
 0x230   :  { %v771_v16 = vpack.c.bf16 %v770_v33, %v770_v33 }
 0x232   :  { %805 = vmatmul.mubr.bf16.vlgmr.msra.gmra.mrb[20].mxu0 %v771_v16  ;;  %846 = vmatmul.mubr.bf16.vlgmr.msra.gmra.mrb[28].mxu1 %v771_v16 }
 0x233   :  { %884 = vmatpush1.bf16.msra.mxu0 %v4413_v46  ;;  %925 = vmatpush1.bf16.msra.mxu1 %v4453_v62 }
 0x234   :  { %885 = vmatprep.subr.bf16.mxu0 %v4419_v49  ;;  %926 = vmatprep.subr.bf16.mxu1 %v4465_v2 }
 0x235   :  { %915 = vmatprep.mubr.bf16.mxu0 %v5964_v54  ;;  %956 = vmatprep.mubr.bf16.mxu1 %v5964_v54 }
 0x237   :  { %886 = vmatpush1.bf16.msra.mxu0 %v4428_v55  ;;  %927 = vmatpush1.bf16.msra.mxu1 %v4481_v6 }
 0x238   :  { %887 = vmatprep.subr.bf16.mxu0 %v4435_v57  ;;  %928 = vmatprep.subr.bf16.mxu1 %v4493_v8 }
 0x23b   :  { %888 = vmatpush1.bf16.msra.mxu0 %v4448_v61  ;;  %929 = vmatpush1.bf16.msra.mxu1 %v4509_v12 }
 0x23c   :  { %889 = vmatprep.subr.bf16.mxu0 %v4460_v1  ;;  %930 = vmatprep.subr.bf16.mxu1 %v4521_v15 }
 0x23f   :  { %890 = vmatpush1.bf16.msra.mxu0 %v4476_v5  ;;  %931 = vmatpush1.bf16.msra.mxu1 %v4537_v19 }
 0x240   :  { %891 = vmatprep.subr.bf16.mxu0 %v4488_v7  ;;  %932 = vmatprep.subr.bf16.mxu1 %v4549_v21 }
 0x243   :  { %892 = vmatpush1.bf16.msra.mxu0 %v4504_v11  ;;  %933 = vmatpush1.bf16.msra.mxu1 %v4565_v25 }
 0x244   :  { %893 = vmatprep.subr.bf16.mxu0 %v4516_v14  ;;  %934 = vmatprep.subr.bf16.mxu1 %v4577_v28 }
 0x247   :  { %894 = vmatpush1.bf16.msra.mxu0 %v4532_v18  ;;  %935 = vmatpush1.bf16.msra.mxu1 %v4591_v30 }
 0x248   :  { %895 = vmatprep.subr.bf16.mxu0 %v4544_v20  ;;  %936 = vmatprep.subr.bf16.mxu1 %v4598_v32 }
 0x24b   :  { %896 = vmatpush1.bf16.msra.mxu0 %v4560_v24  ;;  %937 = vmatpush1.bf16.msra.mxu1 %v4607_v34 }
 0x24c   :  { %897 = vmatprep.subr.bf16.mxu0 %v4572_v27  ;;  %938 = vmatprep.subr.bf16.mxu1 %v4613_v35 }
 0x24f   :  { %898 = vmatpush1.bf16.msra.mxu0 %v4586_v29  ;;  %939 = vmatpush1.bf16.msra.mxu1 %v4622_v36 }
 0x250   :  { %994 = vmatprep.subr.bf16.mxu0 %v4406_v42  ;;  %1035 = vmatprep.subr.bf16.mxu1 %v4440_v58 }
 0x305   :  { %v806_v53 = vpop.f32.mrb[20].mxu0  ;;  %v847_v13 = vpop.f32.mrb[28].mxu1 }
 0x306   :  { %v854_v39 = vadd.f32 %v806_v53, %v4675_v50  ;;  %v856_v0 = vadd.f32 %v847_v13, %v4698_v17  ;;  %v808_v38 = vpop.f32.mrb[21].mxu0  ;;  %v849_v41 = vpop.f32.mrb[29].mxu1 }
 0x307   :  { %v855_v26 = vadd.f32 %v808_v38, %v4677_v51  ;;  %v857_v40 = vadd.f32 %v849_v41, %v4702_v48  ;;  %v810_v31 = vpop.f32.mrb[22].mxu0  ;;  %v851_v56 = vpop.f32.mrb[30].mxu1 }
 0x308   :  { %v3472_v60 = vmul.f32 -1.442695, %v854_v39  ;;  %v811_v3 = vpop.f32.mrb[23].mxu0  ;;  %v852_v9 = vpop.f32.mrb[31].mxu1 }
 0x309   :  { %v3473_v44 = vmul.f32 -1.442695, %v855_v26  ;;  %v3474_v43 = vmul.f32 -1.442695, %v857_v40 }
 0x30a   :  { %3786 = vpow2.f32 %v3472_v60 }
 0x30b   :  { %3788 = vpow2.f32 %v3473_v44 }
 0x30c   :  { %3790 = vpow2.f32 %v3474_v43 }
 0x30d   :  { %3792 = vtanh.f32 %v856_v0 }
 0x314   :  { %v3787_v47 = vpop.eup %3786 }
 0x315   :  { %v3789_v33 = vpop.eup %3788  ;;  %v861_v50 = vadd.f32 1.0, %v3787_v47  ;;  %v5965_v47 = vld [vmem:[#allocation17_spill] sm:$0xff] }
 0x316   :  { %v867_v17 = vadd.f32 1.0, %v3789_v33  ;;  %v3791_v51 = vpop.eup %3790 }
 0x317   :  { %3794 = vrcp.f32 %v861_v50  ;;  %v3793_v16 = vpop.eup %3792  ;;  %v874_v39 = vadd.f32 1.0, %v3791_v51 }
 0x318   :  { %3796 = vrcp.f32 %v867_v17 }
 0x319   :  { %3798 = vrcp.f32 %v874_v39 }
 0x321   :  { %v3795_v48 = vpop.eup %3794 }
 0x322   :  { %v3797_v53 = vpop.eup %3796  ;;  %v878_v13 = vmul.f32 %v3795_v48, %v3793_v16 }
 0x323   :  { %v877_v38 = vmul.f32 %v3797_v53, %v4753_v37  ;;  %v3799_v26 = vpop.eup %3798 }
 0x325   :  { %v4795_v41 = vadd.f32 %v878_v13, %v877_v38 }
 0x327   :  { %3800 = vtanh.f32 %v4795_v41 }
 0x331   :  { %v3801_v40 = vpop.eup %3800 }
 0x332   :  { %v881_v31 = vmul.f32 %v3801_v40, %v3799_v26 }
 0x334   :  { %v882_v0 = vpack.c.bf16 %v881_v31, %v881_v31 }
 0x336   :  { %916 = vmatmul.mubr.bf16.vlgmr.msra.gmra.mrb[24].mxu0 %v882_v0  ;;  %957 = vmatmul.mubr.bf16.vlgmr.msra.gmra.mrb[32].mxu1 %v882_v0 }
 0x337   :  { %995 = vmatpush1.bf16.msra.mxu0 %v4413_v46  ;;  %1036 = vmatpush1.bf16.msra.mxu1 %v4453_v62 }
 0x338   :  { %996 = vmatprep.subr.bf16.mxu0 %v4419_v49  ;;  %1037 = vmatprep.subr.bf16.mxu1 %v4465_v2 }
 0x339   :  { %1026 = vmatprep.mubr.bf16.mxu0 %v5964_v54  ;;  %1067 = vmatprep.mubr.bf16.mxu1 %v5964_v54 }
 0x33b   :  { %997 = vmatpush1.bf16.msra.mxu0 %v4428_v55  ;;  %1038 = vmatpush1.bf16.msra.mxu1 %v4481_v6 }
 0x33c   :  { %998 = vmatprep.subr.bf16.mxu0 %v4435_v57  ;;  %1039 = vmatprep.subr.bf16.mxu1 %v4493_v8 }
 0x33f   :  { %999 = vmatpush1.bf16.msra.mxu0 %v4448_v61  ;;  %1040 = vmatpush1.bf16.msra.mxu1 %v4509_v12 }
 0x340   :  { %1000 = vmatprep.subr.bf16.mxu0 %v4460_v1  ;;  %1041 = vmatprep.subr.bf16.mxu1 %v4521_v15 }
 0x343   :  { %1001 = vmatpush1.bf16.msra.mxu0 %v4476_v5  ;;  %1042 = vmatpush1.bf16.msra.mxu1 %v4537_v19 }
 0x344   :  { %1002 = vmatprep.subr.bf16.mxu0 %v4488_v7  ;;  %1043 = vmatprep.subr.bf16.mxu1 %v4549_v21 }
 0x347   :  { %1003 = vmatpush1.bf16.msra.mxu0 %v4504_v11  ;;  %1044 = vmatpush1.bf16.msra.mxu1 %v4565_v25 }
 0x348   :  { %1004 = vmatprep.subr.bf16.mxu0 %v4516_v14  ;;  %1045 = vmatprep.subr.bf16.mxu1 %v4577_v28 }
 0x34b   :  { %1005 = vmatpush1.bf16.msra.mxu0 %v4532_v18  ;;  %1046 = vmatpush1.bf16.msra.mxu1 %v4591_v30 }
 0x34c   :  { %1006 = vmatprep.subr.bf16.mxu0 %v4544_v20  ;;  %1047 = vmatprep.subr.bf16.mxu1 %v4598_v32 }
 0x34f   :  { %1007 = vmatpush1.bf16.msra.mxu0 %v4560_v24  ;;  %1048 = vmatpush1.bf16.msra.mxu1 %v4607_v34 }
 0x350   :  { %1008 = vmatprep.subr.bf16.mxu0 %v4572_v27  ;;  %1049 = vmatprep.subr.bf16.mxu1 %v4613_v35 }
 0x353   :  { %1009 = vmatpush1.bf16.msra.mxu0 %v4586_v29  ;;  %1050 = vmatpush1.bf16.msra.mxu1 %v4622_v36 }
 0x354   :  { %1105 = vmatprep.subr.bf16.mxu0 %v4406_v42  ;;  %1146 = vmatprep.subr.bf16.mxu1 %v4440_v58 }
 0x409   :  { %v917_v37 = vpop.f32.mrb[24].mxu0  ;;  %v958_v56 = vpop.f32.mrb[32].mxu1 }
 0x40a   :  { %v965_v60 = vadd.f32 %v917_v37, %v4683_v59  ;;  %v967_v3 = vadd.f32 %v958_v56, %v4707_v52  ;;  %v919_v9 = vpop.f32.mrb[25].mxu0  ;;  %v960_v44 = vpop.f32.mrb[33].mxu1 }
 0x40b   :  { %v966_v43 = vadd.f32 %v919_v9, %v4691_v4  ;;  %v968_v33 = vadd.f32 %v960_v44, %v5965_v47  ;;  %v921_v50 = vpop.f32.mrb[26].mxu0  ;;  %v962_v17 = vpop.f32.mrb[34].mxu1 }
 0x40c   :  { %v3475_v51 = vmul.f32 -1.442695, %v965_v60  ;;  %v922_v16 = vpop.f32.mrb[27].mxu0  ;;  %v963_v48 = vpop.f32.mrb[35].mxu1  ;;  %v5967_v17 = vld [vmem:[#allocation19_spill] sm:$0xff] }
 0x40d   :  { %v3476_v53 = vmul.f32 -1.442695, %v966_v43  ;;  %v3477_v13 = vmul.f32 -1.442695, %v968_v33  ;;  %v5966_v33 = vld [vmem:[#allocation13_spill] sm:$0xff] }
 0x40e   :  { %3802 = vpow2.f32 %v3475_v51 }
 0x40f   :  { %3804 = vpow2.f32 %v3476_v53  ;;  %v5968_v53 = vld [vmem:[#allocation14_spill] sm:$0xff] }
 0x410   :  { %3806 = vpow2.f32 %v3477_v13 }
 0x411   :  { %3808 = vtanh.f32 %v967_v3 }
 0x418   :  { %v3803_v39 = vpop.eup %3802 }
 0x419   :  { %v3805_v38 = vpop.eup %3804  ;;  %v972_v59 = vadd.f32 1.0, %v3803_v39  ;;  %v5969_v39 = vld [vmem:[#allocation21_spill] sm:$0xff] }
 0x41a   :  { %v978_v52 = vadd.f32 1.0, %v3805_v38  ;;  %v3807_v4 = vpop.eup %3806 }
 0x41b   :  { %3810 = vrcp.f32 %v972_v59  ;;  %v3809_v26 = vpop.eup %3808  ;;  %v985_v37 = vadd.f32 1.0, %v3807_v4 }
 0x41c   :  { %3812 = vrcp.f32 %v978_v52 }
 0x41d   :  { %3814 = vrcp.f32 %v985_v37 }
 0x425   :  { %v3811_v40 = vpop.eup %3810 }
 0x426   :  { %v3813_v31 = vpop.eup %3812  ;;  %v989_v0 = vmul.f32 %v3811_v40, %v3809_v26 }
 0x427   :  { %v988_v56 = vmul.f32 %v3813_v31, %v4795_v41  ;;  %v3815_v9 = vpop.eup %3814 }
 0x429   :  { %v4837_v60 = vadd.f32 %v989_v0, %v988_v56 }
 0x42b   :  { %3816 = vtanh.f32 %v4837_v60 }
 0x435   :  { %v3817_v44 = vpop.eup %3816 }
 0x436   :  { %v992_v43 = vmul.f32 %v3817_v44, %v3815_v9 }
 0x438   :  { %v993_v3 = vpack.c.bf16 %v992_v43, %v992_v43 }
 0x43a   :  { %1027 = vmatmul.mubr.bf16.vlgmr.msra.gmra.mrb[28].mxu0 %v993_v3  ;;  %1068 = vmatmul.mubr.bf16.vlgmr.msra.gmra.mrb[36].mxu1 %v993_v3 }
 0x43b   :  { %1106 = vmatpush1.bf16.msra.mxu0 %v4413_v46  ;;  %1147 = vmatpush1.bf16.msra.mxu1 %v4453_v62 }
 0x43c   :  { %1107 = vmatprep.subr.bf16.mxu0 %v4419_v49  ;;  %1148 = vmatprep.subr.bf16.mxu1 %v4465_v2 }
 0x43d   :  { %1137 = vmatprep.mubr.bf16.mxu0 %v5964_v54  ;;  %1178 = vmatprep.mubr.bf16.mxu1 %v5964_v54 }
 0x43f   :  { %1108 = vmatpush1.bf16.msra.mxu0 %v4428_v55  ;;  %1149 = vmatpush1.bf16.msra.mxu1 %v4481_v6 }
 0x440   :  { %1109 = vmatprep.subr.bf16.mxu0 %v4435_v57  ;;  %1150 = vmatprep.subr.bf16.mxu1 %v4493_v8 }
 0x443   :  { %1110 = vmatpush1.bf16.msra.mxu0 %v4448_v61  ;;  %1151 = vmatpush1.bf16.msra.mxu1 %v4509_v12 }
 0x444   :  { %1111 = vmatprep.subr.bf16.mxu0 %v4460_v1  ;;  %1152 = vmatprep.subr.bf16.mxu1 %v4521_v15 }
 0x447   :  { %1112 = vmatpush1.bf16.msra.mxu0 %v4476_v5  ;;  %1153 = vmatpush1.bf16.msra.mxu1 %v4537_v19 }
 0x448   :  { %1113 = vmatprep.subr.bf16.mxu0 %v4488_v7  ;;  %1154 = vmatprep.subr.bf16.mxu1 %v4549_v21 }
 0x44b   :  { %1114 = vmatpush1.bf16.msra.mxu0 %v4504_v11  ;;  %1155 = vmatpush1.bf16.msra.mxu1 %v4565_v25 }
 0x44c   :  { %1115 = vmatprep.subr.bf16.mxu0 %v4516_v14  ;;  %1156 = vmatprep.subr.bf16.mxu1 %v4577_v28 }
 0x44f   :  { %1116 = vmatpush1.bf16.msra.mxu0 %v4532_v18  ;;  %1157 = vmatpush1.bf16.msra.mxu1 %v4591_v30 }
 0x450   :  { %1117 = vmatprep.subr.bf16.mxu0 %v4544_v20  ;;  %1158 = vmatprep.subr.bf16.mxu1 %v4598_v32 }
 0x453   :  { %1118 = vmatpush1.bf16.msra.mxu0 %v4560_v24  ;;  %1159 = vmatpush1.bf16.msra.mxu1 %v4607_v34 }
 0x454   :  { %1119 = vmatprep.subr.bf16.mxu0 %v4572_v27  ;;  %1160 = vmatprep.subr.bf16.mxu1 %v4613_v35 }
 0x457   :  { %1120 = vmatpush1.bf16.msra.mxu0 %v4586_v29  ;;  %1161 = vmatpush1.bf16.msra.mxu1 %v4622_v36 }
 0x458   :  { %1216 = vmatprep.subr.bf16.mxu0 %v4406_v42  ;;  %1257 = vmatprep.subr.bf16.mxu1 %v4440_v58 }
 0x50d   :  { %v1028_v41 = vpop.f32.mrb[28].mxu0  ;;  %v1069_v47 = vpop.f32.mrb[36].mxu1 }
 0x50e   :  { %v1076_v50 = vadd.f32 %v1028_v41, %v5966_v33  ;;  %v1078_v51 = vadd.f32 %v1069_v47, %v5967_v17  ;;  %v1030_v16 = vpop.f32.mrb[29].mxu0  ;;  %v1071_v48 = vpop.f32.mrb[37].mxu1 }
 0x50f   :  { %v1077_v13 = vadd.f32 %v1030_v16, %v5968_v53  ;;  %v1079_v38 = vadd.f32 %v1071_v48, %v5969_v39  ;;  %v1032_v59 = vpop.f32.mrb[30].mxu0  ;;  %v1073_v52 = vpop.f32.mrb[38].mxu1 }
 0x510   :  { %v3478_v4 = vmul.f32 -1.442695, %v1076_v50  ;;  %v1033_v26 = vpop.f32.mrb[31].mxu0  ;;  %v1074_v40 = vpop.f32.mrb[39].mxu1 }
 0x511   :  { %v3479_v42 = vmul.f32 -1.442695, %v1077_v13  ;;  %v3480_v31 = vmul.f32 -1.442695, %v1079_v38 }
 0x512   :  { %3818 = vpow2.f32 %v3478_v4 }
 0x513   :  { %3820 = vpow2.f32 %v3479_v42 }
 0x514   :  { %3822 = vpow2.f32 %v3480_v31 }
 0x515   :  { %3824 = vtanh.f32 %v1078_v51 }
 0x51c   :  { %v3819_v0 = vpop.eup %3818 }
 0x51d   :  { %v3821_v37 = vpop.eup %3820  ;;  %v1083_v56 = vadd.f32 1.0, %v3819_v0 }
 0x51e   :  { %v1089_v9 = vadd.f32 1.0, %v3821_v37  ;;  %v3823_v44 = vpop.eup %3822 }
 0x51f   :  { %3826 = vrcp.f32 %v1083_v56  ;;  %v3825_v43 = vpop.eup %3824  ;;  %v1096_v33 = vadd.f32 1.0, %v3823_v44 }
 0x520   :  { %3828 = vrcp.f32 %v1089_v9 }
 0x521   :  { %3830 = vrcp.f32 %v1096_v33  ;;  %v4950_v33 = vld [vmem:[%s5923_s6 + $0x2c] ss:$16 sps:$4 sm:$0xff]  }
 0x529   :  { %v3827_v3 = vpop.eup %3826 }
 0x52a   :  { %v3829_v41 = vpop.eup %3828  ;;  %v1100_v47 = vmul.f32 %v3827_v3, %v3825_v43  ;;  %v4932_v3 = vld [vmem:[%s5923_s6] ss:$16 sps:$4 sm:$0xff]  }
 0x52b   :  { %v1099_v50 = vmul.f32 %v3829_v41, %v4837_v60  ;;  %v3831_v16 = vpop.eup %3830  ;;  %v4938_v41 = vld [vmem:[%s5923_s6 + $0x8] ss:$16 sps:$4 sm:$0xff]  }
 0x52d   :  { %v4879_v17 = vadd.f32 %v1100_v47, %v1099_v50  ;;  %v4944_v47 = vld [vmem:[%s5923_s6 + $0x24] ss:$16 sps:$4 sm:$0xff]   ;;  %v4958_v50 = vld [vmem:[%s5923_s6 + $0x20] ss:$16 sps:$4 sm:$0xff]  }
 0x52f   :  { %3832 = vtanh.f32 %v4879_v17 }
 0x539   :  { %v3833_v48 = vpop.eup %3832 }
 0x53a   :  { %v1103_v53 = vmul.f32 %v3833_v48, %v3831_v16  ;;  %v4970_v16 = vld [vmem:[%s5923_s6 + $0x44] ss:$16 sps:$4 sm:$0xff]   ;;  %v4976_v48 = vld [vmem:[%s5923_s6 + $0x4c] ss:$16 sps:$4 sm:$0xff]  }
 0x53c   :  { %v1104_v51 = vpack.c.bf16 %v1103_v53, %v1103_v53  ;;  %v4982_v53 = vld [vmem:[%s5923_s6 + $0x40] ss:$16 sps:$4 sm:$0xff]  }
 0x53e   :  { %1138 = vmatmul.mubr.bf16.vlgmr.msra.gmra.mrb[32].mxu0 %v1104_v51  ;;  %1179 = vmatmul.mubr.bf16.vlgmr.msra.gmra.mrb[40].mxu1 %v1104_v51  ;;  %v4988_v51 = vld [vmem:[%s5923_s6 + $0x48] ss:$16 sps:$4 sm:$0xff]  }
 0x53f   :  { %1217 = vmatpush1.bf16.msra.mxu0 %v4413_v46  ;;  %1258 = vmatpush1.bf16.msra.mxu1 %v4453_v62  ;;  %v4917_v46 = vld [vmem:[%s5923_s6 + $0x4] ss:$16 sps:$4 sm:$0xff]  }
 0x540   :  { %1218 = vmatprep.subr.bf16.mxu0 %v4419_v49  ;;  %1259 = vmatprep.subr.bf16.mxu1 %v4465_v2  ;;  %v5971_v62 = vld [vmem:[#allocation23_spill] sm:$0xff] }
 0x541   :  { %1248 = vmatprep.mubr.bf16.mxu0 %v5964_v54  ;;  %1289 = vmatprep.mubr.bf16.mxu1 %v5964_v54 }
 0x543   :  { %1219 = vmatpush1.bf16.msra.mxu0 %v4428_v55  ;;  %1260 = vmatpush1.bf16.msra.mxu1 %v4481_v6  ;;  %v5972_v6 = vld [vmem:[#allocation16_spill] sm:$0xff] }
 0x544   :  { %1220 = vmatprep.subr.bf16.mxu0 %v4435_v57  ;;  %1261 = vmatprep.subr.bf16.mxu1 %v4493_v8  ;;  %v5970_v57 = vld [vmem:[#allocation15_spill] sm:$0xff]  ;;  %v5973_v8 = vld [vmem:[#allocation25_spill] sm:$0xff] }
 0x547   :  { %1221 = vmatpush1.bf16.msra.mxu0 %v4448_v61  ;;  %1262 = vmatpush1.bf16.msra.mxu1 %v4509_v12 }
 0x548   :  { %1222 = vmatprep.subr.bf16.mxu0 %v4460_v1  ;;  %1263 = vmatprep.subr.bf16.mxu1 %v4521_v15 }
 0x54b   :  { %1223 = vmatpush1.bf16.msra.mxu0 %v4476_v5  ;;  %1264 = vmatpush1.bf16.msra.mxu1 %v4537_v19 }
 0x54c   :  { %1224 = vmatprep.subr.bf16.mxu0 %v4488_v7  ;;  %1265 = vmatprep.subr.bf16.mxu1 %v4549_v21 }
 0x54f   :  { %1225 = vmatpush1.bf16.msra.mxu0 %v4504_v11  ;;  %1266 = vmatpush1.bf16.msra.mxu1 %v4565_v25 }
 0x550   :  { %1226 = vmatprep.subr.bf16.mxu0 %v4516_v14  ;;  %1267 = vmatprep.subr.bf16.mxu1 %v4577_v28 }
 0x553   :  { %1227 = vmatpush1.bf16.msra.mxu0 %v4532_v18  ;;  %1268 = vmatpush1.bf16.msra.mxu1 %v4591_v30 }
 0x554   :  { %1228 = vmatprep.subr.bf16.mxu0 %v4544_v20  ;;  %1269 = vmatprep.subr.bf16.mxu1 %v4598_v32 }
 0x557   :  { %1229 = vmatpush1.bf16.msra.mxu0 %v4560_v24  ;;  %1270 = vmatpush1.bf16.msra.mxu1 %v4607_v34 }
 0x558   :  { %1230 = vmatprep.subr.bf16.mxu0 %v4572_v27  ;;  %1271 = vmatprep.subr.bf16.mxu1 %v4613_v35 }
 0x55b   :  { %1231 = vmatpush1.bf16.msra.mxu0 %v4586_v29  ;;  %1272 = vmatpush1.bf16.msra.mxu1 %v4622_v36 }
 0x55c   :  { %1327 = vmatprep.subr.bf16.mxu0 %v4917_v46  ;;  %1368 = vmatprep.subr.bf16.mxu1 %v4440_v58 }
 0x611   :  { %v1139_v49 = vpop.f32.mrb[32].mxu0  ;;  %v1180_v55 = vpop.f32.mrb[40].mxu1 }
 0x612   :  { %v1187_v61 = vadd.f32 %v1139_v49, %v5970_v57  ;;  %v1189_v1 = vadd.f32 %v1180_v55, %v5971_v62  ;;  %v1141_v2 = vpop.f32.mrb[33].mxu0  ;;  %v1182_v5 = vpop.f32.mrb[41].mxu1  ;;  %v4994_v49 = vld [vmem:[%s5923_s6 + $0x64] ss:$16 sps:$4 sm:$0xff]   ;;  %v5000_v55 = vld [vmem:[%s5923_s6 + $0x6c] ss:$16 sps:$4 sm:$0xff]  }
 0x613   :  { %v1188_v7 = vadd.f32 %v1141_v2, %v5972_v6  ;;  %v1190_v11 = vadd.f32 %v1182_v5, %v5973_v8  ;;  %v1143_v12 = vpop.f32.mrb[34].mxu0  ;;  %v1184_v14 = vpop.f32.mrb[42].mxu1  ;;  %v5006_v57 = vld [vmem:[%s5923_s6 + $0x60] ss:$16 sps:$4 sm:$0xff]  }
 0x614   :  { %v3481_v15 = vmul.f32 -1.442695, %v1187_v61  ;;  %v1144_v18 = vpop.f32.mrb[35].mxu0  ;;  %v1185_v20 = vpop.f32.mrb[43].mxu1  ;;  %v5013_v61 = vld [vmem:[%s5923_s6 + $0x84] ss:$16 sps:$4 sm:$0xff]  }
 0x615   :  { %v3482_v60 = vmul.f32 -1.442695, %v1188_v7  ;;  %v3483_v58 = vmul.f32 -1.442695, %v1190_v11  ;;  %v5020_v62 = vld [vmem:[%s5923_s6 + $0x80] ss:$16 sps:$4 sm:$0xff]  }
 0x616   :  { %3834 = vpow2.f32 %v3481_v15 }
 0x617   :  { %3836 = vpow2.f32 %v3482_v60 }
 0x618   :  { %3838 = vpow2.f32 %v3483_v58 }
 0x619   :  { %3840 = vtanh.f32 %v1189_v1 }
 0x620   :  { %v3835_v13 = vpop.eup %3834 }
 0x621   :  { %v3837_v39 = vpop.eup %3836  ;;  %v1194_v38 = vadd.f32 1.0, %v3835_v13 }
 0x622   :  { %v1200_v59 = vadd.f32 1.0, %v3837_v39  ;;  %v3839_v52 = vpop.eup %3838 }
 0x623   :  { %3842 = vrcp.f32 %v1194_v38  ;;  %v3841_v4 = vpop.eup %3840  ;;  %v1207_v31 = vadd.f32 1.0, %v3839_v52 }
 0x624   :  { %3844 = vrcp.f32 %v1200_v59 }
 0x625   :  { %3846 = vrcp.f32 %v1207_v31 }
 0x62d   :  { %v3843_v26 = vpop.eup %3842 }
 0x62e   :  { %v3845_v40 = vpop.eup %3844  ;;  %v1211_v42 = vmul.f32 %v3843_v26, %v3841_v4 }
 0x62f   :  { %v1210_v0 = vmul.f32 %v3845_v40, %v4879_v17  ;;  %v3847_v56 = vpop.eup %3846  ;;  %v4964_v17 = vld [vmem:[%s5923_s6 + $0x28] ss:$16 sps:$4 sm:$0xff]  }
 0x631   :  { %v4926_v37 = vadd.f32 %v1211_v42, %v1210_v0  ;;  %v4078_v0 = vld [vmem:[%s5923_s6 + $0x68] ss:$16 sps:$4 sm:$0xff]  }
 0x633   :  { %3848 = vtanh.f32 %v4926_v37 }
 0x63d   :  { %v3849_v9 = vpop.eup %3848 }
 0x63e   :  { %v1214_v44 = vmul.f32 %v3849_v9, %v3847_v56  ;;  %v4080_v56 = vld [vmem:[%s5923_s6 + $0x88] ss:$16 sps:$4 sm:$0xff]   ;;  %v4081_v9 = vld [vmem:[%s5923_s6 + $0xac] ss:$16 sps:$4 sm:$0xff]  }
 0x640   :  { %v1215_v43 = vpack.c.bf16 %v1214_v44, %v1214_v44  ;;  %v4082_v44 = vld [vmem:[%s5923_s6 + $0xa8] ss:$16 sps:$4 sm:$0xff]  }
 0x642   :  { %1249 = vmatmul.mubr.bf16.vlgmr.msra.gmra.mrb[36].mxu0 %v1215_v43  ;;  %1290 = vmatmul.mubr.bf16.vlgmr.msra.gmra.mrb[44].mxu1 %v1215_v43  ;;  %v4083_v43 = vld [vmem:[%s5923_s6 + $0xcc] ss:$16 sps:$4 sm:$0xff]  }
 0x643   :  { %1328 = vmatpush1.bf16.msra.mxu0 %v4932_v3  ;;  %1369 = vmatpush1.bf16.msra.mxu1 %v4938_v41 }
 0x644   :  { %1329 = vmatprep.subr.bf16.mxu0 %v4944_v47  ;;  %1370 = vmatprep.subr.bf16.mxu1 %v4950_v33 }
 0x645   :  { %1359 = vmatprep.mubr.bf16.mxu0 %v5964_v54  ;;  %1400 = vmatprep.mubr.bf16.mxu1 %v5964_v54 }
 0x647   :  { %1330 = vmatpush1.bf16.msra.mxu0 %v4958_v50  ;;  %1371 = vmatpush1.bf16.msra.mxu1 %v4964_v17 }
 0x648   :  { %1331 = vmatprep.subr.bf16.mxu0 %v4970_v16  ;;  %1372 = vmatprep.subr.bf16.mxu1 %v4976_v48 }
 0x64b   :  { %1332 = vmatpush1.bf16.msra.mxu0 %v4982_v53  ;;  %1373 = vmatpush1.bf16.msra.mxu1 %v4988_v51 }
 0x64c   :  { %1333 = vmatprep.subr.bf16.mxu0 %v4994_v49  ;;  %1374 = vmatprep.subr.bf16.mxu1 %v5000_v55 }
 0x64f   :  { %1334 = vmatpush1.bf16.msra.mxu0 %v5006_v57  ;;  %1375 = vmatpush1.bf16.msra.mxu1 %v4537_v19  ;;  %v5027_v19 = vld [vmem:[%s5923_s6 + $0xa4] ss:$16 sps:$4 sm:$0xff]  }
 0x650   :  { %1335 = vmatprep.subr.bf16.mxu0 %v5013_v61  ;;  %1376 = vmatprep.subr.bf16.mxu1 %v4549_v21  ;;  %v5034_v21 = vld [vmem:[%s5923_s6 + $0xa0] ss:$16 sps:$4 sm:$0xff]  }
 0x653   :  { %1336 = vmatpush1.bf16.msra.mxu0 %v5020_v62  ;;  %1377 = vmatpush1.bf16.msra.mxu1 %v4565_v25  ;;  %v5041_v25 = vld [vmem:[%s5923_s6 + $0xc4] ss:$16 sps:$4 sm:$0xff]  }
 0x654   :  { %1337 = vmatprep.subr.bf16.mxu0 %v5027_v19  ;;  %1378 = vmatprep.subr.bf16.mxu1 %v4577_v28  ;;  %v4077_v28 = vld [vmem:[%s5923_s6 + $0xc] ss:$16 sps:$4 sm:$0xff]  }
 0x657   :  { %1338 = vmatpush1.bf16.msra.mxu0 %v5034_v21  ;;  %1379 = vmatpush1.bf16.msra.mxu1 %v4591_v30 }
 0x658   :  { %1339 = vmatprep.subr.bf16.mxu0 %v5041_v25  ;;  %1380 = vmatprep.subr.bf16.mxu1 %v4598_v32 }
 0x65b   :  { %1340 = vmatpush1.bf16.msra.mxu0 %v4560_v24  ;;  %1381 = vmatpush1.bf16.msra.mxu1 %v4607_v34  ;;  %v5974_v24 = vld [vmem:[#allocation18_spill] sm:$0xff]  ;;  %v5975_v34 = vld [vmem:[#allocation27_spill] sm:$0xff] }
 0x65c   :  { %1341 = vmatprep.subr.bf16.mxu0 %v4572_v27  ;;  %1382 = vmatprep.subr.bf16.mxu1 %v4613_v35  ;;  %v5976_v35 = vld [vmem:[#allocation20_spill] sm:$0xff] }
 0x65f   :  { %1342 = vmatpush1.bf16.msra.mxu0 %v4586_v29  ;;  %1383 = vmatpush1.bf16.msra.mxu1 %v4622_v36 }
 0x660   :  { %1438 = vmatprep.subr.bf16.mxu0 %v4917_v46  ;;  %1479 = vmatprep.subr.bf16.mxu1 %v4077_v28 }
 0x715   :  { %v1250_v30 = vpop.f32.mrb[36].mxu0  ;;  %v1291_v32 = vpop.f32.mrb[44].mxu1 }
 0x716   :  { %v1298_v1 = vadd.f32 %v1250_v30, %v5974_v24  ;;  %v1300_v2 = vadd.f32 %v1291_v32, %v5975_v34  ;;  %v1252_v27 = vpop.f32.mrb[37].mxu0  ;;  %v1293_v5 = vpop.f32.mrb[45].mxu1 }
 0x717   :  { %v1299_v6 = vadd.f32 %v1252_v27, %v5976_v35  ;;  %v1301_v29 = vadd.f32 %v1293_v5, %v4738_v63  ;;  %v1254_v36 = vpop.f32.mrb[38].mxu0  ;;  %v1295_v7 = vpop.f32.mrb[46].mxu1 }
 0x718   :  { %v3484_v46 = vmul.f32 -1.442695, %v1298_v1  ;;  %v1255_v8 = vpop.f32.mrb[39].mxu0  ;;  %v1296_v11 = vpop.f32.mrb[47].mxu1 }
 0x719   :  { %v3485_v12 = vmul.f32 -1.442695, %v1299_v6  ;;  %v3486_v14 = vmul.f32 -1.442695, %v1301_v29 }
 0x71a   :  { %3850 = vpow2.f32 %v3484_v46 }
 0x71b   :  { %3852 = vpow2.f32 %v3485_v12 }
 0x71c   :  { %3854 = vpow2.f32 %v3486_v14 }
 0x71d   :  { %3856 = vtanh.f32 %v1300_v2 }
 0x724   :  { %v3851_v15 = vpop.eup %3850 }
 0x725   :  { %v3853_v18 = vpop.eup %3852  ;;  %v1305_v20 = vadd.f32 1.0, %v3851_v15  ;;  %v3701_v15 = vld [vmem:[#allocation2] ss:$16 sps:$4 sm:$0xff]  }
 0x726   :  { %v1311_v60 = vadd.f32 1.0, %v3853_v18  ;;  %v3855_v58 = vpop.eup %3854 }
 0x727   :  { %3858 = vrcp.f32 %v1305_v20  ;;  %v3857_v13 = vpop.eup %3856  ;;  %v1318_v59 = vadd.f32 1.0, %v3855_v58  ;;  %v3706_v20 = vld [vmem:[#allocation2 + $0x24] ss:$16 sps:$4 sm:$0xff]   ;;  %v3710_v58 = vld [vmem:[#allocation2 + $0xc] ss:$16 sps:$4 sm:$0xff]  }
 0x728   :  { %3860 = vrcp.f32 %v1311_v60  ;;  %v3704_v60 = vld [vmem:[#allocation2 + $0x20] ss:$16 sps:$4 sm:$0xff]  }
 0x729   :  { %3862 = vrcp.f32 %v1318_v59 }
 0x731   :  { %v3859_v63 = vpop.eup %3858 }
 0x732   :  { %v3861_v39 = vpop.eup %3860  ;;  %v1322_v38 = vmul.f32 %v3859_v63, %v3857_v13  ;;  %v3707_v13 = vld [vmem:[%s5925_s8] sm:$0xff]   ;;  %v3708_v63 = vld [vmem:[#allocation2 + $0x8] ss:$16 sps:$4 sm:$0xff]  }
 0x733   :  { %v1321_v52 = vmul.f32 %v3861_v39, %v4926_v37  ;;  %v3863_v26 = vpop.eup %3862  ;;  %v4079_v37 = vld [vmem:[%s5923_s6 + $0x8c] ss:$16 sps:$4 sm:$0xff]  }
 0x734   :  { %v3713_v39 = vld [vmem:[#allocation2 + $0x2c] ss:$16 sps:$4 sm:$0xff]  }
 0x735   :  { %v5060_v4 = vadd.f32 %v1322_v38, %v1321_v52  ;;  %v3711_v38 = vld [vmem:[#allocation2 + $0x28] ss:$16 sps:$4 sm:$0xff]  }
 0x737   :  { %3864 = vtanh.f32 %v5060_v4 }
 0x741   :  { %v3865_v40 = vpop.eup %3864 }
 0x742   :  { %v1325_v42 = vmul.f32 %v3865_v40, %v3863_v26 }
 0x744   :  { %v1326_v31 = vpack.c.bf16 %v1325_v42, %v1325_v42 }
 0x746   :  { %1360 = vmatmul.mubr.bf16.vlgmr.msra.gmra.mrb[40].mxu0 %v1326_v31  ;;  %1401 = vmatmul.mubr.bf16.vlgmr.msra.gmra.mrb[48].mxu1 %v1326_v31 }
 0x747   :  { %1439 = vmatpush1.bf16.msra.mxu0 %v4932_v3  ;;  %1480 = vmatpush1.bf16.msra.mxu1 %v4938_v41  ;;  %v4084_v3 = vld [vmem:[%s5923_s6 + $0xc0] ss:$16 sps:$4 sm:$0xff]   ;;  %v4085_v41 = vld [vmem:[%s5923_s6 + $0xc8] ss:$16 sps:$4 sm:$0xff]  }
 0x748   :  { %1440 = vmatprep.subr.bf16.mxu0 %v4944_v47  ;;  %1481 = vmatprep.subr.bf16.mxu1 %v4950_v33  ;;  %v4086_v47 = vld [vmem:[%s5923_s6 + $0xe4] ss:$16 sps:$4 sm:$0xff]   ;;  %v4087_v33 = vld [vmem:[%s5923_s6 + $0xec] ss:$16 sps:$4 sm:$0xff]  }
 0x749   :  { %1470 = vmatprep.mubr.bf16.mxu0 %v5964_v54  ;;  %1511 = vmatprep.mubr.bf16.mxu1 %v5964_v54 }
 0x74b   :  { %1441 = vmatpush1.bf16.msra.mxu0 %v4958_v50  ;;  %1482 = vmatpush1.bf16.msra.mxu1 %v4964_v17  ;;  %v4088_v50 = vld [vmem:[%s5923_s6 + $0xe0] ss:$16 sps:$4 sm:$0xff]   ;;  %v4089_v17 = vld [vmem:[%s5923_s6 + $0xe8] ss:$16 sps:$4 sm:$0xff]  }
 0x74c   :  { %1442 = vmatprep.subr.bf16.mxu0 %v4970_v16  ;;  %1483 = vmatprep.subr.bf16.mxu1 %v4976_v48  ;;  %v3703_v16 = vld [vmem:[#allocation2 + $0x4] ss:$16 sps:$4 sm:$0xff]  }
 0x74f   :  { %1443 = vmatpush1.bf16.msra.mxu0 %v4982_v53  ;;  %1484 = vmatpush1.bf16.msra.mxu1 %v4988_v51  ;;  %v5977_v51 = vld [vmem:[#allocation22_spill] sm:$0xff] }
 0x750   :  { %1444 = vmatprep.subr.bf16.mxu0 %v4994_v49  ;;  %1485 = vmatprep.subr.bf16.mxu1 %v5000_v55 }
 0x753   :  { %1445 = vmatpush1.bf16.msra.mxu0 %v5006_v57  ;;  %1486 = vmatpush1.bf16.msra.mxu1 %v4078_v0  ;;  %v5980_v0 = vld [vmem:[#allocation28_spill] sm:$0xff] }
 0x754   :  { %1446 = vmatprep.subr.bf16.mxu0 %v5013_v61  ;;  %1487 = vmatprep.subr.bf16.mxu1 %v4079_v37 }
 0x757   :  { %1447 = vmatpush1.bf16.msra.mxu0 %v5020_v62  ;;  %1488 = vmatpush1.bf16.msra.mxu1 %v4080_v56  ;;  %v5978_v62 = vld [vmem:[#allocation24_spill] sm:$0xff] }
 0x758   :  { %1448 = vmatprep.subr.bf16.mxu0 %v5027_v19  ;;  %1489 = vmatprep.subr.bf16.mxu1 %v4081_v9 }
 0x75b   :  { %1449 = vmatpush1.bf16.msra.mxu0 %v5034_v21  ;;  %1490 = vmatpush1.bf16.msra.mxu1 %v4082_v44 }
 0x75c   :  { %1450 = vmatprep.subr.bf16.mxu0 %v5041_v25  ;;  %1491 = vmatprep.subr.bf16.mxu1 %v4083_v43 }
 0x75f   :  { %1451 = vmatpush1.bf16.msra.mxu0 %v4084_v3  ;;  %1492 = vmatpush1.bf16.msra.mxu1 %v4085_v41 }
 0x760   :  { %1452 = vmatprep.subr.bf16.mxu0 %v4086_v47  ;;  %1493 = vmatprep.subr.bf16.mxu1 %v4087_v33  ;;  %v1702_v33 = vpop.permute.xlu0 %1701 }
 0x763   :  { %1453 = vmatpush1.bf16.msra.mxu0 %v4088_v50  ;;  %1494 = vmatpush1.bf16.msra.mxu1 %v4089_v17  ;;  %v1705_v17 = vpop.permute.xlu1 %1704 }
 0x764   :  { %1606 = vmatprep.subr.bf16.mxu1 %v3703_v16 }
 0x819   :  { %v1361_v48 = vpop.f32.mrb[40].mxu0  ;;  %v1402_v53 = vpop.f32.mrb[48].mxu1 }
 0x81a   :  { %v1409_v49 = vadd.f32 %v1361_v48, %v5977_v51  ;;  %v1411_v55 = vadd.f32 %v1402_v53, %v4741_v10  ;;  %v1363_v57 = vpop.f32.mrb[41].mxu0  ;;  %v1404_v61 = vpop.f32.mrb[49].mxu1  ;;  %v5981_v48 = vld [vmem:[#allocation11_spill] sm:$0xff] }
 0x81b   :  { %v1410_v19 = vadd.f32 %v1363_v57, %v5978_v62  ;;  %v1412_v21 = vadd.f32 %v1404_v61, %v4743_v22  ;;  %v1365_v25 = vpop.f32.mrb[42].mxu0  ;;  %v1406_v28 = vpop.f32.mrb[50].mxu1  ;;  %vm1724_vm10 = vcmp.eq.s32.totalorder %v5981_v48, %v1702_v33  ;;  %vm1725_vm11 = vcmp.eq.s32.totalorder %v5981_v48, %v1705_v17  ;;  %v5220_v33 = vld [vmem:[#allocation5 + $0x68] ss:$16 sps:$4 sm:$0xff]   ;;  %v5226_v17 = vld [vmem:[#allocation5 + $0x8c] ss:$16 sps:$4 sm:$0xff]  }
 0x81c   :  { %v3487_v30 = vmul.f32 -1.442695, %v1409_v49  ;;  %v1366_v32 = vpop.f32.mrb[43].mxu0  ;;  %v1407_v24 = vpop.f32.mrb[51].mxu1  ;;  %v5982_v57 = vmov 0.0  }
 0x81d   :  { %v3488_v1 = vmul.f32 -1.442695, %v1410_v19  ;;  %v3489_v34 = vmul.f32 -1.442695, %v1412_v21  ;;  %v3504_v61 = vsel %vm1724_vm10, 1.0, %v5982_v57  ;;  %v3505_v62 = vsel %vm1725_vm11, 1.0, %v5982_v57 }
 0x81e   :  { %3866 = vpow2.f32 %v3487_v30  ;;  %v5146_v21 = vld [vmem:[#allocation5] ss:$16 sps:$4 sm:$0xff]   ;;  %v1748_v28 = vpack.c.bf16 %v3505_v62, %v3504_v61  ;;  %v1708_v30 = vpop.permute.xlu0 %1707  ;;  %v5242_v61 = vld [vmem:[#allocation5 + $0xac] ss:$16 sps:$4 sm:$0xff]   ;;  %vm3392_vm11 = vcmask 0  }
 0x81f   :  { %3868 = vpow2.f32 %v3488_v1  ;;  %v5149_v1 = vld [vmem:[#allocation5 + $0x24] ss:$16 sps:$4 sm:$0xff]   ;;  %vm1726_vm12 = vcmp.eq.s32.totalorder %v5981_v48, %v1708_v30  ;;  %v5254_v30 = vld [vmem:[#allocation5 + $0xcc] ss:$16 sps:$4 sm:$0xff]  }
 0x820   :  { %3870 = vpow2.f32 %v3489_v34  ;;  %v1711_v34 = vpop.permute.xlu1 %1710 }
 0x821   :  { %3872 = vtanh.f32 %v1411_v55  ;;  %v5142_v55 = vld [vmem:[#allocation5 + $0x4] ss:$16 sps:$4 sm:$0xff]   ;;  %vm1727_vm13 = vcmp.eq.s32.totalorder %v5981_v48, %v1711_v34  ;;  %v5260_v34 = vld [vmem:[#allocation5 + $0xc8] ss:$16 sps:$4 sm:$0xff]  }
 0x828   :  { %v3867_v2 = vpop.eup %3866 }
 0x829   :  { %v3869_v27 = vpop.eup %3868  ;;  %v1416_v5 = vadd.f32 1.0, %v3867_v2 }
 0x82a   :  { %v1422_v10 = vadd.f32 1.0, %v3869_v27  ;;  %v3871_v35 = vpop.eup %3870 }
 0x82b   :  { %3874 = vrcp.f32 %v1416_v5  ;;  %v3873_v6 = vpop.eup %3872  ;;  %v1429_v7 = vadd.f32 1.0, %v3871_v35 }
 0x82c   :  { %3876 = vrcp.f32 %v1422_v10 }
 0x82d   :  { %3878 = vrcp.f32 %v1429_v7  ;;  %v3506_v7 = vsel %vm1726_vm12, 1.0, %v5982_v57 }
 0x835   :  { %v3875_v22 = vpop.eup %3874 }
 0x836   :  { %v3877_v29 = vpop.eup %3876  ;;  %v1433_v36 = vmul.f32 %v3875_v22, %v3873_v6  ;;  %v5155_v6 = vld [vmem:[#allocation5 + $0x20] ss:$16 sps:$4 sm:$0xff]  }
 0x837   :  { %v1432_v46 = vmul.f32 %v3877_v29, %v5060_v4  ;;  %v3879_v11 = vpop.eup %3878  ;;  %v5979_v4 = vld [vmem:[#allocation26_spill] sm:$0xff]  ;;  %v5159_v29 = vld [vmem:[#allocation5 + $0x44] ss:$16 sps:$4 sm:$0xff]  }
 0x839   :  { %v5124_v8 = vadd.f32 %v1433_v36, %v1432_v46  ;;  %v5161_v36 = vld [vmem:[#allocation5 + $0xc] ss:$16 sps:$4 sm:$0xff]   ;;  %v3507_v46 = vsel %vm1727_vm13, 1.0, %v5982_v57 }
 0x83b   :  { %3880 = vtanh.f32 %v5124_v8 }
 0x845   :  { %v3881_v12 = vpop.eup %3880 }
 0x846   :  { %v1436_v14 = vmul.f32 %v3881_v12, %v3879_v11  ;;  %v5166_v11 = vld [vmem:[#allocation5 + $0x40] ss:$16 sps:$4 sm:$0xff]   ;;  %v5168_v12 = vld [vmem:[#allocation5 + $0x8] ss:$16 sps:$4 sm:$0xff]  }
 0x848   :  { %v1437_v18 = vpack.c.bf16 %v1436_v14, %v1436_v14  ;;  %v1749_v14 = vpack.c.bf16 %v3507_v46, %v3506_v7 }
 0x84a   :  { %1471 = vmatmul.mubr.bf16.vlgmr.msra.gmra.mrb[44].mxu0 %v1437_v18  ;;  %1512 = vmatmul.mubr.bf16.vlgmr.msra.gmra.mrb[52].mxu1 %v1437_v18  ;;  %v5174_v18 = vld [vmem:[#allocation5 + $0x2c] ss:$16 sps:$4 sm:$0xff]  }
 0x84b   :  { %1607 = vmatpush1.bf16.msra.mxu1 %v3701_v15  ;;  %1638 = vmatprep.mubr.bf16.mxu1 %v5964_v54  ;;  %v5172_v15 = vld [vmem:[#allocation5 + $0x64] ss:$16 sps:$4 sm:$0xff]  }
 0x84c   :  { %1608 = vmatprep.subr.bf16.mxu1 %v3706_v20  ;;  %1822 = vmatprep.mubr.bf16.mxu0 %v5964_v54  ;;  %v1714_v20 = vpop.permute.xlu0 %1713 }
 0x84d   :  { %vm1728_vm14 = vcmp.eq.s32.totalorder %v5981_v48, %v1714_v20 }
 0x84f   :  { %1609 = vmatpush1.bf16.msra.mxu1 %v3704_v60  ;;  %v1717_v60 = vpop.permute.xlu1 %1716 }
 0x850   :  { %1649 = vmatprep.subr.bf16.mxu1 %v3710_v58  ;;  %vm1729_vm15 = vcmp.eq.s32.totalorder %v5981_v48, %v1717_v60 }
 0x852   :  { %3502 = vmatmul.mubr.msk.bf16.vlgmr.msra.gmra.mrb[56].mxu1 %vm132_vm0, %v3707_v13 }
 0x853   :  { %1650 = vmatpush1.bf16.msra.mxu1 %v3708_v63  ;;  %1681 = vmatprep.mubr.bf16.mxu1 %v5964_v54  ;;  %v5182_v63 = vld [vmem:[#allocation5 + $0x60] ss:$16 sps:$4 sm:$0xff]  }
 0x854   :  { %1651 = vmatprep.subr.bf16.mxu1 %v3713_v39  ;;  %v5184_v39 = vld [vmem:[#allocation5 + $0x28] ss:$16 sps:$4 sm:$0xff]  }
 0x857   :  { %1652 = vmatpush1.bf16.msra.mxu1 %v3711_v38 }
 0x85a   :  { %3503 = vmatmul.mubr.msk.bf16.vlgmr.msra.gmra.mrb[60].mxu1 %vm132_vm0, %v3707_v13 }
 0x85b   :  { %1895 = vmatprep.mubr.bf16.mxu1 %v5964_v54 }
 0x91d   :  { %v1472_v59 = vpop.f32.mrb[44].mxu0  ;;  %v1513_v52 = vpop.f32.mrb[52].mxu1 }
 0x91e   :  { %v1520_v26 = vadd.f32 %v1472_v59, %v5979_v4  ;;  %v1522_v40 = vadd.f32 %v1513_v52, %v4746_v23  ;;  %v1474_v42 = vpop.f32.mrb[45].mxu0  ;;  %v1515_v31 = vpop.f32.mrb[53].mxu1  ;;  %v5188_v59 = vld [vmem:[#allocation5 + $0x84] ss:$16 sps:$4 sm:$0xff]   ;;  %v5190_v52 = vld [vmem:[#allocation5 + $0x4c] ss:$16 sps:$4 sm:$0xff]  }
 0x91f   :  { %v1521_v37 = vadd.f32 %v1474_v42, %v5980_v0  ;;  %v1523_v56 = vadd.f32 %v1515_v31, %v4748_v45  ;;  %v1476_v9 = vpop.f32.mrb[46].mxu0  ;;  %v1517_v44 = vpop.f32.mrb[54].mxu1 }
 0x920   :  { %v3490_v43 = vmul.f32 -1.442695, %v1520_v26  ;;  %v1477_v3 = vpop.f32.mrb[47].mxu0  ;;  %v1518_v41 = vpop.f32.mrb[55].mxu1  ;;  %v3508_v26 = vsel %vm1728_vm14, 1.0, %v5982_v57 }
 0x921   :  { %v3491_v47 = vmul.f32 -1.442695, %v1521_v37  ;;  %v3492_v45 = vmul.f32 -1.442695, %v1523_v56  ;;  %v5199_v37 = vld [vmem:[#allocation5 + $0x80] ss:$16 sps:$4 sm:$0xff]   ;;  %v1723_v41 = vpop.permute.xlu1 %1722 }
 0x922   :  { %3882 = vpow2.f32 %v3490_v43  ;;  %v5201_v56 = vld [vmem:[#allocation5 + $0x48] ss:$16 sps:$4 sm:$0xff]   ;;  %v5207_v43 = vld [vmem:[#allocation5 + $0xa4] ss:$16 sps:$4 sm:$0xff]   ;;  %v5209_v3 = vld [vmem:[#allocation5 + $0x6c] ss:$16 sps:$4 sm:$0xff]   ;;  %vm1731_vm1 = vcmp.eq.s32.totalorder %v5981_v48, %v1723_v41 }
 0x923   :  { %3884 = vpow2.f32 %v3491_v47  ;;  %v5218_v47 = vld [vmem:[#allocation5 + $0xa0] ss:$16 sps:$4 sm:$0xff]  }
 0x924   :  { %3886 = vpow2.f32 %v3492_v45 }
 0x925   :  { %v1640_v50 = vpop.f32.mrb[56].mxu1  ;;  %3888 = vtanh.f32 %v1522_v40  ;;  %v3509_v40 = vsel %vm1729_vm15, 1.0, %v5982_v57 }
 0x926   :  { %v1642_v16 = vpop.f32.mrb[57].mxu1  ;;  %v1750_v9 = vpack.c.bf16 %v3509_v40, %v3508_v26 }
 0x927   :  { %v1644_v23 = vpop.f32.mrb[58].mxu1 }
 0x928   :  { %v1752_v53 = vpack.c.bf16 %v1644_v23, %v1640_v50  ;;  %v1646_v51 = vpop.f32.mrb[59].mxu1  ;;  %v5224_v50 = vld [vmem:[#allocation5 + $0xc4] ss:$16 sps:$4 sm:$0xff]   ;;  %v3511_v23 = vsel %vm1731_vm1, 1.0, %v5982_v57 }
 0x929   :  { %v1753_v49 = vpack.c.bf16 %v1646_v51, %v1642_v16  ;;  %v5236_v51 = vld [vmem:[#allocation5 + $0x88] ss:$16 sps:$4 sm:$0xff]  }
 0x92b   :  { %1790 = vmatprep.subr.bf16.mxu0 %v1753_v49  ;;  %v5240_v49 = vld [vmem:[#allocation5 + $0xe4] ss:$16 sps:$4 sm:$0xff]  }
 0x92c   :  { %v3883_v19 = vpop.eup %3882  ;;  %1791 = vmatpush1.bf16.msra.mxu0 %v1752_v53  ;;  %v5234_v53 = vld [vmem:[#allocation5 + $0xc0] ss:$16 sps:$4 sm:$0xff]  }
 0x92d   :  { %v3885_v25 = vpop.eup %3884  ;;  %v1527_v32 = vadd.f32 1.0, %v3883_v19  ;;  %v1683_v24 = vpop.f32.mrb[60].mxu1  ;;  %2129 = vmatprep.subr.bf16.mxu0 %v5142_v55  ;;  %v5248_v19 = vld [vmem:[#allocation5 + $0xe0] ss:$16 sps:$4 sm:$0xff]  }
 0x92e   :  { %v1533_v2 = vadd.f32 1.0, %v3885_v25  ;;  %v1685_v27 = vpop.f32.mrb[61].mxu1  ;;  %v3887_v58 = vpop.eup %3886  ;;  %v5250_v25 = vld [vmem:[#allocation5 + $0xa8] ss:$16 sps:$4 sm:$0xff]  }
 0x92f   :  { %3890 = vrcp.f32 %v1527_v32  ;;  %v1687_v5 = vpop.f32.mrb[62].mxu1  ;;  %3512 = vmatmul.mubr.msk.bf16.vlgmr.msra.gmra.mrb[48].mxu0 %vm310_vm3, %v1748_v28  ;;  %v3889_v13 = vpop.eup %3888  ;;  %v1540_v31 = vadd.f32 1.0, %v3887_v58 }
 0x930   :  { %3892 = vrcp.f32 %v1533_v2  ;;  %v1754_v10 = vpack.c.bf16 %v1687_v5, %v1683_v24  ;;  %v1689_v35 = vpop.f32.mrb[63].mxu1  ;;  %2130 = vmatpush1.bf16.msra.mxu0 %v5146_v21  ;;  %1832 = vmatprep.mubr.bf16.mxu0 %v5964_v54  ;;  %v5263_v2 = vld [vmem:[#allocation5 + $0xec] ss:$16 sps:$4 sm:$0xff]   ;;  %v1756_v5 = vld [vmem:[%s5928_s11] sm:$0xf] }
 0x931   :  { %v1755_v22 = vpack.c.bf16 %v1689_v35, %v1685_v27  ;;  %2131 = vmatprep.subr.bf16.mxu0 %v5149_v1  ;;  %3894 = vrcp.f32 %v1540_v31  ;;  %v5268_v27 = vld [vmem:[#allocation5 + $0xe8] ss:$16 sps:$4 sm:$0xff]  }
 0x932   :  { %v5983_v35 = vld [vmem:[#allocation12_spill] sm:$0xff] }
 0x933   :  { %1863 = vmatprep.subr.bf16.mxu1 %v1755_v22  ;;  %v5984_v22 = vsub.s32 0, %v5983_v35  ;;  %v5988_v41 = vsub.s32 3, %v5983_v35 }
 0x934   :  { %1864 = vmatpush1.bf16.msra.mxu1 %v1754_v10  ;;  %2132 = vmatpush1.bf16.msra.mxu0 %v5155_v6 }
 0x935   :  { %2133 = vmatprep.subr.bf16.mxu0 %v5159_v29  ;;  %2170 = vmatprep.subr.bf16.mxu1 %v5161_v36  ;;  %v1761_v7 = vrot.slane %v1756_v5, %v5984_v22 }
 0x937   :  { %3513 = vmatmul.mubr.msk.bf16.gmra.mrb[52].mxu0 %vm310_vm3, %v1749_v14  ;;  %3516 = vmatmul.mubr.msk.bf16.vlgmr.msra.gmra.mrb[64].mxu1 %vm310_vm3, %v1748_v28 }
 0x938   :  { %2134 = vmatpush1.bf16.msra.mxu0 %v5166_v11  ;;  %2171 = vmatpush1.bf16.msra.mxu1 %v5168_v12 }
 0x939   :  { %v3891_v38 = vpop.eup %3890  ;;  %2135 = vmatprep.subr.bf16.mxu0 %v5172_v15  ;;  %2172 = vmatprep.subr.bf16.mxu1 %v5174_v18 }
 0x93a   :  { %v3893_v4 = vpop.eup %3892  ;;  %v1544_v42 = vmul.f32 %v3891_v38, %v3889_v13  ;;  %1842 = vmatprep.mubr.bf16.mxu0 %v5964_v54  ;;  %1905 = vmatprep.mubr.bf16.mxu1 %v5964_v54 }
 0x93b   :  { %v1543_v0 = vmul.f32 %v3893_v4, %v5124_v8  ;;  %v1720_v8 = vpop.permute.xlu0 %1719  ;;  %v3895_v62 = vpop.eup %3894 }
 0x93c   :  { %2136 = vmatpush1.bf16.msra.mxu0 %v5182_v63  ;;  %2173 = vmatpush1.bf16.msra.mxu1 %v5184_v39  ;;  %vm1730_vm0 = vcmp.eq.s32.totalorder %v5981_v48, %v1720_v8 }
 0x93d   :  { %v5203_v44 = vadd.f32 %v1544_v42, %v1543_v0  ;;  %2137 = vmatprep.subr.bf16.mxu0 %v5188_v59  ;;  %2174 = vmatprep.subr.bf16.mxu1 %v5190_v52  ;;  %v3510_v16 = vsel %vm1730_vm0, 1.0, %v5982_v57  ;;  %v5986_v42 = vsub.s32 2, %v5983_v35 }
 0x93e   :  { %v1751_v45 = vpack.c.bf16 %v3511_v23, %v3510_v16  ;;  %v1773_v16 = vrot.slane %v1756_v5, %v5988_v41 }
 0x93f   :  { %3896 = vtanh.f32 %v5203_v44  ;;  %3514 = vmatmul.mubr.msk.bf16.gmra.mrb[56].mxu0 %vm310_vm3, %v1750_v9  ;;  %3517 = vmatmul.mubr.msk.bf16.gmra.mrb[68].mxu1 %vm310_vm3, %v1749_v14  ;;  %v5985_v14 = vsub.s32 1, %v5983_v35  ;;  %v5325_v31 = vrot.slane %v1756_v5, %v5986_v42 }
 0x940   :  { %2138 = vmatpush1.bf16.msra.mxu0 %v5199_v37  ;;  %2175 = vmatpush1.bf16.msra.mxu1 %v5201_v56 }
 0x941   :  { %2139 = vmatprep.subr.bf16.mxu0 %v5207_v43  ;;  %2176 = vmatprep.subr.bf16.mxu1 %v5209_v3  ;;  %v1765_v20 = vrot.slane %v1756_v5, %v5985_v14 }
 0x942   :  { %1852 = vmatprep.mubr.bf16.mxu0 %v5964_v54  ;;  %1915 = vmatprep.mubr.bf16.mxu1 %v5964_v54 }
 0x944   :  { %2140 = vmatpush1.bf16.msra.mxu0 %v5218_v47  ;;  %2177 = vmatpush1.bf16.msra.mxu1 %v5220_v33 }
 0x945   :  { %2141 = vmatprep.subr.bf16.mxu0 %v5224_v50  ;;  %2178 = vmatprep.subr.bf16.mxu1 %v5226_v17 }
 0x947   :  { %3515 = vmatmul.mubr.msk.bf16.gmra.mrb[60].mxu0 %vm310_vm3, %v1751_v45  ;;  %3518 = vmatmul.mubr.msk.bf16.gmra.mrb[72].mxu1 %vm310_vm3, %v1750_v9 }
 0x948   :  { %2142 = vmatpush1.bf16.msra.mxu0 %v5234_v53  ;;  %2179 = vmatpush1.bf16.msra.mxu1 %v5236_v51 }
 0x949   :  { %v3897_v28 = vpop.eup %3896  ;;  %2143 = vmatprep.subr.bf16.mxu0 %v5240_v49  ;;  %2180 = vmatprep.subr.bf16.mxu1 %v5242_v61 }
 0x94a   :  { %1925 = vmatprep.mubr.bf16.mxu1 %v5964_v54  ;;  %2161 = vmatprep.mubr.bf16.mxu0 %v5964_v54  ;;  %v1547_v32 = vmul.f32 %v3897_v28, %v3895_v62 }
 0x94c   :  { %2144 = vmatpush1.bf16.msra.mxu0 %v5248_v19  ;;  %2181 = vmatpush1.bf16.msra.mxu1 %v5250_v25  ;;  %v1968_v24 = vpack.c.bf16 %v1547_v32, %v1547_v32 }
 0x94d   :  { %2182 = vmatprep.subr.bf16.mxu1 %v5254_v30  ;;  %2240 = vmatprep.subr.bf16.mxu0 %v5142_v55 }
 0x94f   :  { %3519 = vmatmul.mubr.msk.bf16.gmra.mrb[76].mxu1 %vm310_vm3, %v1751_v45  ;;  %2162 = vmatmul.mubr.bf16.vlgmr.msra.gmra.mrb[64].mxu0 %v1968_v24 }
 0x950   :  { %2183 = vmatpush1.bf16.msra.mxu1 %v5260_v34  ;;  %2202 = vmatprep.mubr.bf16.mxu1 %v5964_v54 }
 0x951   :  { %2184 = vmatprep.subr.bf16.mxu1 %v5263_v2  ;;  %2241 = vmatpush1.bf16.msra.mxu0 %v5146_v21 }
 0x952   :  { %2242 = vmatprep.subr.bf16.mxu0 %v5149_v1  ;;  %2272 = vmatprep.mubr.bf16.mxu0 %v5964_v54 }
 0x954   :  { %2185 = vmatpush1.bf16.msra.mxu1 %v5268_v27 }
 0x955   :  { %2281 = vmatprep.subr.bf16.mxu1 %v5161_v36  ;;  %2243 = vmatpush1.bf16.msra.mxu0 %v5155_v6 }
 0x956   :  { %2244 = vmatprep.subr.bf16.mxu0 %v5159_v29 }
 0x957   :  { %2203 = vmatmul.mubr.bf16.vlgmr.msra.gmra.mrb[80].mxu1 %v1968_v24 }
 0x958   :  { %2282 = vmatpush1.bf16.msra.mxu1 %v5168_v12  ;;  %2313 = vmatprep.mubr.bf16.mxu1 %v5964_v54 }
 0x959   :  { %2283 = vmatprep.subr.bf16.mxu1 %v5174_v18  ;;  %2245 = vmatpush1.bf16.msra.mxu0 %v5166_v11 }
 0x95a   :  { %2246 = vmatprep.subr.bf16.mxu0 %v5172_v15 }
 0x95c   :  { %2284 = vmatpush1.bf16.msra.mxu1 %v5184_v39 }
 0x95d   :  { %2285 = vmatprep.subr.bf16.mxu1 %v5190_v52  ;;  %2247 = vmatpush1.bf16.msra.mxu0 %v5182_v63 }
 0x95e   :  { %2248 = vmatprep.subr.bf16.mxu0 %v5188_v59 }
 0x960   :  { %2286 = vmatpush1.bf16.msra.mxu1 %v5201_v56 }
 0x961   :  { %2287 = vmatprep.subr.bf16.mxu1 %v5209_v3  ;;  %2249 = vmatpush1.bf16.msra.mxu0 %v5199_v37 }
 0x962   :  { %2250 = vmatprep.subr.bf16.mxu0 %v5207_v43 }
 0x964   :  { %2288 = vmatpush1.bf16.msra.mxu1 %v5220_v33 }
 0x965   :  { %2289 = vmatprep.subr.bf16.mxu1 %v5226_v17  ;;  %2251 = vmatpush1.bf16.msra.mxu0 %v5218_v47 }
 0x966   :  { %2252 = vmatprep.subr.bf16.mxu0 %v5224_v50 }
 0x968   :  { %2290 = vmatpush1.bf16.msra.mxu1 %v5236_v51 }
 0x969   :  { %2291 = vmatprep.subr.bf16.mxu1 %v5242_v61  ;;  %2253 = vmatpush1.bf16.msra.mxu0 %v5234_v53 }
 0x96a   :  { %2254 = vmatprep.subr.bf16.mxu0 %v5240_v49 }
 0x96c   :  { %2292 = vmatpush1.bf16.msra.mxu1 %v5250_v25 }
 0x96d   :  { %2293 = vmatprep.subr.bf16.mxu1 %v5254_v30  ;;  %2255 = vmatpush1.bf16.msra.mxu0 %v5248_v19 }
 0x96e   :  { %2351 = vmatprep.subr.bf16.mxu0 %v5142_v55 }
 0x970   :  { %2294 = vmatpush1.bf16.msra.mxu1 %v5260_v34 }
 0x971   :  { %2295 = vmatprep.subr.bf16.mxu1 %v5263_v2 }
 0x974   :  { %2296 = vmatpush1.bf16.msra.mxu1 %v5268_v27 }
 0x975   :  { %2392 = vmatprep.subr.bf16.mxu1 %v5161_v36 }
 0xa02   :  { %v1824_v10 = vpop.f32.mrb[48].mxu0 }
 0xa03   :  { %v1826_v46 = vpop.f32.mrb[49].mxu0 }
 0xa04   :  { %v1828_v60 = vpop.f32.mrb[50].mxu0 }
 0xa05   :  { %v5315_v58 = vadd.f32 %v1828_v60, %v1761_v7  ;;  %v1830_v13 = vpop.f32.mrb[51].mxu0 }
 0xa06   :  { %v5317_v38 = vadd.f32 %v1830_v13, %v1765_v20 }
 0xa0a   :  { %v1834_v4 = vpop.f32.mrb[52].mxu0  ;;  %v5319_v26 = vpop.f32.mrb[64].mxu1 }
 0xa0b   :  { %v5321_v40 = vadd.f32 %v1834_v4, %v1761_v7  ;;  %v1836_v0 = vpop.f32.mrb[53].mxu0  ;;  %v5327_v9 = vpop.f32.mrb[65].mxu1 }
 0xa0c   :  { %v5329_v8 = vadd.f32 %v1836_v0, %v1765_v20  ;;  %v1838_v23 = vpop.f32.mrb[54].mxu0  ;;  %v1901_v45 = vpop.f32.mrb[66].mxu1 }
 0xa0d   :  { %v5333_v62 = vadd.f32 %v1838_v23, %v1761_v7  ;;  %v5336_v28 = vadd.f32 %v1901_v45, %v5325_v31  ;;  %v1840_v32 = vpop.f32.mrb[55].mxu0  ;;  %v1903_v24 = vpop.f32.mrb[67].mxu1 }
 0xa0e   :  { %5987 = vst [vmem:[#allocation17_spill] sm:$0xff] %v5329_v8  ;;  %v5338_v22 = vadd.f32 %v1840_v32, %v1765_v20  ;;  %v5340_v14 = vadd.f32 %v1903_v24, %v1773_v16 }
 0xa0f   :  { %5989 = vst [vmem:[#allocation13_spill] sm:$0xff] %v5333_v62 }
 0xa10   :  { %5990 = vst [vmem:[#allocation19_spill] sm:$0xff] %v5338_v22 }
 0xa12   :  { %v1844_v60 = vpop.f32.mrb[56].mxu0  ;;  %v1907_v13 = vpop.f32.mrb[68].mxu1 }
 0xa13   :  { %v5342_v4 = vadd.f32 %v1844_v60, %v1761_v7  ;;  %v5345_v35 = vadd.f32 %v1907_v13, %v5325_v31  ;;  %v1846_v5 = vpop.f32.mrb[57].mxu0  ;;  %v1909_v42 = vpop.f32.mrb[69].mxu1 }
 0xa14   :  { %v5347_v0 = vadd.f32 %v1846_v5, %v1765_v20  ;;  %v5349_v41 = vadd.f32 %v1909_v42, %v1773_v16  ;;  %v1848_v23 = vpop.f32.mrb[58].mxu0  ;;  %v1911_v45 = vpop.f32.mrb[70].mxu1 }
 0xa15   :  { %5991 = vst [vmem:[#allocation14_spill] sm:$0xff] %v5342_v4  ;;  %5992 = vst [vmem:[#allocation21_spill] sm:$0xff] %v5345_v35  ;;  %v5351_v57 = vadd.f32 %v1848_v23, %v1761_v7  ;;  %v5354_v32 = vadd.f32 %v1911_v45, %v5325_v31  ;;  %v1850_v24 = vpop.f32.mrb[59].mxu0  ;;  %v1913_v48 = vpop.f32.mrb[71].mxu1 }
 0xa16   :  { %5993 = vst [vmem:[#allocation15_spill] sm:$0xff] %v5347_v0  ;;  %5994 = vst [vmem:[#allocation23_spill] sm:$0xff] %v5349_v41  ;;  %v5356_v60 = vadd.f32 %v1850_v24, %v1765_v20  ;;  %v5358_v4 = vadd.f32 %v1913_v48, %v1773_v16 }
 0xa17   :  { %5995 = vst [vmem:[#allocation16_spill] sm:$0xff] %v5351_v57  ;;  %5996 = vst [vmem:[#allocation25_spill] sm:$0xff] %v5354_v32 }
 0xa18   :  { %5997 = vst [vmem:[#allocation18_spill] sm:$0xff] %v5356_v60  ;;  %5998 = vst [vmem:[#allocation27_spill] sm:$0xff] %v5358_v4 }
 0xa1a   :  { %v1854_v13 = vpop.f32.mrb[60].mxu0  ;;  %v1917_v22 = vpop.f32.mrb[72].mxu1 }
 0xa1b   :  { %v5360_v62 = vadd.f32 %v1854_v13, %v1761_v7  ;;  %v5363_v5 = vadd.f32 %v1917_v22, %v5325_v31  ;;  %v1856_v42 = vpop.f32.mrb[61].mxu0  ;;  %v1919_v0 = vpop.f32.mrb[73].mxu1  ;;  %v1825_v22 = vadd.f32 %v1824_v10, %v1761_v7 }
 0xa1c   :  { %v5365_v23 = vadd.f32 %v1856_v42, %v1765_v20  ;;  %v5367_v57 = vadd.f32 %v1919_v0, %v1773_v16  ;;  %v1858_v45 = vpop.f32.mrb[62].mxu0  ;;  %v1921_v32 = vpop.f32.mrb[74].mxu1 }
 0xa1d   :  { %5999 = vst [vmem:[#allocation20_spill] sm:$0xff] %v5360_v62  ;;  %6000 = vst [vmem:[#allocation22_spill] sm:$0xff] %v5363_v5  ;;  %v5369_v41 = vadd.f32 %v1858_v45, %v1761_v7  ;;  %v5372_v48 = vadd.f32 %v1921_v32, %v5325_v31  ;;  %v1860_v24 = vpop.f32.mrb[63].mxu0  ;;  %v1923_v60 = vpop.f32.mrb[75].mxu1  ;;  %v1827_v5 = vadd.f32 %v1826_v46, %v1765_v20 }
 0xa1e   :  { %6001 = vst [vmem:[#allocation24_spill] sm:$0xff] %v5365_v23  ;;  %6002 = vst [vmem:[#allocation26_spill] sm:$0xff] %v5367_v57  ;;  %v5374_v13 = vadd.f32 %v1860_v24, %v1765_v20  ;;  %v5376_v62 = vadd.f32 %v1923_v60, %v1773_v16  ;;  %v1898_v20 = vadd.f32 %v5319_v26, %v5325_v31 }
 0xa1f   :  { %6003 = vst [vmem:[#allocation28_spill] sm:$0xff] %v5369_v41  ;;  %6004 = vst [vmem:[#allocation12_spill] sm:$0xff] %v5372_v48 }
 0xa20   :  { %6005 = vst [vmem:[#allocation29_spill] sm:$0xff] %v5374_v13 }
 0xa22   :  { %v1927_v4 = vpop.f32.mrb[76].mxu1  ;;  %v2163_v42 = vpop.f32.mrb[64].mxu0 }
 0xa23   :  { %v5379_v0 = vadd.f32 %v1927_v4, %v5325_v31  ;;  %v2211_v23 = vadd.f32 %v2163_v42, %v1825_v22  ;;  %v1929_v57 = vpop.f32.mrb[77].mxu1  ;;  %v2165_v45 = vpop.f32.mrb[65].mxu0 }
 0xa24   :  { %v5381_v41 = vadd.f32 %v1929_v57, %v1773_v16  ;;  %v2212_v32 = vadd.f32 %v2165_v45, %v1827_v5  ;;  %v1931_v48 = vpop.f32.mrb[78].mxu1  ;;  %v2167_v8 = vpop.f32.mrb[66].mxu0  ;;  %v1900_v57 = vadd.f32 %v5327_v9, %v1773_v16 }
 0xa25   :  { %v3552_v35 = vmul.f32 -1.442695, %v2211_v23  ;;  %v5384_v24 = vadd.f32 %v1931_v48, %v5325_v31  ;;  %v1933_v60 = vpop.f32.mrb[79].mxu1  ;;  %v2168_v10 = vpop.f32.mrb[67].mxu0 }
 0xa26   :  { %v3553_v7 = vmul.f32 -1.442695, %v2212_v32  ;;  %v5386_v46 = vadd.f32 %v1933_v60, %v1773_v16 }
 0xa27   :  { %3898 = vpow2.f32 %v3552_v35 }
 0xa28   :  { %3900 = vpow2.f32 %v3553_v7 }
 0xa2a   :  { %v2204_v4 = vpop.f32.mrb[80].mxu1 }
 0xa2b   :  { %v2213_v5 = vadd.f32 %v2204_v4, %v1898_v20  ;;  %v2206_v22 = vpop.f32.mrb[81].mxu1 }
 0xa2c   :  { %v2214_v8 = vadd.f32 %v2206_v22, %v1900_v57  ;;  %v2208_v23 = vpop.f32.mrb[82].mxu1 }
 0xa2d   :  { %v2209_v42 = vpop.f32.mrb[83].mxu1 }
 0xa2e   :  { %v3554_v48 = vmul.f32 -1.442695, %v2214_v8 }
 0xa30   :  { %3902 = vpow2.f32 %v3554_v48 }
 0xa31   :  { %v3899_v45 = vpop.eup %3898  ;;  %3904 = vtanh.f32 %v2213_v5 }
 0xa32   :  { %v3901_v13 = vpop.eup %3900  ;;  %v2218_v10 = vadd.f32 1.0, %v3899_v45 }
 0xa33   :  { %v2224_v32 = vadd.f32 1.0, %v3901_v13 }
 0xa34   :  { %3906 = vrcp.f32 %v2218_v10 }
 0xa35   :  { %3908 = vrcp.f32 %v2224_v32 }
 0xa3a   :  { %v3903_v35 = vpop.eup %3902 }
 0xa3b   :  { %v3905_v60 = vpop.eup %3904  ;;  %v2231_v16 = vadd.f32 1.0, %v3903_v35 }
 0xa3d   :  { %3910 = vrcp.f32 %v2231_v16 }
 0xa3e   :  { %v3907_v26 = vpop.eup %3906 }
 0xa3f   :  { %v3909_v31 = vpop.eup %3908  ;;  %v2235_v9 = vmul.f32 %v3907_v26, %v3905_v60 }
 0xa40   :  { %v2234_v7 = vmul.f32 %v3909_v31, %v5203_v44 }
 0xa42   :  { %v5392_v20 = vadd.f32 %v2235_v9, %v2234_v7 }
 0xa44   :  { %3912 = vtanh.f32 %v5392_v20 }
 0xa47   :  { %v3911_v57 = vpop.eup %3910 }
 0xa4e   :  { %v3913_v4 = vpop.eup %3912 }
 0xa4f   :  { %v5395_v22 = vmul.f32 %v3913_v4, %v3911_v57 }
 0xa51   :  { %v2239_v13 = vpack.c.bf16 %v5395_v22, %v5395_v22 }
 0xa53   :  { %2273 = vmatmul.mubr.bf16.vlgmr.msra.gmra.mrb[68].mxu0 %v2239_v13  ;;  %2314 = vmatmul.mubr.bf16.vlgmr.msra.gmra.mrb[84].mxu1 %v2239_v13 }
 0xa54   :  { %2352 = vmatpush1.bf16.msra.mxu0 %v5146_v21  ;;  %2393 = vmatpush1.bf16.msra.mxu1 %v5168_v12 }
 0xa55   :  { %2353 = vmatprep.subr.bf16.mxu0 %v5149_v1  ;;  %2394 = vmatprep.subr.bf16.mxu1 %v5174_v18 }
 0xa56   :  { %2383 = vmatprep.mubr.bf16.mxu0 %v5964_v54  ;;  %2424 = vmatprep.mubr.bf16.mxu1 %v5964_v54 }
 0xa58   :  { %2354 = vmatpush1.bf16.msra.mxu0 %v5155_v6  ;;  %2395 = vmatpush1.bf16.msra.mxu1 %v5184_v39 }
 0xa59   :  { %2355 = vmatprep.subr.bf16.mxu0 %v5159_v29  ;;  %2396 = vmatprep.subr.bf16.mxu1 %v5190_v52 }
 0xa5c   :  { %2356 = vmatpush1.bf16.msra.mxu0 %v5166_v11  ;;  %2397 = vmatpush1.bf16.msra.mxu1 %v5201_v56 }
 0xa5d   :  { %2357 = vmatprep.subr.bf16.mxu0 %v5172_v15  ;;  %2398 = vmatprep.subr.bf16.mxu1 %v5209_v3 }
 0xa60   :  { %2358 = vmatpush1.bf16.msra.mxu0 %v5182_v63  ;;  %2399 = vmatpush1.bf16.msra.mxu1 %v5220_v33 }
 0xa61   :  { %2359 = vmatprep.subr.bf16.mxu0 %v5188_v59  ;;  %2400 = vmatprep.subr.bf16.mxu1 %v5226_v17 }
 0xa64   :  { %2360 = vmatpush1.bf16.msra.mxu0 %v5199_v37  ;;  %2401 = vmatpush1.bf16.msra.mxu1 %v5236_v51 }
 0xa65   :  { %2361 = vmatprep.subr.bf16.mxu0 %v5207_v43  ;;  %2402 = vmatprep.subr.bf16.mxu1 %v5242_v61 }
 0xa68   :  { %2362 = vmatpush1.bf16.msra.mxu0 %v5218_v47  ;;  %2403 = vmatpush1.bf16.msra.mxu1 %v5250_v25 }
 0xa69   :  { %2363 = vmatprep.subr.bf16.mxu0 %v5224_v50  ;;  %2404 = vmatprep.subr.bf16.mxu1 %v5254_v30 }
 0xa6c   :  { %2364 = vmatpush1.bf16.msra.mxu0 %v5234_v53  ;;  %2405 = vmatpush1.bf16.msra.mxu1 %v5260_v34 }
 0xa6d   :  { %2365 = vmatprep.subr.bf16.mxu0 %v5240_v49  ;;  %2406 = vmatprep.subr.bf16.mxu1 %v5263_v2 }
 0xa70   :  { %2366 = vmatpush1.bf16.msra.mxu0 %v5248_v19  ;;  %2407 = vmatpush1.bf16.msra.mxu1 %v5268_v27 }
 0xa71   :  { %2462 = vmatprep.subr.bf16.mxu0 %v5142_v55  ;;  %2503 = vmatprep.subr.bf16.mxu1 %v5161_v36 }
 0xb26   :  { %v2274_v44 = vpop.f32.mrb[68].mxu0  ;;  %v2315_v5 = vpop.f32.mrb[84].mxu1 }
 0xb27   :  { %v2322_v8 = vadd.f32 %v2274_v44, %v5315_v58  ;;  %v2324_v23 = vadd.f32 %v2315_v5, %v5336_v28  ;;  %v2276_v42 = vpop.f32.mrb[69].mxu0  ;;  %v2317_v48 = vpop.f32.mrb[85].mxu1 }
 0xb28   :  { %v2323_v45 = vadd.f32 %v2276_v42, %v5317_v38  ;;  %v2325_v10 = vadd.f32 %v2317_v48, %v5340_v14  ;;  %v2278_v32 = vpop.f32.mrb[70].mxu0  ;;  %v2319_v35 = vpop.f32.mrb[86].mxu1 }
 0xb29   :  { %v3555_v60 = vmul.f32 -1.442695, %v2322_v8  ;;  %v2279_v26 = vpop.f32.mrb[71].mxu0  ;;  %v2320_v31 = vpop.f32.mrb[87].mxu1 }
 0xb2a   :  { %v3556_v9 = vmul.f32 -1.442695, %v2323_v45  ;;  %v3557_v16 = vmul.f32 -1.442695, %v2325_v10 }
 0xb2b   :  { %3914 = vpow2.f32 %v3555_v60  ;;  %v6006_v60 = vld [vmem:[#allocation21_spill] sm:$0xff] }
 0xb2c   :  { %3916 = vpow2.f32 %v3556_v9 }
 0xb2d   :  { %3918 = vpow2.f32 %v3557_v16  ;;  %v6007_v16 = vld [vmem:[#allocation17_spill] sm:$0xff] }
 0xb2e   :  { %3920 = vtanh.f32 %v2324_v23 }
 0xb35   :  { %v3915_v7 = vpop.eup %3914 }
 0xb36   :  { %v3917_v57 = vpop.eup %3916  ;;  %v2329_v58 = vadd.f32 1.0, %v3915_v7 }
 0xb37   :  { %v2335_v28 = vadd.f32 1.0, %v3917_v57  ;;  %v3919_v38 = vpop.eup %3918  ;;  %v6008_v57 = vld [vmem:[#allocation23_spill] sm:$0xff] }
 0xb38   :  { %3922 = vrcp.f32 %v2329_v58  ;;  %v3921_v4 = vpop.eup %3920  ;;  %v2342_v5 = vadd.f32 1.0, %v3919_v38 }
 0xb39   :  { %3924 = vrcp.f32 %v2335_v28 }
 0xb3a   :  { %3926 = vrcp.f32 %v2342_v5 }
 0xb42   :  { %v3923_v14 = vpop.eup %3922 }
 0xb43   :  { %v3925_v13 = vpop.eup %3924  ;;  %v2346_v44 = vmul.f32 %v3923_v14, %v3921_v4 }
 0xb44   :  { %v2345_v8 = vmul.f32 %v3925_v13, %v5392_v20  ;;  %v3927_v48 = vpop.eup %3926 }
 0xb46   :  { %v5438_v42 = vadd.f32 %v2346_v44, %v2345_v8 }
 0xb48   :  { %3928 = vtanh.f32 %v5438_v42 }
 0xb52   :  { %v3929_v45 = vpop.eup %3928 }
 0xb53   :  { %v5441_v10 = vmul.f32 %v3929_v45, %v3927_v48 }
 0xb55   :  { %v2350_v23 = vpack.c.bf16 %v5441_v10, %v5441_v10 }
 0xb57   :  { %2384 = vmatmul.mubr.bf16.vlgmr.msra.gmra.mrb[72].mxu0 %v2350_v23  ;;  %2425 = vmatmul.mubr.bf16.vlgmr.msra.gmra.mrb[88].mxu1 %v2350_v23 }
 0xb58   :  { %2463 = vmatpush1.bf16.msra.mxu0 %v5146_v21  ;;  %2504 = vmatpush1.bf16.msra.mxu1 %v5168_v12 }
 0xb59   :  { %2464 = vmatprep.subr.bf16.mxu0 %v5149_v1  ;;  %2505 = vmatprep.subr.bf16.mxu1 %v5174_v18 }
 0xb5a   :  { %2494 = vmatprep.mubr.bf16.mxu0 %v5964_v54  ;;  %2535 = vmatprep.mubr.bf16.mxu1 %v5964_v54 }
 0xb5c   :  { %2465 = vmatpush1.bf16.msra.mxu0 %v5155_v6  ;;  %2506 = vmatpush1.bf16.msra.mxu1 %v5184_v39 }
 0xb5d   :  { %2466 = vmatprep.subr.bf16.mxu0 %v5159_v29  ;;  %2507 = vmatprep.subr.bf16.mxu1 %v5190_v52 }
 0xb60   :  { %2467 = vmatpush1.bf16.msra.mxu0 %v5166_v11  ;;  %2508 = vmatpush1.bf16.msra.mxu1 %v5201_v56 }
 0xb61   :  { %2468 = vmatprep.subr.bf16.mxu0 %v5172_v15  ;;  %2509 = vmatprep.subr.bf16.mxu1 %v5209_v3 }
 0xb64   :  { %2469 = vmatpush1.bf16.msra.mxu0 %v5182_v63  ;;  %2510 = vmatpush1.bf16.msra.mxu1 %v5220_v33 }
 0xb65   :  { %2470 = vmatprep.subr.bf16.mxu0 %v5188_v59  ;;  %2511 = vmatprep.subr.bf16.mxu1 %v5226_v17 }
 0xb68   :  { %2471 = vmatpush1.bf16.msra.mxu0 %v5199_v37  ;;  %2512 = vmatpush1.bf16.msra.mxu1 %v5236_v51 }
 0xb69   :  { %2472 = vmatprep.subr.bf16.mxu0 %v5207_v43  ;;  %2513 = vmatprep.subr.bf16.mxu1 %v5242_v61 }
 0xb6c   :  { %2473 = vmatpush1.bf16.msra.mxu0 %v5218_v47  ;;  %2514 = vmatpush1.bf16.msra.mxu1 %v5250_v25 }
 0xb6d   :  { %2474 = vmatprep.subr.bf16.mxu0 %v5224_v50  ;;  %2515 = vmatprep.subr.bf16.mxu1 %v5254_v30 }
 0xb70   :  { %2475 = vmatpush1.bf16.msra.mxu0 %v5234_v53  ;;  %2516 = vmatpush1.bf16.msra.mxu1 %v5260_v34 }
 0xb71   :  { %2476 = vmatprep.subr.bf16.mxu0 %v5240_v49  ;;  %2517 = vmatprep.subr.bf16.mxu1 %v5263_v2 }
 0xb74   :  { %2477 = vmatpush1.bf16.msra.mxu0 %v5248_v19  ;;  %2518 = vmatpush1.bf16.msra.mxu1 %v5268_v27 }
 0xb75   :  { %2573 = vmatprep.subr.bf16.mxu0 %v5142_v55  ;;  %2614 = vmatprep.subr.bf16.mxu1 %v5161_v36 }
 0xc2a   :  { %v2385_v20 = vpop.f32.mrb[72].mxu0  ;;  %v2426_v32 = vpop.f32.mrb[88].mxu1 }
 0xc2b   :  { %v2433_v35 = vadd.f32 %v2385_v20, %v5321_v40  ;;  %v2435_v26 = vadd.f32 %v2426_v32, %v6006_v60  ;;  %v2387_v31 = vpop.f32.mrb[73].mxu0  ;;  %v2428_v9 = vpop.f32.mrb[89].mxu1 }
 0xc2c   :  { %v2434_v7 = vadd.f32 %v2387_v31, %v6007_v16  ;;  %v2436_v58 = vadd.f32 %v2428_v9, %v6008_v57  ;;  %v2389_v28 = vpop.f32.mrb[74].mxu0  ;;  %v2430_v38 = vpop.f32.mrb[90].mxu1 }
 0xc2d   :  { %v3558_v4 = vmul.f32 -1.442695, %v2433_v35  ;;  %v2390_v14 = vpop.f32.mrb[75].mxu0  ;;  %v2431_v13 = vpop.f32.mrb[91].mxu1  ;;  %v6009_v38 = vld [vmem:[#allocation13_spill] sm:$0xff] }
 0xc2e   :  { %v3559_v44 = vmul.f32 -1.442695, %v2434_v7  ;;  %v3560_v5 = vmul.f32 -1.442695, %v2436_v58  ;;  %v6010_v14 = vld [vmem:[#allocation25_spill] sm:$0xff] }
 0xc2f   :  { %3930 = vpow2.f32 %v3558_v4 }
 0xc30   :  { %3932 = vpow2.f32 %v3559_v44 }
 0xc31   :  { %3934 = vpow2.f32 %v3560_v5 }
 0xc32   :  { %3936 = vtanh.f32 %v2435_v26 }
 0xc39   :  { %v3931_v8 = vpop.eup %3930 }
 0xc3a   :  { %v3933_v48 = vpop.eup %3932  ;;  %v2440_v40 = vadd.f32 1.0, %v3931_v8  ;;  %v6011_v8 = vld [vmem:[#allocation19_spill] sm:$0xff] }
 0xc3b   :  { %v2446_v45 = vadd.f32 1.0, %v3933_v48  ;;  %v3935_v23 = vpop.eup %3934 }
 0xc3c   :  { %3938 = vrcp.f32 %v2440_v40  ;;  %v3937_v20 = vpop.eup %3936  ;;  %v2453_v35 = vadd.f32 1.0, %v3935_v23  ;;  %v6012_v40 = vld [vmem:[#allocation27_spill] sm:$0xff] }
 0xc3d   :  { %3940 = vrcp.f32 %v2446_v45 }
 0xc3e   :  { %3942 = vrcp.f32 %v2453_v35 }
 0xc46   :  { %v3939_v32 = vpop.eup %3938 }
 0xc47   :  { %v3941_v60 = vpop.eup %3940  ;;  %v2457_v31 = vmul.f32 %v3939_v32, %v3937_v20 }
 0xc48   :  { %v2456_v9 = vmul.f32 %v3941_v60, %v5438_v42  ;;  %v3943_v7 = vpop.eup %3942 }
 0xc4a   :  { %v5484_v16 = vadd.f32 %v2457_v31, %v2456_v9 }
 0xc4c   :  { %3944 = vtanh.f32 %v5484_v16 }
 0xc56   :  { %v3945_v57 = vpop.eup %3944 }
 0xc57   :  { %v5487_v58 = vmul.f32 %v3945_v57, %v3943_v7 }
 0xc59   :  { %v2461_v26 = vpack.c.bf16 %v5487_v58, %v5487_v58 }
 0xc5b   :  { %2495 = vmatmul.mubr.bf16.vlgmr.msra.gmra.mrb[76].mxu0 %v2461_v26  ;;  %2536 = vmatmul.mubr.bf16.vlgmr.msra.gmra.mrb[92].mxu1 %v2461_v26 }
 0xc5c   :  { %2574 = vmatpush1.bf16.msra.mxu0 %v5146_v21  ;;  %2615 = vmatpush1.bf16.msra.mxu1 %v5168_v12 }
 0xc5d   :  { %2575 = vmatprep.subr.bf16.mxu0 %v5149_v1  ;;  %2616 = vmatprep.subr.bf16.mxu1 %v5174_v18 }
 0xc5e   :  { %2605 = vmatprep.mubr.bf16.mxu0 %v5964_v54  ;;  %2646 = vmatprep.mubr.bf16.mxu1 %v5964_v54 }
 0xc60   :  { %2576 = vmatpush1.bf16.msra.mxu0 %v5155_v6  ;;  %2617 = vmatpush1.bf16.msra.mxu1 %v5184_v39 }
 0xc61   :  { %2577 = vmatprep.subr.bf16.mxu0 %v5159_v29  ;;  %2618 = vmatprep.subr.bf16.mxu1 %v5190_v52 }
 0xc64   :  { %2578 = vmatpush1.bf16.msra.mxu0 %v5166_v11  ;;  %2619 = vmatpush1.bf16.msra.mxu1 %v5201_v56 }
 0xc65   :  { %2579 = vmatprep.subr.bf16.mxu0 %v5172_v15  ;;  %2620 = vmatprep.subr.bf16.mxu1 %v5209_v3 }
 0xc68   :  { %2580 = vmatpush1.bf16.msra.mxu0 %v5182_v63  ;;  %2621 = vmatpush1.bf16.msra.mxu1 %v5220_v33 }
 0xc69   :  { %2581 = vmatprep.subr.bf16.mxu0 %v5188_v59  ;;  %2622 = vmatprep.subr.bf16.mxu1 %v5226_v17 }
 0xc6c   :  { %2582 = vmatpush1.bf16.msra.mxu0 %v5199_v37  ;;  %2623 = vmatpush1.bf16.msra.mxu1 %v5236_v51 }
 0xc6d   :  { %2583 = vmatprep.subr.bf16.mxu0 %v5207_v43  ;;  %2624 = vmatprep.subr.bf16.mxu1 %v5242_v61 }
 0xc70   :  { %2584 = vmatpush1.bf16.msra.mxu0 %v5218_v47  ;;  %2625 = vmatpush1.bf16.msra.mxu1 %v5250_v25 }
 0xc71   :  { %2585 = vmatprep.subr.bf16.mxu0 %v5224_v50  ;;  %2626 = vmatprep.subr.bf16.mxu1 %v5254_v30 }
 0xc74   :  { %2586 = vmatpush1.bf16.msra.mxu0 %v5234_v53  ;;  %2627 = vmatpush1.bf16.msra.mxu1 %v5260_v34 }
 0xc75   :  { %2587 = vmatprep.subr.bf16.mxu0 %v5240_v49  ;;  %2628 = vmatprep.subr.bf16.mxu1 %v5263_v2 }
 0xc78   :  { %2588 = vmatpush1.bf16.msra.mxu0 %v5248_v19  ;;  %2629 = vmatpush1.bf16.msra.mxu1 %v5268_v27 }
 0xc79   :  { %2684 = vmatprep.subr.bf16.mxu0 %v5142_v55  ;;  %2725 = vmatprep.subr.bf16.mxu1 %v5161_v36 }
 0xd2e   :  { %v2496_v42 = vpop.f32.mrb[76].mxu0  ;;  %v2537_v28 = vpop.f32.mrb[92].mxu1 }
 0xd2f   :  { %v2544_v4 = vadd.f32 %v2496_v42, %v6009_v38  ;;  %v2546_v13 = vadd.f32 %v2537_v28, %v6010_v14  ;;  %v2498_v44 = vpop.f32.mrb[77].mxu0  ;;  %v2539_v5 = vpop.f32.mrb[93].mxu1 }
 0xd30   :  { %v2545_v48 = vadd.f32 %v2498_v44, %v6011_v8  ;;  %v2547_v45 = vadd.f32 %v2539_v5, %v6012_v40  ;;  %v2500_v23 = vpop.f32.mrb[78].mxu0  ;;  %v2541_v20 = vpop.f32.mrb[94].mxu1 }
 0xd31   :  { %v3561_v32 = vmul.f32 -1.442695, %v2544_v4  ;;  %v2501_v60 = vpop.f32.mrb[79].mxu0  ;;  %v2542_v31 = vpop.f32.mrb[95].mxu1 }
 0xd32   :  { %v3562_v55 = vmul.f32 -1.442695, %v2545_v48  ;;  %v3563_v35 = vmul.f32 -1.442695, %v2547_v45 }
 0xd33   :  { %3946 = vpow2.f32 %v3561_v32 }
 0xd34   :  { %3948 = vpow2.f32 %v3562_v55 }
 0xd35   :  { %3950 = vpow2.f32 %v3563_v35 }
 0xd36   :  { %3952 = vtanh.f32 %v2546_v13 }
 0xd3d   :  { %v3947_v9 = vpop.eup %3946 }
 0xd3e   :  { %v3949_v7 = vpop.eup %3948  ;;  %v2551_v57 = vadd.f32 1.0, %v3947_v9 }
 0xd3f   :  { %v2557_v26 = vadd.f32 1.0, %v3949_v7  ;;  %v3951_v42 = vpop.eup %3950 }
 0xd40   :  { %3954 = vrcp.f32 %v2551_v57  ;;  %v3953_v28 = vpop.eup %3952  ;;  %v2564_v4 = vadd.f32 1.0, %v3951_v42 }
 0xd41   :  { %3956 = vrcp.f32 %v2557_v26 }
 0xd42   :  { %3958 = vrcp.f32 %v2564_v4  ;;  %v5585_v4 = vld [vmem:[#allocation5] ss:$16 sps:$4 sm:$0xff]  }
 0xd4a   :  { %v3955_v38 = vpop.eup %3954 }
 0xd4b   :  { %v3957_v14 = vpop.eup %3956  ;;  %v2568_v44 = vmul.f32 %v3955_v38, %v3953_v28 }
 0xd4c   :  { %v2567_v5 = vmul.f32 %v3957_v14, %v5484_v16  ;;  %v3959_v48 = vpop.eup %3958 }
 0xd4e   :  { %v5530_v8 = vadd.f32 %v2568_v44, %v2567_v5  ;;  %v5588_v5 = vld [vmem:[#allocation5 + $0x8] ss:$16 sps:$4 sm:$0xff]  }
 0xd50   :  { %3960 = vtanh.f32 %v5530_v8 }
 0xd5a   :  { %v3961_v40 = vpop.eup %3960 }
 0xd5b   :  { %v5533_v45 = vmul.f32 %v3961_v40, %v3959_v48  ;;  %v5594_v48 = vld [vmem:[#allocation5 + $0x2c] ss:$16 sps:$4 sm:$0xff]   ;;  %v5599_v40 = vld [vmem:[#allocation5 + $0x20] ss:$16 sps:$4 sm:$0xff]  }
 0xd5d   :  { %v2572_v13 = vpack.c.bf16 %v5533_v45, %v5533_v45 }
 0xd5f   :  { %2606 = vmatmul.mubr.bf16.vlgmr.msra.gmra.mrb[80].mxu0 %v2572_v13  ;;  %2647 = vmatmul.mubr.bf16.vlgmr.msra.gmra.mrb[96].mxu1 %v2572_v13  ;;  %v5602_v13 = vld [vmem:[#allocation5 + $0x28] ss:$16 sps:$4 sm:$0xff]  }
 0xd60   :  { %2685 = vmatpush1.bf16.msra.mxu0 %v5146_v21  ;;  %2726 = vmatpush1.bf16.msra.mxu1 %v5168_v12  ;;  %v5569_v21 = vld [vmem:[#allocation5 + $0x4] ss:$16 sps:$4 sm:$0xff]   ;;  %v6014_v12 = vld [vmem:[#allocation22_spill] sm:$0xff] }
 0xd61   :  { %2686 = vmatprep.subr.bf16.mxu0 %v5149_v1  ;;  %2727 = vmatprep.subr.bf16.mxu1 %v5174_v18 }
 0xd62   :  { %2716 = vmatprep.mubr.bf16.mxu0 %v5964_v54  ;;  %2757 = vmatprep.mubr.bf16.mxu1 %v5964_v54 }
 0xd64   :  { %2687 = vmatpush1.bf16.msra.mxu0 %v5155_v6  ;;  %2728 = vmatpush1.bf16.msra.mxu1 %v5184_v39  ;;  %v6015_v39 = vld [vmem:[#allocation15_spill] sm:$0xff] }
 0xd65   :  { %2688 = vmatprep.subr.bf16.mxu0 %v5159_v29  ;;  %2729 = vmatprep.subr.bf16.mxu1 %v5190_v52  ;;  %v6013_v29 = vld [vmem:[#allocation14_spill] sm:$0xff] }
 0xd66   :  { %v6016_v52 = vld [vmem:[#allocation26_spill] sm:$0xff] }
 0xd68   :  { %2689 = vmatpush1.bf16.msra.mxu0 %v5166_v11  ;;  %2730 = vmatpush1.bf16.msra.mxu1 %v5201_v56 }
 0xd69   :  { %2690 = vmatprep.subr.bf16.mxu0 %v5172_v15  ;;  %2731 = vmatprep.subr.bf16.mxu1 %v5209_v3 }
 0xd6c   :  { %2691 = vmatpush1.bf16.msra.mxu0 %v5182_v63  ;;  %2732 = vmatpush1.bf16.msra.mxu1 %v5220_v33 }
 0xd6d   :  { %2692 = vmatprep.subr.bf16.mxu0 %v5188_v59  ;;  %2733 = vmatprep.subr.bf16.mxu1 %v5226_v17 }
 0xd70   :  { %2693 = vmatpush1.bf16.msra.mxu0 %v5199_v37  ;;  %2734 = vmatpush1.bf16.msra.mxu1 %v5236_v51 }
 0xd71   :  { %2694 = vmatprep.subr.bf16.mxu0 %v5207_v43  ;;  %2735 = vmatprep.subr.bf16.mxu1 %v5242_v61 }
 0xd74   :  { %2695 = vmatpush1.bf16.msra.mxu0 %v5218_v47  ;;  %2736 = vmatpush1.bf16.msra.mxu1 %v5250_v25 }
 0xd75   :  { %2696 = vmatprep.subr.bf16.mxu0 %v5224_v50  ;;  %2737 = vmatprep.subr.bf16.mxu1 %v5254_v30 }
 0xd78   :  { %2697 = vmatpush1.bf16.msra.mxu0 %v5234_v53  ;;  %2738 = vmatpush1.bf16.msra.mxu1 %v5260_v34 }
 0xd79   :  { %2698 = vmatprep.subr.bf16.mxu0 %v5240_v49  ;;  %2739 = vmatprep.subr.bf16.mxu1 %v5263_v2 }
 0xd7c   :  { %2699 = vmatpush1.bf16.msra.mxu0 %v5248_v19  ;;  %2740 = vmatpush1.bf16.msra.mxu1 %v5268_v27 }
 0xd7d   :  { %2795 = vmatprep.subr.bf16.mxu0 %v5569_v21  ;;  %2836 = vmatprep.subr.bf16.mxu1 %v5161_v36 }
 0xe32   :  { %v2607_v1 = vpop.f32.mrb[80].mxu0  ;;  %v2648_v6 = vpop.f32.mrb[96].mxu1 }
 0xe33   :  { %v2655_v11 = vadd.f32 %v2607_v1, %v6013_v29  ;;  %v2657_v15 = vadd.f32 %v2648_v6, %v6014_v12  ;;  %v2609_v18 = vpop.f32.mrb[81].mxu0  ;;  %v2650_v63 = vpop.f32.mrb[97].mxu1  ;;  %v5605_v1 = vld [vmem:[#allocation5 + $0x44] ss:$16 sps:$4 sm:$0xff]   ;;  %v5608_v6 = vld [vmem:[#allocation5 + $0x4c] ss:$16 sps:$4 sm:$0xff]  }
 0xe34   :  { %v2656_v59 = vadd.f32 %v2609_v18, %v6015_v39  ;;  %v2658_v37 = vadd.f32 %v2650_v63, %v6016_v52  ;;  %v2611_v56 = vpop.f32.mrb[82].mxu0  ;;  %v2652_v43 = vpop.f32.mrb[98].mxu1  ;;  %v5611_v29 = vld [vmem:[#allocation5 + $0x40] ss:$16 sps:$4 sm:$0xff]   ;;  %v5617_v12 = vld [vmem:[#allocation5 + $0x64] ss:$16 sps:$4 sm:$0xff]  }
 0xe35   :  { %v3564_v3 = vmul.f32 -1.442695, %v2655_v11  ;;  %v2612_v47 = vpop.f32.mrb[83].mxu0  ;;  %v2653_v50 = vpop.f32.mrb[99].mxu1  ;;  %v5614_v11 = vld [vmem:[#allocation5 + $0x48] ss:$16 sps:$4 sm:$0xff]  }
 0xe36   :  { %v3565_v16 = vmul.f32 -1.442695, %v2656_v59  ;;  %v3566_v36 = vmul.f32 -1.442695, %v2658_v37  ;;  %v5623_v18 = vld [vmem:[#allocation5 + $0x60] ss:$16 sps:$4 sm:$0xff]  }
 0xe37   :  { %3962 = vpow2.f32 %v3564_v3  ;;  %v5627_v63 = vld [vmem:[#allocation5 + $0x84] ss:$16 sps:$4 sm:$0xff]   ;;  %v5631_v39 = vld [vmem:[#allocation5 + $0x80] ss:$16 sps:$4 sm:$0xff]  }
 0xe38   :  { %3964 = vpow2.f32 %v3565_v16  ;;  %v5635_v59 = vld [vmem:[#allocation5 + $0xa4] ss:$16 sps:$4 sm:$0xff]   ;;  %v5639_v52 = vld [vmem:[#allocation5 + $0xa0] ss:$16 sps:$4 sm:$0xff]  }
 0xe39   :  { %3966 = vpow2.f32 %v3566_v36  ;;  %v6018_v37 = vld [vmem:[#allocation12_spill] sm:$0xff]  ;;  %v6019_v43 = vld [vmem:[#allocation18_spill] sm:$0xff] }
 0xe3a   :  { %3968 = vtanh.f32 %v2657_v15  ;;  %v5620_v15 = vld [vmem:[#allocation5 + $0x6c] ss:$16 sps:$4 sm:$0xff]  }
 0xe41   :  { %v3963_v23 = vpop.eup %3962 }
 0xe42   :  { %v3965_v20 = vpop.eup %3964  ;;  %v2662_v32 = vadd.f32 1.0, %v3963_v23 }
 0xe43   :  { %v2668_v60 = vadd.f32 1.0, %v3965_v20  ;;  %v3967_v31 = vpop.eup %3966 }
 0xe44   :  { %3970 = vrcp.f32 %v2662_v32  ;;  %v3969_v55 = vpop.eup %3968  ;;  %v2675_v57 = vadd.f32 1.0, %v3967_v31 }
 0xe45   :  { %3972 = vrcp.f32 %v2668_v60 }
 0xe46   :  { %3974 = vrcp.f32 %v2675_v57 }
 0xe4e   :  { %v3971_v35 = vpop.eup %3970 }
 0xe4f   :  { %v3973_v9 = vpop.eup %3972  ;;  %v2679_v7 = vmul.f32 %v3971_v35, %v3969_v55 }
 0xe50   :  { %v2678_v26 = vmul.f32 %v3973_v9, %v5530_v8  ;;  %v3975_v28 = vpop.eup %3974  ;;  %v5591_v8 = vld [vmem:[#allocation5 + $0x24] ss:$16 sps:$4 sm:$0xff]  }
 0xe52   :  { %v5578_v42 = vadd.f32 %v2679_v7, %v2678_v26 }
 0xe54   :  { %3976 = vtanh.f32 %v5578_v42 }
 0xe5e   :  { %v3977_v38 = vpop.eup %3976 }
 0xe5f   :  { %v5581_v14 = vmul.f32 %v3977_v38, %v3975_v28 }
 0xe61   :  { %v2683_v44 = vpack.c.bf16 %v5581_v14, %v5581_v14 }
 0xe63   :  { %2717 = vmatmul.mubr.bf16.vlgmr.msra.gmra.mrb[84].mxu0 %v2683_v44  ;;  %2758 = vmatmul.mubr.bf16.vlgmr.msra.gmra.mrb[100].mxu1 %v2683_v44 }
 0xe64   :  { %2796 = vmatpush1.bf16.msra.mxu0 %v5585_v4  ;;  %2837 = vmatpush1.bf16.msra.mxu1 %v5588_v5 }
 0xe65   :  { %2797 = vmatprep.subr.bf16.mxu0 %v5591_v8  ;;  %2838 = vmatprep.subr.bf16.mxu1 %v5594_v48 }
 0xe66   :  { %2827 = vmatprep.mubr.bf16.mxu0 %v5964_v54  ;;  %2868 = vmatprep.mubr.bf16.mxu1 %v5964_v54 }
 0xe68   :  { %2798 = vmatpush1.bf16.msra.mxu0 %v5599_v40  ;;  %2839 = vmatpush1.bf16.msra.mxu1 %v5602_v13 }
 0xe69   :  { %2799 = vmatprep.subr.bf16.mxu0 %v5605_v1  ;;  %2840 = vmatprep.subr.bf16.mxu1 %v5608_v6 }
 0xe6c   :  { %2800 = vmatpush1.bf16.msra.mxu0 %v5611_v29  ;;  %2841 = vmatpush1.bf16.msra.mxu1 %v5614_v11 }
 0xe6d   :  { %2801 = vmatprep.subr.bf16.mxu0 %v5617_v12  ;;  %2842 = vmatprep.subr.bf16.mxu1 %v5620_v15 }
 0xe70   :  { %2802 = vmatpush1.bf16.msra.mxu0 %v5623_v18  ;;  %2843 = vmatpush1.bf16.msra.mxu1 %v5220_v33  ;;  %v5643_v33 = vld [vmem:[#allocation5 + $0xc4] ss:$16 sps:$4 sm:$0xff]  }
 0xe71   :  { %2803 = vmatprep.subr.bf16.mxu0 %v5627_v63  ;;  %2844 = vmatprep.subr.bf16.mxu1 %v5226_v17  ;;  %v4109_v17 = vld [vmem:[#allocation5 + $0xc] ss:$16 sps:$4 sm:$0xff]  }
 0xe74   :  { %2804 = vmatpush1.bf16.msra.mxu0 %v5631_v39  ;;  %2845 = vmatpush1.bf16.msra.mxu1 %v5236_v51 }
 0xe75   :  { %2805 = vmatprep.subr.bf16.mxu0 %v5635_v59  ;;  %2846 = vmatprep.subr.bf16.mxu1 %v5242_v61 }
 0xe78   :  { %2806 = vmatpush1.bf16.msra.mxu0 %v5639_v52  ;;  %2847 = vmatpush1.bf16.msra.mxu1 %v5250_v25  ;;  %v6017_v25 = vld [vmem:[#allocation16_spill] sm:$0xff] }
 0xe79   :  { %2807 = vmatprep.subr.bf16.mxu0 %v5643_v33  ;;  %2848 = vmatprep.subr.bf16.mxu1 %v5254_v30 }
 0xe7c   :  { %2808 = vmatpush1.bf16.msra.mxu0 %v5234_v53  ;;  %2849 = vmatpush1.bf16.msra.mxu1 %v5260_v34 }
 0xe7d   :  { %2809 = vmatprep.subr.bf16.mxu0 %v5240_v49  ;;  %2850 = vmatprep.subr.bf16.mxu1 %v5263_v2 }
 0xe80   :  { %2810 = vmatpush1.bf16.msra.mxu0 %v5248_v19  ;;  %2851 = vmatpush1.bf16.msra.mxu1 %v5268_v27 }
 0xe81   :  { %2906 = vmatprep.subr.bf16.mxu0 %v5569_v21  ;;  %2947 = vmatprep.subr.bf16.mxu1 %v4109_v17  ;;  %v6021_v17 = vld [vmem:[#allocation24_spill] sm:$0xff] }
 0xf36   :  { %v2718_v51 = vpop.f32.mrb[84].mxu0  ;;  %v2759_v61 = vpop.f32.mrb[100].mxu1 }
 0xf37   :  { %v2766_v30 = vadd.f32 %v2718_v51, %v6017_v25  ;;  %v2768_v53 = vadd.f32 %v2759_v61, %v6018_v37  ;;  %v2720_v56 = vpop.f32.mrb[85].mxu0  ;;  %v2761_v34 = vpop.f32.mrb[101].mxu1 }
 0xf38   :  { %v2767_v49 = vadd.f32 %v2720_v56, %v6019_v43  ;;  %v2769_v2 = vadd.f32 %v2761_v34, %v5376_v62  ;;  %v2722_v3 = vpop.f32.mrb[86].mxu0  ;;  %v2763_v19 = vpop.f32.mrb[102].mxu1 }
 0xf39   :  { %v3567_v47 = vmul.f32 -1.442695, %v2766_v30  ;;  %v2723_v27 = vpop.f32.mrb[87].mxu0  ;;  %v2764_v50 = vpop.f32.mrb[103].mxu1 }
 0xf3a   :  { %v3568_v21 = vmul.f32 -1.442695, %v2767_v49  ;;  %v3569_v16 = vmul.f32 -1.442695, %v2769_v2 }
 0xf3b   :  { %3978 = vpow2.f32 %v3567_v47 }
 0xf3c   :  { %3980 = vpow2.f32 %v3568_v21 }
 0xf3d   :  { %3982 = vpow2.f32 %v3569_v16 }
 0xf3e   :  { %3984 = vtanh.f32 %v2768_v53 }
 0xf45   :  { %v3979_v36 = vpop.eup %3978 }
 0xf46   :  { %v3981_v23 = vpop.eup %3980  ;;  %v2773_v20 = vadd.f32 1.0, %v3979_v36 }
 0xf47   :  { %v2779_v32 = vadd.f32 1.0, %v3981_v23  ;;  %v3983_v60 = vpop.eup %3982 }
 0xf48   :  { %3986 = vrcp.f32 %v2773_v20  ;;  %v3985_v31 = vpop.eup %3984  ;;  %v2786_v9 = vadd.f32 1.0, %v3983_v60 }
 0xf49   :  { %3988 = vrcp.f32 %v2779_v32 }
 0xf4a   :  { %3990 = vrcp.f32 %v2786_v9  ;;  %v3768_v9 = vld [vmem:[%s5929_s12 + $0x30] sm:$0xff]  }
 0xf52   :  { %v3987_v62 = vpop.eup %3986 }
 0xf53   :  { %v3989_v55 = vpop.eup %3988  ;;  %v2790_v35 = vmul.f32 %v3987_v62, %v3985_v31  ;;  %v3763_v31 = vld [vmem:[%s5929_s12 + $0x8] sm:$0xff]   ;;  %v3016_v62 = vpack.c.bf16 %v5441_v10, %v5395_v22  ;;  %v3766_v22 = vld [vmem:[%s5929_s12 + $0x20] sm:$0xff]  }
 0xf54   :  { %v2789_v7 = vmul.f32 %v3989_v55, %v5578_v42  ;;  %v3991_v26 = vpop.eup %3990  ;;  %v4110_v42 = vld [vmem:[#allocation5 + $0x68] ss:$16 sps:$4 sm:$0xff]   ;;  %v3764_v55 = vld [vmem:[%s5929_s12 + $0x10] sm:$0xff]  }
 0xf55   :  { %v3767_v10 = vld [vmem:[%s5929_s12 + $0x28] sm:$0xff]  }
 0xf56   :  { %v5659_v57 = vadd.f32 %v2790_v35, %v2789_v7  ;;  %v3765_v35 = vld [vmem:[%s5929_s12 + $0x18] sm:$0xff]  }
 0xf57   :  { %v3769_v7 = vld [vmem:[%s5929_s12 + $0x38] sm:$0xff]  }
 0xf58   :  { %3992 = vtanh.f32 %v5659_v57 }
 0xf62   :  { %v3993_v28 = vpop.eup %3992 }
 0xf63   :  { %v5662_v38 = vmul.f32 %v3993_v28, %v3991_v26 }
 0xf65   :  { %v2794_v44 = vpack.c.bf16 %v5662_v38, %v5662_v38  ;;  %v3018_v26 = vpack.c.bf16 %v5662_v38, %v5581_v14 }
 0xf67   :  { %2828 = vmatmul.mubr.bf16.vlgmr.msra.gmra.mrb[88].mxu0 %v2794_v44  ;;  %2869 = vmatmul.mubr.bf16.vlgmr.msra.gmra.mrb[104].mxu1 %v2794_v44 }
 0xf68   :  { %2907 = vmatpush1.bf16.msra.mxu0 %v5585_v4  ;;  %2948 = vmatpush1.bf16.msra.mxu1 %v5588_v5  ;;  %v4112_v4 = vld [vmem:[#allocation5 + $0x88] ss:$16 sps:$4 sm:$0xff]   ;;  %v4113_v5 = vld [vmem:[#allocation5 + $0xac] ss:$16 sps:$4 sm:$0xff]  }
 0xf69   :  { %2908 = vmatprep.subr.bf16.mxu0 %v5591_v8  ;;  %2949 = vmatprep.subr.bf16.mxu1 %v5594_v48  ;;  %v4114_v8 = vld [vmem:[#allocation5 + $0xa8] ss:$16 sps:$4 sm:$0xff]   ;;  %v4115_v48 = vld [vmem:[#allocation5 + $0xcc] ss:$16 sps:$4 sm:$0xff]  }
 0xf6a   :  { %2938 = vmatprep.mubr.bf16.mxu0 %v5964_v54  ;;  %2979 = vmatprep.mubr.bf16.mxu1 %v5964_v54  ;;  %v4111_v54 = vld [vmem:[#allocation5 + $0x8c] ss:$16 sps:$4 sm:$0xff]  }
 0xf6c   :  { %2909 = vmatpush1.bf16.msra.mxu0 %v5599_v40  ;;  %2950 = vmatpush1.bf16.msra.mxu1 %v5602_v13  ;;  %v4116_v40 = vld [vmem:[#allocation5 + $0xc0] ss:$16 sps:$4 sm:$0xff]   ;;  %v4117_v13 = vld [vmem:[#allocation5 + $0xc8] ss:$16 sps:$4 sm:$0xff]  }
 0xf6d   :  { %2910 = vmatprep.subr.bf16.mxu0 %v5605_v1  ;;  %2951 = vmatprep.subr.bf16.mxu1 %v5608_v6  ;;  %v4118_v1 = vld [vmem:[#allocation5 + $0xe4] ss:$16 sps:$4 sm:$0xff]   ;;  %v4119_v6 = vld [vmem:[#allocation5 + $0xec] ss:$16 sps:$4 sm:$0xff]  }
 0xf70   :  { %2911 = vmatpush1.bf16.msra.mxu0 %v5611_v29  ;;  %2952 = vmatpush1.bf16.msra.mxu1 %v5614_v11  ;;  %v4120_v29 = vld [vmem:[#allocation5 + $0xe0] ss:$16 sps:$4 sm:$0xff]   ;;  %v4121_v11 = vld [vmem:[#allocation5 + $0xe8] ss:$16 sps:$4 sm:$0xff]  }
 0xf71   :  { %2912 = vmatprep.subr.bf16.mxu0 %v5617_v12  ;;  %2953 = vmatprep.subr.bf16.mxu1 %v5620_v15  ;;  %v3762_v12 = vld [vmem:[%s5929_s12] sm:$0xff]  }
 0xf74   :  { %2913 = vmatpush1.bf16.msra.mxu0 %v5623_v18  ;;  %2954 = vmatpush1.bf16.msra.mxu1 %v4110_v42  ;;  %v6022_v42 = vld [vmem:[#allocation28_spill] sm:$0xff] }
 0xf75   :  { %2914 = vmatprep.subr.bf16.mxu0 %v5627_v63  ;;  %2955 = vmatprep.subr.bf16.mxu1 %v4111_v54  ;;  %v6020_v63 = vld [vmem:[#allocation20_spill] sm:$0xff] }
 0xf78   :  { %2915 = vmatpush1.bf16.msra.mxu0 %v5631_v39  ;;  %2956 = vmatpush1.bf16.msra.mxu1 %v4112_v4 }
 0xf79   :  { %2916 = vmatprep.subr.bf16.mxu0 %v5635_v59  ;;  %2957 = vmatprep.subr.bf16.mxu1 %v4113_v5 }
 0xf7c   :  { %2917 = vmatpush1.bf16.msra.mxu0 %v5639_v52  ;;  %2958 = vmatpush1.bf16.msra.mxu1 %v4114_v8 }
 0xf7d   :  { %2918 = vmatprep.subr.bf16.mxu0 %v5643_v33  ;;  %2959 = vmatprep.subr.bf16.mxu1 %v4115_v48  ;;  %v6023_v48 = vld [vmem:[#allocation29_spill] sm:$0xff] }
 0xf80   :  { %2919 = vmatpush1.bf16.msra.mxu0 %v4116_v40  ;;  %2960 = vmatpush1.bf16.msra.mxu1 %v4117_v13 }
 0xf81   :  { %2920 = vmatprep.subr.bf16.mxu0 %v4118_v1  ;;  %2961 = vmatprep.subr.bf16.mxu1 %v4119_v6 }
 0xf84   :  { %2921 = vmatpush1.bf16.msra.mxu0 %v4120_v29  ;;  %2962 = vmatpush1.bf16.msra.mxu1 %v4121_v11 }
 0xf85   :  { %3605 = vmatprep.subr.bf16.mxu0 %v3762_v12 }
0x103a   :  { %v2829_v15 = vpop.f32.mrb[88].mxu0  ;;  %v2870_v18 = vpop.f32.mrb[104].mxu1 }
0x103b   :  { %v2877_v39 = vadd.f32 %v2829_v15, %v6020_v63  ;;  %v2879_v59 = vadd.f32 %v2870_v18, %v5379_v0  ;;  %v2831_v52 = vpop.f32.mrb[89].mxu0  ;;  %v2872_v33 = vpop.f32.mrb[105].mxu1 }
0x103c   :  { %v2878_v51 = vadd.f32 %v2831_v52, %v6021_v17  ;;  %v2880_v61 = vadd.f32 %v2872_v33, %v5381_v41  ;;  %v2833_v25 = vpop.f32.mrb[90].mxu0  ;;  %v2874_v30 = vpop.f32.mrb[106].mxu1  ;;  %v3576_v17 = vld [vmem:[%s5930_s13] ss:$0 sm:$0xff] }
0x103d   :  { %v3570_v37 = vmul.f32 -1.442695, %v2877_v39  ;;  %v2834_v53 = vpop.f32.mrb[91].mxu0  ;;  %v2875_v56 = vpop.f32.mrb[107].mxu1 }
0x103e   :  { %v3571_v34 = vmul.f32 -1.442695, %v2878_v51  ;;  %v3572_v43 = vmul.f32 -1.442695, %v2880_v61 }
0x103f   :  { %3994 = vpow2.f32 %v3570_v37 }
0x1040   :  { %3996 = vpow2.f32 %v3571_v34 }
0x1041   :  { %3998 = vpow2.f32 %v3572_v43 }
0x1042   :  { %4000 = vtanh.f32 %v2879_v59 }
0x1049   :  { %v3995_v49 = vpop.eup %3994 }
0x104a   :  { %v3997_v2 = vpop.eup %3996  ;;  %v2884_v3 = vadd.f32 1.0, %v3995_v49 }
0x104b   :  { %v2890_v0 = vadd.f32 1.0, %v3997_v2  ;;  %v3999_v19 = vpop.eup %3998 }
0x104c   :  { %4002 = vrcp.f32 %v2884_v3  ;;  %v4001_v47 = vpop.eup %4000  ;;  %v2897_v21 = vadd.f32 1.0, %v3999_v19 }
0x104d   :  { %4004 = vrcp.f32 %v2890_v0 }
0x104e   :  { %4006 = vrcp.f32 %v2897_v21 }
0x1056   :  { %v4003_v41 = vpop.eup %4002 }
0x1057   :  { %v4005_v27 = vpop.eup %4004  ;;  %v2901_v50 = vmul.f32 %v4003_v41, %v4001_v47 }
0x1058   :  { %v2900_v16 = vmul.f32 %v4005_v27, %v5659_v57  ;;  %v4007_v23 = vpop.eup %4006  ;;  %v3017_v57 = vpack.c.bf16 %v5533_v45, %v5487_v58 }
0x105a   :  { %v5694_v36 = vadd.f32 %v2901_v50, %v2900_v16 }
0x105c   :  { %4008 = vtanh.f32 %v5694_v36 }
0x1066   :  { %v4009_v20 = vpop.eup %4008 }
0x1067   :  { %v5697_v32 = vmul.f32 %v4009_v20, %v4007_v23 }
0x1069   :  { %v2905_v60 = vpack.c.bf16 %v5697_v32, %v5697_v32 }
0x106b   :  { %2939 = vmatmul.mubr.bf16.vlgmr.msra.gmra.mrb[92].mxu0 %v2905_v60  ;;  %2980 = vmatmul.mubr.bf16.vlgmr.msra.gmra.mrb[108].mxu1 %v2905_v60 }
0x106c   :  { %3606 = vmatpush3.bf16.msra.mxu0 %v3762_v12  ;;  %3621 = vmatprep.mubr.bf16.mxu0 %v3016_v62 }
0x106d   :  { %3607 = vmatprep.subr.bf16.mxu0 %v3763_v31 }
0x1070   :  { %3608 = vmatpush3.bf16.msra.mxu0 %v3763_v31 }
0x1071   :  { %3609 = vmatprep.subr.bf16.mxu0 %v3764_v55 }
0x1074   :  { %3610 = vmatpush3.bf16.msra.mxu0 %v3764_v55 }
0x1075   :  { %3611 = vmatprep.subr.bf16.mxu0 %v3765_v35 }
0x1078   :  { %3612 = vmatpush3.bf16.msra.mxu0 %v3765_v35 }
0x1079   :  { %3613 = vmatprep.subr.bf16.mxu0 %v3766_v22 }
0x107c   :  { %3614 = vmatpush3.bf16.msra.mxu0 %v3766_v22  ;;  %v5769_v22 = vpop.permute.xlu0 %3264 }
0x107d   :  { %3615 = vmatprep.subr.bf16.mxu0 %v3767_v10 }
0x1080   :  { %3616 = vmatpush3.bf16.msra.mxu0 %v3767_v10  ;;  %v3257_v10 = vld [vmem:[%s5919_s2 + $0x28] sm:$0xff] }
0x1081   :  { %3617 = vmatprep.subr.bf16.mxu0 %v3768_v9 }
0x1084   :  { %3618 = vmatpush3.bf16.msra.mxu0 %v3768_v9  ;;  %v5774_v9 = vpop.permute.xlu1 %3261 }
0x1085   :  { %3619 = vmatprep.subr.bf16.mxu0 %v3769_v7 }
0x1088   :  { %3620 = vmatpush3.bf16.msra.mxu0 %v3769_v7  ;;  %v3259_v7 = vld [vmem:[%s5919_s2 + $0x38] sm:$0xff] }
0x108b   :  { %3622 = vmatmul.mubr.bf16.vlgmr.msra.gmra.mrb[96].mxu0 %v3017_v57  ;;  %v5779_v57 = vpop.permute.xlu0 %3273 }
0x108c   :  { %3625 = vmatprep.mubr.bf16.mxu0 %v3018_v26  ;;  %v3258_v26 = vld [vmem:[%s5919_s2 + $0x30] sm:$0xff] }
0x113e   :  { %v2940_v28 = vpop.f32.mrb[92].mxu0  ;;  %v2981_v44 = vpop.f32.mrb[108].mxu1 }
0x113f   :  { %v2988_v54 = vadd.f32 %v2940_v28, %v6022_v42  ;;  %v2990_v4 = vadd.f32 %v2981_v44, %v5384_v24  ;;  %v2942_v5 = vpop.f32.mrb[93].mxu0  ;;  %v2983_v8 = vpop.f32.mrb[109].mxu1 }
0x1140   :  { %v2989_v40 = vadd.f32 %v2942_v5, %v6023_v48  ;;  %v2991_v13 = vadd.f32 %v2983_v8, %v5386_v46  ;;  %v2944_v1 = vpop.f32.mrb[94].mxu0  ;;  %v2985_v6 = vpop.f32.mrb[110].mxu1 }
0x1141   :  { %v3573_v58 = vmul.f32 -1.442695, %v2988_v54  ;;  %v2945_v45 = vpop.f32.mrb[95].mxu0  ;;  %v2986_v29 = vpop.f32.mrb[111].mxu1 }
0x1142   :  { %v3574_v14 = vmul.f32 -1.442695, %v2989_v40  ;;  %v3575_v38 = vmul.f32 -1.442695, %v2991_v13  ;;  %v5784_v28 = vpop.permute.xlu1 %3267 }
0x1143   :  { %4010 = vpow2.f32 %v3573_v58 }
0x1144   :  { %4012 = vpow2.f32 %v3574_v14 }
0x1145   :  { %4014 = vpow2.f32 %v3575_v38 }
0x1146   :  { %4016 = vtanh.f32 %v2990_v4  ;;  %v5788_v42 = vpop.permute.xlu1 %3270 }
0x114d   :  { %v4011_v11 = vpop.eup %4010 }
0x114e   :  { %v4013_v12 = vpop.eup %4012  ;;  %v2995_v15 = vadd.f32 1.0, %v4011_v11 }
0x114f   :  { %v3001_v24 = vadd.f32 1.0, %v4013_v12  ;;  %v4015_v18 = vpop.eup %4014 }
0x1150   :  { %4018 = vrcp.f32 %v2995_v15  ;;  %v4017_v63 = vpop.eup %4016  ;;  %v3008_v52 = vadd.f32 1.0, %v4015_v18 }
0x1151   :  { %4020 = vrcp.f32 %v3001_v24 }
0x1152   :  { %4022 = vrcp.f32 %v3008_v52 }
0x115a   :  { %v4019_v46 = vpop.eup %4018 }
0x115b   :  { %v4021_v39 = vpop.eup %4020  ;;  %v3012_v59 = vmul.f32 %v4019_v46, %v4017_v63 }
0x115c   :  { %v3011_v33 = vmul.f32 %v4021_v39, %v5694_v36  ;;  %v4023_v0 = vpop.eup %4022 }
0x115e   :  { %v3623_v51 = vpop.f32.mrb[96].mxu0  ;;  %v3013_v61 = vadd.f32 %v3012_v59, %v3011_v33 }
0x115f   :  { %v5736_v25 = vadd.f32 %v3623_v51, %v3576_v17  ;;  %v3125_v30 = vpop.f32.mrb[97].mxu0 }
0x1160   :  { %v3624_v37 = vpop.f32.mrb[98].mxu0  ;;  %4024 = vtanh.f32 %v3013_v61  ;;  %v5738_v53 = vadd.f32 %v3576_v17, %v3125_v30 }
0x1161   :  { %v3128_v56 = vpop.f32.mrb[99].mxu0  ;;  %v3162_v34 = vsel %vm310_vm3, %v5736_v25, -inf  ;;  %v5746_v2 = vadd.f32 %v3624_v37, %v3576_v17 }
0x1162   :  { %v5742_v43 = vadd.f32 %v3576_v17, %v3128_v56  ;;  %3163 = vmax.xlane.f32.xlu0 %v3162_v34  ;;  %v3156_v3 = vsel %vm310_vm3, %v5738_v53, -inf }
0x1163   :  { %v3165_v19 = vsel %vm310_vm3, %v5746_v2, -inf }
0x1164   :  { %v3159_v49 = vsel %vm310_vm3, %v5742_v43, -inf }
0x1165   :  { %3160 = vmax.xlane.f32.xlu1 %v3159_v49 }
0x1166   :  { %3157 = vmax.xlane.f32.xlu0 %v3156_v3  ;;  %v6024_v3 = vld [vmem:[#allocation11_spill] sm:$0xff] }
0x1167   :  { %vm3284_vm2 = vcmp.eq.s32.totalorder %v6024_v3, %v5774_v9  ;;  %vm3285_vm4 = vcmp.eq.s32.totalorder %v6024_v3, %v5769_v22  ;;  %vm3286_vm5 = vcmp.eq.s32.totalorder %v6024_v3, %v5784_v28  ;;  %vm3287_vm6 = vcmp.eq.s32.totalorder %v6024_v3, %v5788_v42 }
0x1168   :  { %vm3288_vm7 = vcmp.eq.s32.totalorder %v6024_v3, %v5779_v57 }
0x116a   :  { %v4025_v47 = vpop.eup %4024  ;;  %3166 = vmax.xlane.f32.xlu0 %v3165_v19 }
0x116b   :  { %v3015_v41 = vmul.f32 %v4025_v47, %v4023_v0 }
0x116d   :  { %v3019_v27 = vpack.c.bf16 %v3015_v41, %v5697_v32 }
0x116f   :  { %3626 = vmatmul.mubr.bf16.gmra.mrb[100].mxu0 %v3019_v27  ;;  %v6025_v27 = vmov 0.0  }
0x1170   :  { %v3588_v9 = vsel %vm3287_vm6, 1.0, %v6025_v27  ;;  %v3589_v28 = vsel %vm3288_vm7, 1.0, %v6025_v27 }
0x11ef   :  { %v5786_v44 = vpop.xlane.xlu0 %3163 }
0x11f0   :  { %v3182_v48 = vsub.f32 %v5736_v25, %v5786_v44 }
0x11f2   :  { %v5792_v4 = vpop.xlane.xlu1 %3160  ;;  %v3192_v6 = vmul.f32 1.442695, %v3182_v48 }
0x11f3   :  { %v5790_v54 = vpop.xlane.xlu0 %3157  ;;  %v3181_v8 = vsub.f32 %v5742_v43, %v5792_v4 }
0x11f4   :  { %v3180_v5 = vsub.f32 %v5738_v53, %v5790_v54 }
0x11f5   :  { %v3190_v1 = vmul.f32 1.442695, %v3181_v8 }
0x11f6   :  { %v3188_v40 = vmul.f32 1.442695, %v3180_v5 }
0x11f7   :  { %v5800_v13 = vpop.xlane.xlu0 %3166 }
0x11f8   :  { %4026 = vpow2.f32 %v3188_v40  ;;  %v3183_v58 = vsub.f32 %v5746_v2, %v5800_v13 }
0x11f9   :  { %4028 = vpow2.f32 %v3190_v1 }
0x11fa   :  { %4030 = vpow2.f32 %v3192_v6  ;;  %v3194_v45 = vmul.f32 1.442695, %v3183_v58 }
0x11fc   :  { %4032 = vpow2.f32 %v3194_v45 }
0x1202   :  { %v4027_v29 = vpop.eup %4026 }
0x1203   :  { %v4029_v14 = vpop.eup %4028  ;;  %v3204_v38 = vsel %vm310_vm3, %v4027_v29, 0.0 }
0x1204   :  { %v4031_v11 = vpop.eup %4030  ;;  %v3207_v12 = vsel %vm310_vm3, %v4029_v14, 0.0 }
0x1205   :  { %v3210_v15 = vsel %vm310_vm3, %v4031_v11, 0.0 }
0x1206   :  { %v4033_v24 = vpop.eup %4032 }
0x1207   :  { %v3213_v18 = vsel %vm310_vm3, %v4033_v24, 0.0 }
0x1242   :  { %v3627_v50 = vpop.f32.mrb[100].mxu0 }
0x1243   :  { %v5753_v21 = vadd.f32 %v3627_v50, %v3576_v17  ;;  %v3141_v16 = vpop.f32.mrb[101].mxu0  ;;  %v3585_v50 = vsel %vm3284_vm2, 1.0, %v6025_v27 }
0x1244   :  { %v3628_v36 = vpop.f32.mrb[102].mxu0  ;;  %v5755_v23 = vadd.f32 %v3576_v17, %v3141_v16 }
0x1245   :  { %v5757_v20 = vadd.f32 %v3628_v36, %v3576_v17  ;;  %v3144_v60 = vpop.f32.mrb[103].mxu0  ;;  %v3174_v31 = vsel %vm310_vm3, %v5753_v21, -inf }
0x1246   :  { %3175 = vmax.xlane.f32.xlu1 %v3174_v31  ;;  %v5761_v62 = vadd.f32 %v3576_v17, %v3144_v60  ;;  %v3168_v55 = vsel %vm310_vm3, %v5755_v23, -inf  ;;  %v3308_v60 = vmul.f32 %v3585_v50, %v5738_v53  ;;  %v3586_v31 = vsel %vm3285_vm4, 1.0, %v6025_v27  ;;  %v3342_v50 = vld [vmem:[%s5920_s3 + $0x10] sm:$0xff] }
0x1247   :  { %v3177_v32 = vsel %vm310_vm3, %v5757_v20, -inf }
0x1248   :  { %3178 = vmax.xlane.f32.xlu0 %v3177_v32  ;;  %v3171_v35 = vsel %vm310_vm3, %v5761_v62, -inf  ;;  %v3316_v53 = vsel %vm310_vm3, %v3308_v60, 0.0 }
0x124a   :  { %3169 = vmax.xlane.f32.xlu1 %v3168_v55  ;;  %v3309_v55 = vmul.f32 %v3586_v31, %v5742_v43 }
0x124c   :  { %3172 = vmax.xlane.f32.xlu0 %v3171_v35  ;;  %v3587_v35 = vsel %vm3286_vm5, 1.0, %v6025_v27  ;;  %v3319_v43 = vsel %vm310_vm3, %v3309_v55, 0.0  ;;  %v3343_v55 = vld [vmem:[%s5920_s3 + $0x18] sm:$0xff] }
0x125b   :  { %3276 = vperm.xlu1 %3639, %v3257_v10   ;;  %v3310_v10 = vmul.f32 %v3587_v35, %v5736_v25  ;;  %v3312_v25 = vmul.f32 %v3589_v28, %v5755_v23 }
0x125d   :  { %v3322_v42 = vsel %vm310_vm3, %v3310_v10, 0.0  ;;  %v3328_v40 = vsel %vm310_vm3, %v3312_v25, 0.0 }
0x125f   :  { %3282 = vperm.xlu1 %3639, %v3259_v7  }
0x1262   :  { %3279 = vperm.xlu0 %3638, %v3258_v26   ;;  %v3311_v26 = vmul.f32 %v3588_v9, %v5746_v2 }
0x1264   :  { %v3325_v8 = vsel %vm310_vm3, %v3311_v26, 0.0 }
0x1281   :  { %3205 = vadd.xlane.f32.xlu0 %v3204_v38 }
0x1283   :  { %3208 = vadd.xlane.f32.xlu1 %v3207_v12 }
0x1285   :  { %3211 = vadd.xlane.f32.xlu0 %v3210_v15 }
0x1289   :  { %3214 = vadd.xlane.f32.xlu0 %v3213_v18 }
0x12d3   :  { %v5808_v63 = vpop.xlane.xlu1 %3175 }
0x12d4   :  { %v3186_v46 = vsub.f32 %v5753_v21, %v5808_v63 }
0x12d5   :  { %v5812_v39 = vpop.xlane.xlu0 %3178 }
0x12d6   :  { %v3187_v52 = vsub.f32 %v5757_v20, %v5812_v39  ;;  %v3200_v17 = vmul.f32 1.442695, %v3186_v46 }
0x12d7   :  { %v5814_v59 = vpop.xlane.xlu1 %3169 }
0x12d8   :  { %v3184_v33 = vsub.f32 %v5755_v23, %v5814_v59  ;;  %v3202_v37 = vmul.f32 1.442695, %v3187_v52 }
0x12d9   :  { %v5820_v51 = vpop.xlane.xlu0 %3172 }
0x12da   :  { %v3196_v61 = vmul.f32 1.442695, %v3184_v33  ;;  %v3185_v30 = vsub.f32 %v5761_v62, %v5820_v51 }
0x12db   :  { %v3277_v16 = vpop.permute.xlu1 %3276 }
0x12dc   :  { %4034 = vpow2.f32 %v3196_v61  ;;  %v3198_v56 = vmul.f32 1.442695, %v3185_v30  ;;  %vm3289_vm8 = vcmp.eq.s32.totalorder %v6024_v3, %v3277_v16  ;;  %v3340_v30 = vld [vmem:[%s5920_s3] sm:$0xff] }
0x12dd   :  { %4036 = vpow2.f32 %v3200_v17  ;;  %v3590_v57 = vsel %vm3289_vm8, 1.0, %v6025_v27 }
0x12de   :  { %4038 = vpow2.f32 %v3198_v56  ;;  %v3313_v48 = vmul.f32 %v3590_v57, %v5761_v62 }
0x12df   :  { %4040 = vpow2.f32 %v3202_v37  ;;  %v3283_v7 = vpop.permute.xlu1 %3282 }
0x12e0   :  { %vm3291_vm10 = vcmp.eq.s32.totalorder %v6024_v3, %v3283_v7  ;;  %v3331_v6 = vsel %vm310_vm3, %v3313_v48, 0.0 }
0x12e1   :  { %v3280_v22 = vpop.permute.xlu0 %3279  ;;  %v3592_v2 = vsel %vm3291_vm10, 1.0, %v6025_v27 }
0x12e2   :  { %vm3290_vm9 = vcmp.eq.s32.totalorder %v6024_v3, %v3280_v22  ;;  %v3315_v58 = vmul.f32 %v3592_v2, %v5757_v20  ;;  %v3341_v3 = vld [vmem:[%s5920_s3 + $0x8] sm:$0xff] }
0x12e3   :  { %v3591_v5 = vsel %vm3290_vm9, 1.0, %v6025_v27  ;;  %v3345_v2 = vld [vmem:[%s5920_s3 + $0x28] sm:$0xff] }
0x12e4   :  { %v3314_v1 = vmul.f32 %v3591_v5, %v5753_v21  ;;  %v3337_v45 = vsel %vm310_vm3, %v3315_v58, 0.0 }
0x12e6   :  { %v4035_v34 = vpop.eup %4034  ;;  %v3334_v23 = vsel %vm310_vm3, %v3314_v1, 0.0 }
0x12e7   :  { %v4037_v49 = vpop.eup %4036  ;;  %v3216_v0 = vsel %vm310_vm3, %v4035_v34, 0.0 }
0x12e8   :  { %v4039_v19 = vpop.eup %4038  ;;  %3217 = vadd.xlane.f32.xlu1 %v3216_v0  ;;  %v3222_v36 = vsel %vm310_vm3, %v4037_v49, 0.0 }
0x12e9   :  { %v3219_v47 = vsel %vm310_vm3, %v4039_v19, 0.0  ;;  %v4041_v41 = vpop.eup %4040 }
0x12ea   :  { %3220 = vadd.xlane.f32.xlu0 %v3219_v47  ;;  %v3225_v32 = vsel %vm310_vm3, %v4041_v41, 0.0  ;;  %vm3364_vm3 = vcmask 7168  }
0x12ec   :  { %3223 = vadd.xlane.f32.xlu1 %v3222_v36 }
0x12ee   :  { %3226 = vadd.xlane.f32.xlu0 %v3225_v32 }
0x12f0   :  { %3317 = vadd.xlane.f32.xlu1 %v3316_v53 }
0x12f2   :  { %3320 = vadd.xlane.f32.xlu0 %v3319_v43 }
0x12f4   :  { %3323 = vadd.xlane.f32.xlu1 %v3322_v42 }
0x12f6   :  { %3326 = vadd.xlane.f32.xlu0 %v3325_v8 }
0x12f8   :  { %3329 = vadd.xlane.f32.xlu1 %v3328_v40 }
0x12fa   :  { %3332 = vadd.xlane.f32.xlu0 %v3331_v6 }
0x12fc   :  { %3335 = vadd.xlane.f32.xlu1 %v3334_v23 }
0x12fe   :  { %3338 = vadd.xlane.f32.xlu0 %v3337_v45 }
0x130e   :  { %v3206_v62 = vpop.xlane.xlu0 %3205 }
0x130f   :  { %4042 = vlog2.f32 %v3206_v62 }
0x1310   :  { %v3209_v14 = vpop.xlane.xlu1 %3208 }
0x1311   :  { %4044 = vlog2.f32 %v3209_v14 }
0x1312   :  { %v3212_v29 = vpop.xlane.xlu0 %3211 }
0x1313   :  { %4046 = vlog2.f32 %v3212_v29 }
0x1316   :  { %v3215_v38 = vpop.xlane.xlu0 %3214 }
0x1317   :  { %4048 = vlog2.f32 %v3215_v38 }
0x1319   :  { %v4043_v21 = vpop.eup %4042 }
0x131a   :  { %v3229_v15 = vmul.f32 0.6931472, %v4043_v21 }
0x131b   :  { %v4045_v12 = vpop.eup %4044 }
0x131c   :  { %v3231_v46 = vmul.f32 0.6931472, %v4045_v12  ;;  %v3244_v61 = vadd.f32 %v3229_v15, %v5790_v54 }
0x131d   :  { %v4047_v24 = vpop.eup %4046 }
0x131e   :  { %v3233_v17 = vmul.f32 0.6931472, %v4047_v24  ;;  %v3245_v49 = vadd.f32 %v3231_v46, %v5792_v4 }
0x1320   :  { %v3246_v27 = vadd.f32 %v3233_v17, %v5786_v44 }
0x1321   :  { %v4049_v52 = vpop.eup %4048 }
0x1322   :  { %v3235_v56 = vmul.f32 0.6931472, %v4049_v52 }
0x1324   :  { %v3247_v31 = vadd.f32 %v3235_v56, %v5800_v13  ;;  %v3344_v13 = vld [vmem:[%s5920_s3 + $0x20] sm:$0xff] }
0x1375   :  { %v3218_v11 = vpop.xlane.xlu1 %3217 }
0x1376   :  { %4050 = vlog2.f32 %v3218_v11 }
0x1377   :  { %v3221_v20 = vpop.xlane.xlu0 %3220 }
0x1378   :  { %4052 = vlog2.f32 %v3221_v20 }
0x1379   :  { %v3224_v18 = vpop.xlane.xlu1 %3223 }
0x137a   :  { %4054 = vlog2.f32 %v3224_v18 }
0x137b   :  { %v3227_v33 = vpop.xlane.xlu0 %3226 }
0x137c   :  { %4056 = vlog2.f32 %v3227_v33 }
0x137d   :  { %v3318_v37 = vpop.xlane.xlu1 %3317 }
0x137e   :  { %v3348_v34 = vsub.f32 %v3244_v61, %v3318_v37 }
0x137f   :  { %v3321_v0 = vpop.xlane.xlu0 %3320 }
0x1380   :  { %v4051_v19 = vpop.eup %4050  ;;  %v3356_v47 = vmul.f32 %v3348_v34, %v3340_v30  ;;  %v3349_v41 = vsub.f32 %v3245_v49, %v3321_v0 }
0x1381   :  { %v3237_v54 = vmul.f32 0.6931472, %v4051_v19  ;;  %v3324_v16 = vpop.xlane.xlu1 %3323 }
0x1382   :  { %v4053_v36 = vpop.eup %4052  ;;  %v3357_v60 = vmul.f32 %v3349_v41, %v3341_v3  ;;  %v3350_v4 = vsub.f32 %v3246_v27, %v3324_v16  ;;  %v3365_v53 = vsel %vm3364_vm3, %v3356_v47, 0.0 }
0x1383   :  { %v3239_v32 = vmul.f32 0.6931472, %v4053_v36  ;;  %v3327_v35 = vpop.xlane.xlu0 %3326  ;;  %v3248_v44 = vadd.f32 %v3237_v54, %v5814_v59 }
0x1384   :  { %v4055_v22 = vpop.eup %4054  ;;  %v3366_v10 = vsel %vm3364_vm3, %v3357_v60, 0.0  ;;  %v3358_v9 = vmul.f32 %v3350_v4, %v3342_v50  ;;  %v3351_v7 = vsub.f32 %v3247_v31, %v3327_v35 }
0x1385   :  { %v3241_v43 = vmul.f32 0.6931472, %v4055_v22  ;;  %v3367_v26 = vadd.f32 %v3366_v10, %v3365_v53  ;;  %v3330_v28 = vpop.xlane.xlu1 %3329  ;;  %v3249_v57 = vadd.f32 %v3239_v32, %v5820_v51  ;;  %v3346_v51 = vld [vmem:[%s5920_s3 + $0x30] sm:$0xff] }
0x1386   :  { %v4057_v42 = vpop.eup %4056  ;;  %v3368_v25 = vsel %vm3364_vm3, %v3358_v9, 0.0  ;;  %v3359_v59 = vmul.f32 %v3351_v7, %v3343_v55  ;;  %v3352_v5 = vsub.f32 %v3248_v44, %v3330_v28 }
0x1387   :  { %v3243_v8 = vmul.f32 0.6931472, %v4057_v42  ;;  %v3369_v48 = vadd.f32 %v3368_v25, %v3367_v26  ;;  %v3333_v40 = vpop.xlane.xlu0 %3332  ;;  %v3250_v1 = vadd.f32 %v3241_v43, %v5808_v63  ;;  %v3347_v63 = vld [vmem:[%s5920_s3 + $0x38] sm:$0xff]  ;;  %s4200_s3 = smov [#allocation7]  }
0x1388   :  { %v3370_v6 = vsel %vm3364_vm3, %v3359_v59, 0.0  ;;  %v3360_v58 = vmul.f32 %v3352_v5, %v3344_v13  ;;  %v3353_v23 = vsub.f32 %v3249_v57, %v3333_v40  ;;  %s3400_s10 = sshll.u32 %s4200_s3, 4  ;;  %s3401_s10 = int_to_ptr.vmem [resolvable:$true] %s3400_s10 }
0x1389   :  { %v3371_v45 = vadd.f32 %v3370_v6, %v3369_v48  ;;  %v3336_v62 = vpop.xlane.xlu1 %3335  ;;  %v3251_v29 = vadd.f32 %v3243_v8, %v5812_v39  ;;  %s4166_s24 = scalar_lea.vmem %s3401_s10, 16  ;;  %s4170_s28 = scalar_lea.vmem %s3401_s10, 32 }
0x138a   :  { %v3372_v14 = vsel %vm3364_vm3, %v3360_v58, 0.0  ;;  %v3361_v38 = vmul.f32 %v3353_v23, %v3345_v2  ;;  %v3354_v21 = vsub.f32 %v3250_v1, %v3336_v62  ;;  %p4167_p2 = scmp.ne.s32.totalorder %s3401_s10, %s4166_s24  ;;  %p4171_p3 = scmp.lt.s32.totalorder %s3401_s10, %s3401_s10 }
0x138b   :  { %v3373_v11 = vadd.f32 %v3372_v14, %v3371_v45  ;;  %v3339_v12 = vpop.xlane.xlu0 %3338  ;;  %p4172_p4 = scmp.lt.s32.totalorder %s4170_s28, %s4166_s24 }
0x138c   :  { %v3374_v20 = vsel %vm3364_vm3, %v3361_v38, 0.0  ;;  %v3362_v15 = vmul.f32 %v3354_v21, %v3346_v51  ;;  %v3355_v24 = vsub.f32 %v3251_v29, %v3339_v12 }
0x138d   :  { %v3375_v18 = vadd.f32 %v3374_v20, %v3373_v11  ;;  %p4173_p5 = por %p4172_p4, %p4171_p3 }
0x138e   :  { %v3363_v46 = vmul.f32 %v3355_v24, %v3347_v63  ;;  %v3376_v52 = vsel %vm3364_vm3, %v3362_v15, 0.0 }
0x138f   :  { %v3377_v33 = vadd.f32 %v3376_v52, %v3375_v18  ;;  %p4174_p6 = pnand %p4173_p5, %p4167_p2 }
0x1390   :  { %v3378_v39 = vsel %vm3364_vm3, %v3363_v46, 0.0 }
0x1391   :  { %v3379_v17 = vadd.f32 %v3378_v39, %v3377_v33 }
0x1393   :  { %3380 = vadd.xlane.f32.xlu1 %v3379_v17 }
0x1420   :  { %v3381_v61 = vpop.xlane.xlu1 %3380 }
0x1421   :  { %v3382_v30 = vrot.slane %v3381_v61, 4 }
0x1423   :  { %v3383_v37 = vadd.f32 %v3382_v30, %v3381_v61 }
0x1425   :  { %v3384_v56 = vrot.slane %v3383_v37, 2 }
0x1427   :  { %v3385_v34 = vadd.f32 %v3384_v56, %v3383_v37 }
0x1429   :  { %v3386_v49 = vrot.slane %v3385_v34, 1 }
0x142b   :  { %v3387_v3 = vadd.f32 %v3386_v49, %v3385_v34 }
0x142d   :  { %3629 = vpush %v3387_v3 }
0x145e   :  { %s3630_s23 = spop %3629 }
0x145f   :  { %v3389_v0 = vstv %s3630_s23 }
0x1460   :  { %v3391_v19 = vmul.f32 0.0625, %v3389_v0 }
0x1462   :  { %3393 = vst.msk [vmem:[#allocation7] sm:$0x1] %vm3392_vm11, %v3391_v19 }
0x1463   :  { %4177 = shalt.err (!%p4174_p6)
}
0x1464   :  { %s4178_s15 = scalar_lea.hbm %s5931_s14, 16 }
0x1465   :  { %p4179_p7 = scmp.ne.s32.totalorder %s5931_s14, %s4178_s15  ;;  %p4182_p8 = scmp.lt.u32.totalorder %s4178_s15, %s5931_s14 }
0x1467   :  { %p4184_p9 = pnand %p4182_p8, %p4179_p7 }
0x1469   :  { %4187 = shalt.err (!%p4184_p9)
}
0x146a   :  { %3403 = dma.vmem_to_hbm [thread:$0]  %s3401_s10, 16, %s5931_s14, [#allocation4]  }
0x146b   :  { %4192 = dma.done.wait [#allocation4], 16  }
0x146c   :  { %4193 = vsyncadd [#allocation4], 4294967280 }
0x146d   :  { %3407 = vsyncpa [#allocation3], 1 }
0x146e   :  { %3408 = vsyncpa [#allocation6], 1 }
0x146f   :  { %3409 = vsyncpa [#allocation4], 1 }

</bundles_post_ra>
